<compile_context>
chip_gen: v5e
topology: v5e:2x2
jax: 0.10.0
libtpu: 0.0.40
codegen_flags: <defaults>
</compile_context>

<pallas_src>
import functools

import jax
import jax.numpy as jnp
from jax import lax
from jax.experimental import pallas as pl
from jax.experimental.pallas import tpu as pltpu

# ----------------------------- config -----------------------------
VOCAB = 100
TYPE_VOCAB = 2
MAX_POS = 16
HIDDEN = 128
HEADS = 2
HEAD_DIM = HIDDEN // HEADS
INTER = 4 * HIDDEN
LAYERS = 2
NUM_CLASSES = 2
PAD_CLASSES = 128          # lane-dense classifier output width
LN_EPS = 1e-12
NEG_BIG = -1e9


def _vmem():
    return pl.BlockSpec(memory_space=pltpu.MemorySpace.VMEM)


# ----------------------------- fused kernel -----------------------------
def bmodel_kernel(emb_ref, amask_ref,
                  emb_ln_g, emb_ln_b,
                  wqkv, bqkv, wo, bo, ln1_g, ln1_b,
                  wi, bi, wf, bf, ln2_g, ln2_b,
                  pool_w, pool_b, fc_w, fc_b,
                  out_ref, *, batch, seq):
    T = batch * seq
    scale = 1.0 / (HEAD_DIM ** 0.5)

    def layer_norm(x, g, b):
        mu = jnp.mean(x, axis=-1, keepdims=True)
        var = jnp.mean(jnp.square(x - mu), axis=-1, keepdims=True)
        return (x - mu) * lax.rsqrt(var + LN_EPS) * g + b

    # Per-head lane masks over the hidden axis (hoisted out of the layer loop).
    lane = lax.broadcasted_iota(jnp.int32, (1, HIDDEN), 1)
    head_masks = [
        jnp.logical_and(lane >= hd * HEAD_DIM, lane < (hd + 1) * HEAD_DIM).astype(jnp.float32)
        for hd in range(HEADS)
    ]

    amask = amask_ref[...]                                   # [T, T] additive attention mask
    h = layer_norm(emb_ref[...], emb_ln_g[...], emb_ln_b[...])

    for l in range(LAYERS):
        # Fused QKV projection: one [T,H] x [H,3H] MXU pass, lane-aligned slices.
        qkv = jnp.dot(h, wqkv[l], preferred_element_type=jnp.float32) + bqkv[l]
        q = qkv[:, 0 * HIDDEN:1 * HIDDEN]
        k = qkv[:, 1 * HIDDEN:2 * HIDDEN]
        v = qkv[:, 2 * HIDDEN:3 * HIDDEN]

        ctx = jnp.zeros((T, HIDDEN), jnp.float32)
        for hm in head_masks:
            # Masked-q trick: zeroing the other head's lanes of q makes the full
            # 128-deep contraction equal the per-head (64-dim) dot product exactly,
            # avoiding unaligned lane slicing and keeping the MXU contraction wide.
            s = lax.dot_general(q * hm, k, (((1,), (1,)), ((), ())),
                                preferred_element_type=jnp.float32)
            s = s * scale + amask
            s = s - jnp.max(s, axis=-1, keepdims=True)
            p = jnp.exp(s)
            p = p * pl.reciprocal(jnp.sum(p, axis=-1, keepdims=True), approx=True)
            # p @ v is correct on this head's lanes; mask selects them.
            ctx = ctx + jnp.dot(p, v, preferred_element_type=jnp.float32) * hm

        attn_out = jnp.dot(ctx, wo[l], preferred_element_type=jnp.float32) + bo[l]
        h = layer_norm(h + attn_out, ln1_g[l], ln1_b[l])      # residual fused into LN

        inter = jnp.dot(h, wi[l], preferred_element_type=jnp.float32) + bi[l]
        # TODO(synk): HF BERT uses erf-GELU; tanh approximation used for a clean TPU lowering.
        inter = jax.nn.gelu(inter, approximate=True)
        ffn_out = jnp.dot(inter, wf[l], preferred_element_type=jnp.float32) + bf[l]
        h = layer_norm(h + ffn_out, ln2_g[l], ln2_b[l])       # residual fused into LN

    # Pooler input: first token of each sequence, gathered with a tiny selector matmul
    # (avoids sublane gather / concat ops inside the kernel).
    row = lax.broadcasted_iota(jnp.int32, (batch, T), 0)
    col = lax.broadcasted_iota(jnp.int32, (batch, T), 1)
    sel = (col == row * seq).astype(jnp.float32)              # [B, T]
    first = jnp.dot(sel, h, preferred_element_type=jnp.float32)

    pooled = jnp.tanh(jnp.dot(first, pool_w[...], preferred_element_type=jnp.float32)
                      + pool_b[...])

    # TODO(synk): F.dropout(p=0.5) is identity at inference (training-mode dropout not implemented).
    # Lane-dense classifier: fc_w zero-padded to 128 cols, fc_b padded with -1e9 so the
    # padded lanes vanish under softmax (exp underflows to 0).
    logits = jnp.dot(pooled, fc_w[...], preferred_element_type=jnp.float32) + fc_b[...]
    logits = logits - jnp.max(logits, axis=-1, keepdims=True)
    e = jnp.exp(logits)
    probs = e * pl.reciprocal(jnp.sum(e, axis=-1, keepdims=True), approx=False)
    out_ref[...] = probs.astype(out_ref.dtype)


# ----------------------------- params -----------------------------
def init_params(key):
    keys = iter(jax.random.split(key, 16))

    def w(shape):
        return 0.02 * jax.random.normal(next(keys), shape, dtype=jnp.float32)

    return {
        "word_emb": w((VOCAB, HIDDEN)),
        "pos_emb": w((MAX_POS, HIDDEN)),
        "type_emb": w((TYPE_VOCAB, HIDDEN)),
        "emb_ln_g": jnp.ones((1, HIDDEN), jnp.float32),
        "emb_ln_b": jnp.zeros((1, HIDDEN), jnp.float32),
        # per-layer weights stacked on a leading LAYERS axis (indexed statically in-kernel)
        "wqkv": w((LAYERS, HIDDEN, 3 * HIDDEN)),
        "bqkv": jnp.zeros((LAYERS, 1, 3 * HIDDEN), jnp.float32),
        "wo": w((LAYERS, HIDDEN, HIDDEN)),
        "bo": jnp.zeros((LAYERS, 1, HIDDEN), jnp.float32),
        "ln1_g": jnp.ones((LAYERS, 1, HIDDEN), jnp.float32),
        "ln1_b": jnp.zeros((LAYERS, 1, HIDDEN), jnp.float32),
        "wi": w((LAYERS, HIDDEN, INTER)),
        "bi": jnp.zeros((LAYERS, 1, INTER), jnp.float32),
        "wf": w((LAYERS, INTER, HIDDEN)),
        "bf": jnp.zeros((LAYERS, 1, HIDDEN), jnp.float32),
        "ln2_g": jnp.ones((LAYERS, 1, HIDDEN), jnp.float32),
        "ln2_b": jnp.zeros((LAYERS, 1, HIDDEN), jnp.float32),
        "pool_w": w((HIDDEN, HIDDEN)),
        "pool_b": jnp.zeros((1, HIDDEN), jnp.float32),
        "fc_w": w((HIDDEN, NUM_CLASSES)),
        "fc_b": jnp.zeros((NUM_CLASSES,), jnp.float32),
    }


# ----------------------------- forward -----------------------------
@jax.jit
def bmodel_forward(params, context, types, mask):
    B, S = context.shape
    T = B * S

    # Embedding gathers (glue) + sum; LayerNorm happens inside the fused kernel.
    word = jnp.take(params["word_emb"], context, axis=0)
    pos = params["pos_emb"][:S][None, :, :]
    tok = jnp.take(params["type_emb"], types, axis=0)
    emb = (word + pos + tok).reshape(T, HIDDEN)

    # Packed [T, T] additive attention mask: (1 - mask) * -10000 within a sequence,
    # -1e9 across sequences (excludes cross-batch attention in the packed token layout).
    km = (1.0 - mask.astype(jnp.float32)) * -10000.0                  # [B, S]
    same = jnp.eye(B, dtype=jnp.float32)                              # [Bq, Bk]
    within = jnp.broadcast_to(km[None, :, None, :], (B, B, S, S))     # [Bq, Bk, Sq, Sk]
    amask = within * same[:, :, None, None] + (1.0 - same)[:, :, None, None] * NEG_BIG
    amask = amask.transpose(0, 2, 1, 3).reshape(T, T)

    # Lane-dense padded classifier params.
    fc_w_pad = jnp.zeros((HIDDEN, PAD_CLASSES), jnp.float32).at[:, :NUM_CLASSES].set(params["fc_w"])
    fc_b_pad = jnp.full((1, PAD_CLASSES), NEG_BIG, jnp.float32).at[0, :NUM_CLASSES].set(params["fc_b"])

    operands = (
        emb, amask,
        params["emb_ln_g"], params["emb_ln_b"],
        params["wqkv"], params["bqkv"], params["wo"], params["bo"],
        params["ln1_g"], params["ln1_b"],
        params["wi"], params["bi"], params["wf"], params["bf"],
        params["ln2_g"], params["ln2_b"],
        params["pool_w"], params["pool_b"], fc_w_pad, fc_b_pad,
    )

    # Advisory cost estimate for the XLA scheduler.
    flops_layer = (2 * T * HIDDEN * 3 * HIDDEN
                   + HEADS * (2 * T * HIDDEN * T + 2 * T * T * HIDDEN)
                   + 2 * T * HIDDEN * HIDDEN
                   + 2 * T * HIDDEN * INTER + 2 * T * INTER * HIDDEN)
    flops = LAYERS * flops_layer + 2 * B * T * HIDDEN + 2 * B * HIDDEN * HIDDEN + 2 * B * HIDDEN * PAD_CLASSES
    transcendentals = LAYERS * (HEADS * T * T + T * INTER) + B * HIDDEN + B * PAD_CLASSES
    bytes_accessed = sum(int(o.size) * o.dtype.itemsize for o in operands) + B * PAD_CLASSES * 4

    out_pad = pl.pallas_call(
        functools.partial(bmodel_kernel, batch=B, seq=S),
        out_shape=jax.ShapeDtypeStruct((B, PAD_CLASSES), jnp.float32),
        in_specs=[_vmem()] * len(operands),
        out_specs=_vmem(),
        cost_estimate=pl.CostEstimate(flops=flops,
                                      transcendentals=transcendentals,
                                      bytes_accessed=bytes_accessed),
    )(*operands)

    return out_pad[:, :NUM_CLASSES]


# ----------------------------- main -----------------------------
if __name__ == "__main__":
    key = jax.random.PRNGKey(0)
    kc, kp = jax.random.split(key, 2)

    B, S = 2, 8
    context = jax.random.randint(kc, (B, S), 0, VOCAB, dtype=jnp.int32)  # token ids
    types = jnp.zeros((B, S), dtype=jnp.int32)                           # token_type_ids
    mask = jnp.ones((B, S), dtype=jnp.float32)                           # attention_mask

    params = init_params(kp)

    out = bmodel_forward(params, context, types, mask)
    out = jax.block_until_ready(out)

    assert out.shape == (B, NUM_CLASSES)
    # softmax rows must sum to 1
    assert jnp.allclose(jnp.sum(out, axis=1), 1.0, atol=1e-5)
    print("KERNEL_OK")
</pallas_src>

<mosaic_0001>
module attributes {stable_mosaic.version = 11 : i64} {
  func.func @bmodel_kernel(%arg0: memref<16x128xf32, #tpu.memory_space<vmem>>, %arg1: memref<16x16xf32, #tpu.memory_space<vmem>>, %arg2: memref<1x128xf32, #tpu.memory_space<vmem>>, %arg3: memref<1x128xf32, #tpu.memory_space<vmem>>, %arg4: memref<2x128x384xf32, #tpu.memory_space<vmem>>, %arg5: memref<2x1x384xf32, #tpu.memory_space<vmem>>, %arg6: memref<2x128x128xf32, #tpu.memory_space<vmem>>, %arg7: memref<2x1x128xf32, #tpu.memory_space<vmem>>, %arg8: memref<2x1x128xf32, #tpu.memory_space<vmem>>, %arg9: memref<2x1x128xf32, #tpu.memory_space<vmem>>, %arg10: memref<2x128x512xf32, #tpu.memory_space<vmem>>, %arg11: memref<2x1x512xf32, #tpu.memory_space<vmem>>, %arg12: memref<2x512x128xf32, #tpu.memory_space<vmem>>, %arg13: memref<2x1x128xf32, #tpu.memory_space<vmem>>, %arg14: memref<2x1x128xf32, #tpu.memory_space<vmem>>, %arg15: memref<2x1x128xf32, #tpu.memory_space<vmem>>, %arg16: memref<128x128xf32, #tpu.memory_space<vmem>>, %arg17: memref<1x128xf32, #tpu.memory_space<vmem>>, %arg18: memref<128x128xf32, #tpu.memory_space<vmem>>, %arg19: memref<1x128xf32, #tpu.memory_space<vmem>>, %arg20: memref<2x128xf32, #tpu.memory_space<vmem>>) attributes {dimension_semantics = [], scalar_prefetch = 0 : i64, scratch_operands = 0 : i64, tpu.core_type = #tpu.core_type<tc>} {
    %0 = tpu.iota {dimensions = array<i32: 1>} : vector<1x128xi32>
    %c0_i32 = arith.constant 0 : i32
    %1 = vector.broadcast %c0_i32 : i32 to vector<1x128xi32>
    %2 = arith.cmpi sge, %0, %1 : vector<1x128xi32>
    %c64_i32 = arith.constant 64 : i32
    %3 = vector.broadcast %c64_i32 : i32 to vector<1x128xi32>
    %4 = arith.cmpi slt, %0, %3 : vector<1x128xi32>
    %5 = arith.andi %2, %4 : vector<1x128xi1>
    %6 = arith.extui %5 : vector<1x128xi1> to vector<1x128xi32>
    %7 = arith.sitofp %6 : vector<1x128xi32> to vector<1x128xf32>
    %c64_i32_0 = arith.constant 64 : i32
    %8 = vector.broadcast %c64_i32_0 : i32 to vector<1x128xi32>
    %9 = arith.cmpi sge, %0, %8 : vector<1x128xi32>
    %c128_i32 = arith.constant 128 : i32
    %10 = vector.broadcast %c128_i32 : i32 to vector<1x128xi32>
    %11 = arith.cmpi slt, %0, %10 : vector<1x128xi32>
    %12 = arith.andi %9, %11 : vector<1x128xi1>
    %13 = arith.extui %12 : vector<1x128xi1> to vector<1x128xi32>
    %14 = arith.sitofp %13 : vector<1x128xi32> to vector<1x128xf32>
    %c0 = arith.constant 0 : index
    %c0_1 = arith.constant 0 : index
    %15 = vector.load %arg1[%c0, %c0_1] : memref<16x16xf32, #tpu.memory_space<vmem>>, vector<16x16xf32>
    %c0_2 = arith.constant 0 : index
    %c0_3 = arith.constant 0 : index
    %16 = vector.load %arg0[%c0_2, %c0_3] : memref<16x128xf32, #tpu.memory_space<vmem>>, vector<16x128xf32>
    %c0_4 = arith.constant 0 : index
    %c0_5 = arith.constant 0 : index
    %17 = vector.load %arg2[%c0_4, %c0_5] : memref<1x128xf32, #tpu.memory_space<vmem>>, vector<1x128xf32>
    %c0_6 = arith.constant 0 : index
    %c0_7 = arith.constant 0 : index
    %18 = vector.load %arg3[%c0_6, %c0_7] : memref<1x128xf32, #tpu.memory_space<vmem>>, vector<1x128xf32>
    %cst = arith.constant dense<0.000000e+00> : vector<16xf32>
    %19 = vector.multi_reduction <add>, %16, %cst [1] : vector<16x128xf32> to vector<16xf32>
    %20 = vector.shape_cast %19 : vector<16xf32> to vector<16x1xf32>
    %cst_8 = arith.constant 1.280000e+02 : f32
    %21 = vector.broadcast %cst_8 : f32 to vector<16x1xf32>
    %22 = arith.divf %20, %21 : vector<16x1xf32>
    %23 = vector.broadcast %22 : vector<16x1xf32> to vector<16x128xf32>
    %24 = arith.subf %16, %23 : vector<16x128xf32>
    %25 = arith.mulf %24, %24 : vector<16x128xf32>
    %cst_9 = arith.constant dense<0.000000e+00> : vector<16xf32>
    %26 = vector.multi_reduction <add>, %25, %cst_9 [1] : vector<16x128xf32> to vector<16xf32>
    %27 = vector.shape_cast %26 : vector<16xf32> to vector<16x1xf32>
    %cst_10 = arith.constant 1.280000e+02 : f32
    %28 = vector.broadcast %cst_10 : f32 to vector<16x1xf32>
    %29 = arith.divf %27, %28 : vector<16x1xf32>
    %30 = vector.broadcast %22 : vector<16x1xf32> to vector<16x128xf32>
    %31 = arith.subf %16, %30 : vector<16x128xf32>
    %cst_11 = arith.constant 9.99999996E-13 : f32
    %32 = vector.broadcast %cst_11 : f32 to vector<16x1xf32>
    %33 = arith.addf %29, %32 : vector<16x1xf32>
    %34 = math.rsqrt %33 : vector<16x1xf32>
    %35 = vector.broadcast %34 : vector<16x1xf32> to vector<16x128xf32>
    %36 = arith.mulf %31, %35 : vector<16x128xf32>
    %37 = vector.broadcast %17 : vector<1x128xf32> to vector<16x128xf32>
    %38 = arith.mulf %36, %37 : vector<16x128xf32>
    %39 = vector.broadcast %18 : vector<1x128xf32> to vector<16x128xf32>
    %40 = arith.addf %38, %39 : vector<16x128xf32>
    %c0_12 = arith.constant 0 : index
    %c0_13 = arith.constant 0 : index
    %c0_14 = arith.constant 0 : index
    %41 = vector.load %arg4[%c0_12, %c0_13, %c0_14] : memref<2x128x384xf32, #tpu.memory_space<vmem>>, vector<1x128x384xf32>
    %42 = vector.shape_cast %41 : vector<1x128x384xf32> to vector<128x384xf32>
    %cst_15 = arith.constant dense<0.000000e+00> : vector<16x384xf32>
    %43 = tpu.matmul %40, %42, %cst_15 {dimension_numbers = #tpu.dot_dimension_numbers<[1], [0], [0], [1], [0, 0, 1, 1], [], []>} : vector<16x128xf32>, vector<128x384xf32>, vector<16x384xf32> -> vector<16x384xf32>
    %c0_16 = arith.constant 0 : index
    %c0_17 = arith.constant 0 : index
    %c0_18 = arith.constant 0 : index
    %44 = vector.load %arg5[%c0_16, %c0_17, %c0_18] : memref<2x1x384xf32, #tpu.memory_space<vmem>>, vector<1x1x384xf32>
    %45 = vector.shape_cast %44 : vector<1x1x384xf32> to vector<1x384xf32>
    %46 = vector.broadcast %45 : vector<1x384xf32> to vector<16x384xf32>
    %47 = arith.addf %43, %46 : vector<16x384xf32>
    %48 = vector.extract_strided_slice %47 {offsets = [0, 0], sizes = [16, 128], strides = [1, 1]} : vector<16x384xf32> to vector<16x128xf32>
    %49 = vector.extract_strided_slice %47 {offsets = [0, 128], sizes = [16, 128], strides = [1, 1]} : vector<16x384xf32> to vector<16x128xf32>
    %50 = vector.extract_strided_slice %47 {offsets = [0, 256], sizes = [16, 128], strides = [1, 1]} : vector<16x384xf32> to vector<16x128xf32>
    %cst_19 = arith.constant 0.000000e+00 : f32
    %51 = vector.broadcast %cst_19 : f32 to vector<16x128xf32>
    %52 = vector.broadcast %7 : vector<1x128xf32> to vector<16x128xf32>
    %53 = arith.mulf %48, %52 : vector<16x128xf32>
    %cst_20 = arith.constant dense<0.000000e+00> : vector<16x16xf32>
    %54 = tpu.matmul %53, %49, %cst_20 {dimension_numbers = #tpu.dot_dimension_numbers<[1], [1], [0], [0], [0, 0, 1, 0], [], []>} : vector<16x128xf32>, vector<16x128xf32>, vector<16x16xf32> -> vector<16x16xf32>
    %cst_21 = arith.constant 1.250000e-01 : f32
    %55 = vector.broadcast %cst_21 : f32 to vector<16x16xf32>
    %56 = arith.mulf %54, %55 : vector<16x16xf32>
    %57 = arith.addf %56, %15 : vector<16x16xf32>
    %cst_22 = arith.constant dense<0xFF800000> : vector<16xf32>
    %58 = vector.multi_reduction <maximumf>, %57, %cst_22 [1] : vector<16x16xf32> to vector<16xf32>
    %59 = vector.shape_cast %58 : vector<16xf32> to vector<16x1xf32>
    %60 = vector.broadcast %59 : vector<16x1xf32> to vector<16x16xf32>
    %61 = arith.subf %57, %60 : vector<16x16xf32>
    %62 = math.exp %61 : vector<16x16xf32>
    %cst_23 = arith.constant dense<0.000000e+00> : vector<16xf32>
    %63 = vector.multi_reduction <add>, %62, %cst_23 [1] : vector<16x16xf32> to vector<16xf32>
    %64 = vector.shape_cast %63 : vector<16xf32> to vector<16x1xf32>
    %65 = tpu.reciprocal %64 {approx = true} : vector<16x1xf32> -> vector<16x1xf32>
    %66 = vector.broadcast %65 : vector<16x1xf32> to vector<16x16xf32>
    %67 = arith.mulf %62, %66 : vector<16x16xf32>
    %cst_24 = arith.constant dense<0.000000e+00> : vector<16x128xf32>
    %68 = tpu.matmul %67, %50, %cst_24 {dimension_numbers = #tpu.dot_dimension_numbers<[1], [0], [0], [1], [0, 0, 1, 1], [], []>} : vector<16x16xf32>, vector<16x128xf32>, vector<16x128xf32> -> vector<16x128xf32>
    %69 = vector.broadcast %7 : vector<1x128xf32> to vector<16x128xf32>
    %70 = arith.mulf %68, %69 : vector<16x128xf32>
    %71 = arith.addf %51, %70 : vector<16x128xf32>
    %72 = vector.broadcast %14 : vector<1x128xf32> to vector<16x128xf32>
    %73 = arith.mulf %48, %72 : vector<16x128xf32>
    %cst_25 = arith.constant dense<0.000000e+00> : vector<16x16xf32>
    %74 = tpu.matmul %73, %49, %cst_25 {dimension_numbers = #tpu.dot_dimension_numbers<[1], [1], [0], [0], [0, 0, 1, 0], [], []>} : vector<16x128xf32>, vector<16x128xf32>, vector<16x16xf32> -> vector<16x16xf32>
    %cst_26 = arith.constant 1.250000e-01 : f32
    %75 = vector.broadcast %cst_26 : f32 to vector<16x16xf32>
    %76 = arith.mulf %74, %75 : vector<16x16xf32>
    %77 = arith.addf %76, %15 : vector<16x16xf32>
    %cst_27 = arith.constant dense<0xFF800000> : vector<16xf32>
    %78 = vector.multi_reduction <maximumf>, %77, %cst_27 [1] : vector<16x16xf32> to vector<16xf32>
    %79 = vector.shape_cast %78 : vector<16xf32> to vector<16x1xf32>
    %80 = vector.broadcast %79 : vector<16x1xf32> to vector<16x16xf32>
    %81 = arith.subf %77, %80 : vector<16x16xf32>
    %82 = math.exp %81 : vector<16x16xf32>
    %cst_28 = arith.constant dense<0.000000e+00> : vector<16xf32>
    %83 = vector.multi_reduction <add>, %82, %cst_28 [1] : vector<16x16xf32> to vector<16xf32>
    %84 = vector.shape_cast %83 : vector<16xf32> to vector<16x1xf32>
    %85 = tpu.reciprocal %84 {approx = true} : vector<16x1xf32> -> vector<16x1xf32>
    %86 = vector.broadcast %85 : vector<16x1xf32> to vector<16x16xf32>
    %87 = arith.mulf %82, %86 : vector<16x16xf32>
    %cst_29 = arith.constant dense<0.000000e+00> : vector<16x128xf32>
    %88 = tpu.matmul %87, %50, %cst_29 {dimension_numbers = #tpu.dot_dimension_numbers<[1], [0], [0], [1], [0, 0, 1, 1], [], []>} : vector<16x16xf32>, vector<16x128xf32>, vector<16x128xf32> -> vector<16x128xf32>
    %89 = vector.broadcast %14 : vector<1x128xf32> to vector<16x128xf32>
    %90 = arith.mulf %88, %89 : vector<16x128xf32>
    %91 = arith.addf %71, %90 : vector<16x128xf32>
    %c0_30 = arith.constant 0 : index
    %c0_31 = arith.constant 0 : index
    %c0_32 = arith.constant 0 : index
    %92 = vector.load %arg6[%c0_30, %c0_31, %c0_32] : memref<2x128x128xf32, #tpu.memory_space<vmem>>, vector<1x128x128xf32>
    %93 = vector.shape_cast %92 : vector<1x128x128xf32> to vector<128x128xf32>
    %cst_33 = arith.constant dense<0.000000e+00> : vector<16x128xf32>
    %94 = tpu.matmul %91, %93, %cst_33 {dimension_numbers = #tpu.dot_dimension_numbers<[1], [0], [0], [1], [0, 0, 1, 1], [], []>} : vector<16x128xf32>, vector<128x128xf32>, vector<16x128xf32> -> vector<16x128xf32>
    %c0_34 = arith.constant 0 : index
    %c0_35 = arith.constant 0 : index
    %c0_36 = arith.constant 0 : index
    %95 = vector.load %arg7[%c0_34, %c0_35, %c0_36] : memref<2x1x128xf32, #tpu.memory_space<vmem>>, vector<1x1x128xf32>
    %96 = vector.shape_cast %95 : vector<1x1x128xf32> to vector<1x128xf32>
    %97 = vector.broadcast %96 : vector<1x128xf32> to vector<16x128xf32>
    %98 = arith.addf %94, %97 : vector<16x128xf32>
    %99 = arith.addf %40, %98 : vector<16x128xf32>
    %c0_37 = arith.constant 0 : index
    %c0_38 = arith.constant 0 : index
    %c0_39 = arith.constant 0 : index
    %100 = vector.load %arg8[%c0_37, %c0_38, %c0_39] : memref<2x1x128xf32, #tpu.memory_space<vmem>>, vector<1x1x128xf32>
    %101 = vector.shape_cast %100 : vector<1x1x128xf32> to vector<1x128xf32>
    %c0_40 = arith.constant 0 : index
    %c0_41 = arith.constant 0 : index
    %c0_42 = arith.constant 0 : index
    %102 = vector.load %arg9[%c0_40, %c0_41, %c0_42] : memref<2x1x128xf32, #tpu.memory_space<vmem>>, vector<1x1x128xf32>
    %103 = vector.shape_cast %102 : vector<1x1x128xf32> to vector<1x128xf32>
    %cst_43 = arith.constant dense<0.000000e+00> : vector<16xf32>
    %104 = vector.multi_reduction <add>, %99, %cst_43 [1] : vector<16x128xf32> to vector<16xf32>
    %105 = vector.shape_cast %104 : vector<16xf32> to vector<16x1xf32>
    %cst_44 = arith.constant 1.280000e+02 : f32
    %106 = vector.broadcast %cst_44 : f32 to vector<16x1xf32>
    %107 = arith.divf %105, %106 : vector<16x1xf32>
    %108 = vector.broadcast %107 : vector<16x1xf32> to vector<16x128xf32>
    %109 = arith.subf %99, %108 : vector<16x128xf32>
    %110 = arith.mulf %109, %109 : vector<16x128xf32>
    %cst_45 = arith.constant dense<0.000000e+00> : vector<16xf32>
    %111 = vector.multi_reduction <add>, %110, %cst_45 [1] : vector<16x128xf32> to vector<16xf32>
    %112 = vector.shape_cast %111 : vector<16xf32> to vector<16x1xf32>
    %cst_46 = arith.constant 1.280000e+02 : f32
    %113 = vector.broadcast %cst_46 : f32 to vector<16x1xf32>
    %114 = arith.divf %112, %113 : vector<16x1xf32>
    %115 = vector.broadcast %107 : vector<16x1xf32> to vector<16x128xf32>
    %116 = arith.subf %99, %115 : vector<16x128xf32>
    %cst_47 = arith.constant 9.99999996E-13 : f32
    %117 = vector.broadcast %cst_47 : f32 to vector<16x1xf32>
    %118 = arith.addf %114, %117 : vector<16x1xf32>
    %119 = math.rsqrt %118 : vector<16x1xf32>
    %120 = vector.broadcast %119 : vector<16x1xf32> to vector<16x128xf32>
    %121 = arith.mulf %116, %120 : vector<16x128xf32>
    %122 = vector.broadcast %101 : vector<1x128xf32> to vector<16x128xf32>
    %123 = arith.mulf %121, %122 : vector<16x128xf32>
    %124 = vector.broadcast %103 : vector<1x128xf32> to vector<16x128xf32>
    %125 = arith.addf %123, %124 : vector<16x128xf32>
    %c0_48 = arith.constant 0 : index
    %c0_49 = arith.constant 0 : index
    %c0_50 = arith.constant 0 : index
    %126 = vector.load %arg10[%c0_48, %c0_49, %c0_50] : memref<2x128x512xf32, #tpu.memory_space<vmem>>, vector<1x128x512xf32>
    %127 = vector.shape_cast %126 : vector<1x128x512xf32> to vector<128x512xf32>
    %cst_51 = arith.constant dense<0.000000e+00> : vector<16x512xf32>
    %128 = tpu.matmul %125, %127, %cst_51 {dimension_numbers = #tpu.dot_dimension_numbers<[1], [0], [0], [1], [0, 0, 1, 1], [], []>} : vector<16x128xf32>, vector<128x512xf32>, vector<16x512xf32> -> vector<16x512xf32>
    %c0_52 = arith.constant 0 : index
    %c0_53 = arith.constant 0 : index
    %c0_54 = arith.constant 0 : index
    %129 = vector.load %arg11[%c0_52, %c0_53, %c0_54] : memref<2x1x512xf32, #tpu.memory_space<vmem>>, vector<1x1x512xf32>
    %130 = vector.shape_cast %129 : vector<1x1x512xf32> to vector<1x512xf32>
    %131 = vector.broadcast %130 : vector<1x512xf32> to vector<16x512xf32>
    %132 = arith.addf %128, %131 : vector<16x512xf32>
    %133 = arith.mulf %132, %132 : vector<16x512xf32>
    %134 = arith.mulf %132, %133 : vector<16x512xf32>
    %cst_55 = arith.constant 4.471500e-02 : f32
    %135 = vector.broadcast %cst_55 : f32 to vector<16x512xf32>
    %136 = arith.mulf %135, %134 : vector<16x512xf32>
    %137 = arith.addf %132, %136 : vector<16x512xf32>
    %cst_56 = arith.constant 0.797884583 : f32
    %138 = vector.broadcast %cst_56 : f32 to vector<16x512xf32>
    %139 = arith.mulf %138, %137 : vector<16x512xf32>
    %140 = math.tanh %139 : vector<16x512xf32>
    %cst_57 = arith.constant 1.000000e+00 : f32
    %141 = vector.broadcast %cst_57 : f32 to vector<16x512xf32>
    %142 = arith.addf %141, %140 : vector<16x512xf32>
    %cst_58 = arith.constant 5.000000e-01 : f32
    %143 = vector.broadcast %cst_58 : f32 to vector<16x512xf32>
    %144 = arith.mulf %143, %142 : vector<16x512xf32>
    %145 = arith.mulf %132, %144 : vector<16x512xf32>
    %c0_59 = arith.constant 0 : index
    %c0_60 = arith.constant 0 : index
    %c0_61 = arith.constant 0 : index
    %146 = vector.load %arg12[%c0_59, %c0_60, %c0_61] : memref<2x512x128xf32, #tpu.memory_space<vmem>>, vector<1x512x128xf32>
    %147 = vector.shape_cast %146 : vector<1x512x128xf32> to vector<512x128xf32>
    %cst_62 = arith.constant dense<0.000000e+00> : vector<16x128xf32>
    %148 = tpu.matmul %145, %147, %cst_62 {dimension_numbers = #tpu.dot_dimension_numbers<[1], [0], [0], [1], [0, 0, 1, 1], [], []>} : vector<16x512xf32>, vector<512x128xf32>, vector<16x128xf32> -> vector<16x128xf32>
    %c0_63 = arith.constant 0 : index
    %c0_64 = arith.constant 0 : index
    %c0_65 = arith.constant 0 : index
    %149 = vector.load %arg13[%c0_63, %c0_64, %c0_65] : memref<2x1x128xf32, #tpu.memory_space<vmem>>, vector<1x1x128xf32>
    %150 = vector.shape_cast %149 : vector<1x1x128xf32> to vector<1x128xf32>
    %151 = vector.broadcast %150 : vector<1x128xf32> to vector<16x128xf32>
    %152 = arith.addf %148, %151 : vector<16x128xf32>
    %153 = arith.addf %125, %152 : vector<16x128xf32>
    %c0_66 = arith.constant 0 : index
    %c0_67 = arith.constant 0 : index
    %c0_68 = arith.constant 0 : index
    %154 = vector.load %arg14[%c0_66, %c0_67, %c0_68] : memref<2x1x128xf32, #tpu.memory_space<vmem>>, vector<1x1x128xf32>
    %155 = vector.shape_cast %154 : vector<1x1x128xf32> to vector<1x128xf32>
    %c0_69 = arith.constant 0 : index
    %c0_70 = arith.constant 0 : index
    %c0_71 = arith.constant 0 : index
    %156 = vector.load %arg15[%c0_69, %c0_70, %c0_71] : memref<2x1x128xf32, #tpu.memory_space<vmem>>, vector<1x1x128xf32>
    %157 = vector.shape_cast %156 : vector<1x1x128xf32> to vector<1x128xf32>
    %cst_72 = arith.constant dense<0.000000e+00> : vector<16xf32>
    %158 = vector.multi_reduction <add>, %153, %cst_72 [1] : vector<16x128xf32> to vector<16xf32>
    %159 = vector.shape_cast %158 : vector<16xf32> to vector<16x1xf32>
    %cst_73 = arith.constant 1.280000e+02 : f32
    %160 = vector.broadcast %cst_73 : f32 to vector<16x1xf32>
    %161 = arith.divf %159, %160 : vector<16x1xf32>
    %162 = vector.broadcast %161 : vector<16x1xf32> to vector<16x128xf32>
    %163 = arith.subf %153, %162 : vector<16x128xf32>
    %164 = arith.mulf %163, %163 : vector<16x128xf32>
    %cst_74 = arith.constant dense<0.000000e+00> : vector<16xf32>
    %165 = vector.multi_reduction <add>, %164, %cst_74 [1] : vector<16x128xf32> to vector<16xf32>
    %166 = vector.shape_cast %165 : vector<16xf32> to vector<16x1xf32>
    %cst_75 = arith.constant 1.280000e+02 : f32
    %167 = vector.broadcast %cst_75 : f32 to vector<16x1xf32>
    %168 = arith.divf %166, %167 : vector<16x1xf32>
    %169 = vector.broadcast %161 : vector<16x1xf32> to vector<16x128xf32>
    %170 = arith.subf %153, %169 : vector<16x128xf32>
    %cst_76 = arith.constant 9.99999996E-13 : f32
    %171 = vector.broadcast %cst_76 : f32 to vector<16x1xf32>
    %172 = arith.addf %168, %171 : vector<16x1xf32>
    %173 = math.rsqrt %172 : vector<16x1xf32>
    %174 = vector.broadcast %173 : vector<16x1xf32> to vector<16x128xf32>
    %175 = arith.mulf %170, %174 : vector<16x128xf32>
    %176 = vector.broadcast %155 : vector<1x128xf32> to vector<16x128xf32>
    %177 = arith.mulf %175, %176 : vector<16x128xf32>
    %178 = vector.broadcast %157 : vector<1x128xf32> to vector<16x128xf32>
    %179 = arith.addf %177, %178 : vector<16x128xf32>
    %c1 = arith.constant 1 : index
    %c0_77 = arith.constant 0 : index
    %c0_78 = arith.constant 0 : index
    %180 = vector.load %arg4[%c1, %c0_77, %c0_78] : memref<2x128x384xf32, #tpu.memory_space<vmem>>, vector<1x128x384xf32>
    %181 = vector.shape_cast %180 : vector<1x128x384xf32> to vector<128x384xf32>
    %cst_79 = arith.constant dense<0.000000e+00> : vector<16x384xf32>
    %182 = tpu.matmul %179, %181, %cst_79 {dimension_numbers = #tpu.dot_dimension_numbers<[1], [0], [0], [1], [0, 0, 1, 1], [], []>} : vector<16x128xf32>, vector<128x384xf32>, vector<16x384xf32> -> vector<16x384xf32>
    %c1_80 = arith.constant 1 : index
    %c0_81 = arith.constant 0 : index
    %c0_82 = arith.constant 0 : index
    %183 = vector.load %arg5[%c1_80, %c0_81, %c0_82] : memref<2x1x384xf32, #tpu.memory_space<vmem>>, vector<1x1x384xf32>
    %184 = vector.shape_cast %183 : vector<1x1x384xf32> to vector<1x384xf32>
    %185 = vector.broadcast %184 : vector<1x384xf32> to vector<16x384xf32>
    %186 = arith.addf %182, %185 : vector<16x384xf32>
    %187 = vector.extract_strided_slice %186 {offsets = [0, 0], sizes = [16, 128], strides = [1, 1]} : vector<16x384xf32> to vector<16x128xf32>
    %188 = vector.extract_strided_slice %186 {offsets = [0, 128], sizes = [16, 128], strides = [1, 1]} : vector<16x384xf32> to vector<16x128xf32>
    %189 = vector.extract_strided_slice %186 {offsets = [0, 256], sizes = [16, 128], strides = [1, 1]} : vector<16x384xf32> to vector<16x128xf32>
    %cst_83 = arith.constant 0.000000e+00 : f32
    %190 = vector.broadcast %cst_83 : f32 to vector<16x128xf32>
    %191 = vector.broadcast %7 : vector<1x128xf32> to vector<16x128xf32>
    %192 = arith.mulf %187, %191 : vector<16x128xf32>
    %cst_84 = arith.constant dense<0.000000e+00> : vector<16x16xf32>
    %193 = tpu.matmul %192, %188, %cst_84 {dimension_numbers = #tpu.dot_dimension_numbers<[1], [1], [0], [0], [0, 0, 1, 0], [], []>} : vector<16x128xf32>, vector<16x128xf32>, vector<16x16xf32> -> vector<16x16xf32>
    %cst_85 = arith.constant 1.250000e-01 : f32
    %194 = vector.broadcast %cst_85 : f32 to vector<16x16xf32>
    %195 = arith.mulf %193, %194 : vector<16x16xf32>
    %196 = arith.addf %195, %15 : vector<16x16xf32>
    %cst_86 = arith.constant dense<0xFF800000> : vector<16xf32>
    %197 = vector.multi_reduction <maximumf>, %196, %cst_86 [1] : vector<16x16xf32> to vector<16xf32>
    %198 = vector.shape_cast %197 : vector<16xf32> to vector<16x1xf32>
    %199 = vector.broadcast %198 : vector<16x1xf32> to vector<16x16xf32>
    %200 = arith.subf %196, %199 : vector<16x16xf32>
    %201 = math.exp %200 : vector<16x16xf32>
    %cst_87 = arith.constant dense<0.000000e+00> : vector<16xf32>
    %202 = vector.multi_reduction <add>, %201, %cst_87 [1] : vector<16x16xf32> to vector<16xf32>
    %203 = vector.shape_cast %202 : vector<16xf32> to vector<16x1xf32>
    %204 = tpu.reciprocal %203 {approx = true} : vector<16x1xf32> -> vector<16x1xf32>
    %205 = vector.broadcast %204 : vector<16x1xf32> to vector<16x16xf32>
    %206 = arith.mulf %201, %205 : vector<16x16xf32>
    %cst_88 = arith.constant dense<0.000000e+00> : vector<16x128xf32>
    %207 = tpu.matmul %206, %189, %cst_88 {dimension_numbers = #tpu.dot_dimension_numbers<[1], [0], [0], [1], [0, 0, 1, 1], [], []>} : vector<16x16xf32>, vector<16x128xf32>, vector<16x128xf32> -> vector<16x128xf32>
    %208 = vector.broadcast %7 : vector<1x128xf32> to vector<16x128xf32>
    %209 = arith.mulf %207, %208 : vector<16x128xf32>
    %210 = arith.addf %190, %209 : vector<16x128xf32>
    %211 = vector.broadcast %14 : vector<1x128xf32> to vector<16x128xf32>
    %212 = arith.mulf %187, %211 : vector<16x128xf32>
    %cst_89 = arith.constant dense<0.000000e+00> : vector<16x16xf32>
    %213 = tpu.matmul %212, %188, %cst_89 {dimension_numbers = #tpu.dot_dimension_numbers<[1], [1], [0], [0], [0, 0, 1, 0], [], []>} : vector<16x128xf32>, vector<16x128xf32>, vector<16x16xf32> -> vector<16x16xf32>
    %cst_90 = arith.constant 1.250000e-01 : f32
    %214 = vector.broadcast %cst_90 : f32 to vector<16x16xf32>
    %215 = arith.mulf %213, %214 : vector<16x16xf32>
    %216 = arith.addf %215, %15 : vector<16x16xf32>
    %cst_91 = arith.constant dense<0xFF800000> : vector<16xf32>
    %217 = vector.multi_reduction <maximumf>, %216, %cst_91 [1] : vector<16x16xf32> to vector<16xf32>
    %218 = vector.shape_cast %217 : vector<16xf32> to vector<16x1xf32>
    %219 = vector.broadcast %218 : vector<16x1xf32> to vector<16x16xf32>
    %220 = arith.subf %216, %219 : vector<16x16xf32>
    %221 = math.exp %220 : vector<16x16xf32>
    %cst_92 = arith.constant dense<0.000000e+00> : vector<16xf32>
    %222 = vector.multi_reduction <add>, %221, %cst_92 [1] : vector<16x16xf32> to vector<16xf32>
    %223 = vector.shape_cast %222 : vector<16xf32> to vector<16x1xf32>
    %224 = tpu.reciprocal %223 {approx = true} : vector<16x1xf32> -> vector<16x1xf32>
    %225 = vector.broadcast %224 : vector<16x1xf32> to vector<16x16xf32>
    %226 = arith.mulf %221, %225 : vector<16x16xf32>
    %cst_93 = arith.constant dense<0.000000e+00> : vector<16x128xf32>
    %227 = tpu.matmul %226, %189, %cst_93 {dimension_numbers = #tpu.dot_dimension_numbers<[1], [0], [0], [1], [0, 0, 1, 1], [], []>} : vector<16x16xf32>, vector<16x128xf32>, vector<16x128xf32> -> vector<16x128xf32>
    %228 = vector.broadcast %14 : vector<1x128xf32> to vector<16x128xf32>
    %229 = arith.mulf %227, %228 : vector<16x128xf32>
    %230 = arith.addf %210, %229 : vector<16x128xf32>
    %c1_94 = arith.constant 1 : index
    %c0_95 = arith.constant 0 : index
    %c0_96 = arith.constant 0 : index
    %231 = vector.load %arg6[%c1_94, %c0_95, %c0_96] : memref<2x128x128xf32, #tpu.memory_space<vmem>>, vector<1x128x128xf32>
    %232 = vector.shape_cast %231 : vector<1x128x128xf32> to vector<128x128xf32>
    %cst_97 = arith.constant dense<0.000000e+00> : vector<16x128xf32>
    %233 = tpu.matmul %230, %232, %cst_97 {dimension_numbers = #tpu.dot_dimension_numbers<[1], [0], [0], [1], [0, 0, 1, 1], [], []>} : vector<16x128xf32>, vector<128x128xf32>, vector<16x128xf32> -> vector<16x128xf32>
    %c1_98 = arith.constant 1 : index
    %c0_99 = arith.constant 0 : index
    %c0_100 = arith.constant 0 : index
    %234 = vector.load %arg7[%c1_98, %c0_99, %c0_100] : memref<2x1x128xf32, #tpu.memory_space<vmem>>, vector<1x1x128xf32>
    %235 = vector.shape_cast %234 : vector<1x1x128xf32> to vector<1x128xf32>
    %236 = vector.broadcast %235 : vector<1x128xf32> to vector<16x128xf32>
    %237 = arith.addf %233, %236 : vector<16x128xf32>
    %238 = arith.addf %179, %237 : vector<16x128xf32>
    %c1_101 = arith.constant 1 : index
    %c0_102 = arith.constant 0 : index
    %c0_103 = arith.constant 0 : index
    %239 = vector.load %arg8[%c1_101, %c0_102, %c0_103] : memref<2x1x128xf32, #tpu.memory_space<vmem>>, vector<1x1x128xf32>
    %240 = vector.shape_cast %239 : vector<1x1x128xf32> to vector<1x128xf32>
    %c1_104 = arith.constant 1 : index
    %c0_105 = arith.constant 0 : index
    %c0_106 = arith.constant 0 : index
    %241 = vector.load %arg9[%c1_104, %c0_105, %c0_106] : memref<2x1x128xf32, #tpu.memory_space<vmem>>, vector<1x1x128xf32>
    %242 = vector.shape_cast %241 : vector<1x1x128xf32> to vector<1x128xf32>
    %cst_107 = arith.constant dense<0.000000e+00> : vector<16xf32>
    %243 = vector.multi_reduction <add>, %238, %cst_107 [1] : vector<16x128xf32> to vector<16xf32>
    %244 = vector.shape_cast %243 : vector<16xf32> to vector<16x1xf32>
    %cst_108 = arith.constant 1.280000e+02 : f32
    %245 = vector.broadcast %cst_108 : f32 to vector<16x1xf32>
    %246 = arith.divf %244, %245 : vector<16x1xf32>
    %247 = vector.broadcast %246 : vector<16x1xf32> to vector<16x128xf32>
    %248 = arith.subf %238, %247 : vector<16x128xf32>
    %249 = arith.mulf %248, %248 : vector<16x128xf32>
    %cst_109 = arith.constant dense<0.000000e+00> : vector<16xf32>
    %250 = vector.multi_reduction <add>, %249, %cst_109 [1] : vector<16x128xf32> to vector<16xf32>
    %251 = vector.shape_cast %250 : vector<16xf32> to vector<16x1xf32>
    %cst_110 = arith.constant 1.280000e+02 : f32
    %252 = vector.broadcast %cst_110 : f32 to vector<16x1xf32>
    %253 = arith.divf %251, %252 : vector<16x1xf32>
    %254 = vector.broadcast %246 : vector<16x1xf32> to vector<16x128xf32>
    %255 = arith.subf %238, %254 : vector<16x128xf32>
    %cst_111 = arith.constant 9.99999996E-13 : f32
    %256 = vector.broadcast %cst_111 : f32 to vector<16x1xf32>
    %257 = arith.addf %253, %256 : vector<16x1xf32>
    %258 = math.rsqrt %257 : vector<16x1xf32>
    %259 = vector.broadcast %258 : vector<16x1xf32> to vector<16x128xf32>
    %260 = arith.mulf %255, %259 : vector<16x128xf32>
    %261 = vector.broadcast %240 : vector<1x128xf32> to vector<16x128xf32>
    %262 = arith.mulf %260, %261 : vector<16x128xf32>
    %263 = vector.broadcast %242 : vector<1x128xf32> to vector<16x128xf32>
    %264 = arith.addf %262, %263 : vector<16x128xf32>
    %c1_112 = arith.constant 1 : index
    %c0_113 = arith.constant 0 : index
    %c0_114 = arith.constant 0 : index
    %265 = vector.load %arg10[%c1_112, %c0_113, %c0_114] : memref<2x128x512xf32, #tpu.memory_space<vmem>>, vector<1x128x512xf32>
    %266 = vector.shape_cast %265 : vector<1x128x512xf32> to vector<128x512xf32>
    %cst_115 = arith.constant dense<0.000000e+00> : vector<16x512xf32>
    %267 = tpu.matmul %264, %266, %cst_115 {dimension_numbers = #tpu.dot_dimension_numbers<[1], [0], [0], [1], [0, 0, 1, 1], [], []>} : vector<16x128xf32>, vector<128x512xf32>, vector<16x512xf32> -> vector<16x512xf32>
    %c1_116 = arith.constant 1 : index
    %c0_117 = arith.constant 0 : index
    %c0_118 = arith.constant 0 : index
    %268 = vector.load %arg11[%c1_116, %c0_117, %c0_118] : memref<2x1x512xf32, #tpu.memory_space<vmem>>, vector<1x1x512xf32>
    %269 = vector.shape_cast %268 : vector<1x1x512xf32> to vector<1x512xf32>
    %270 = vector.broadcast %269 : vector<1x512xf32> to vector<16x512xf32>
    %271 = arith.addf %267, %270 : vector<16x512xf32>
    %272 = arith.mulf %271, %271 : vector<16x512xf32>
    %273 = arith.mulf %271, %272 : vector<16x512xf32>
    %cst_119 = arith.constant 4.471500e-02 : f32
    %274 = vector.broadcast %cst_119 : f32 to vector<16x512xf32>
    %275 = arith.mulf %274, %273 : vector<16x512xf32>
    %276 = arith.addf %271, %275 : vector<16x512xf32>
    %cst_120 = arith.constant 0.797884583 : f32
    %277 = vector.broadcast %cst_120 : f32 to vector<16x512xf32>
    %278 = arith.mulf %277, %276 : vector<16x512xf32>
    %279 = math.tanh %278 : vector<16x512xf32>
    %cst_121 = arith.constant 1.000000e+00 : f32
    %280 = vector.broadcast %cst_121 : f32 to vector<16x512xf32>
    %281 = arith.addf %280, %279 : vector<16x512xf32>
    %cst_122 = arith.constant 5.000000e-01 : f32
    %282 = vector.broadcast %cst_122 : f32 to vector<16x512xf32>
    %283 = arith.mulf %282, %281 : vector<16x512xf32>
    %284 = arith.mulf %271, %283 : vector<16x512xf32>
    %c1_123 = arith.constant 1 : index
    %c0_124 = arith.constant 0 : index
    %c0_125 = arith.constant 0 : index
    %285 = vector.load %arg12[%c1_123, %c0_124, %c0_125] : memref<2x512x128xf32, #tpu.memory_space<vmem>>, vector<1x512x128xf32>
    %286 = vector.shape_cast %285 : vector<1x512x128xf32> to vector<512x128xf32>
    %cst_126 = arith.constant dense<0.000000e+00> : vector<16x128xf32>
    %287 = tpu.matmul %284, %286, %cst_126 {dimension_numbers = #tpu.dot_dimension_numbers<[1], [0], [0], [1], [0, 0, 1, 1], [], []>} : vector<16x512xf32>, vector<512x128xf32>, vector<16x128xf32> -> vector<16x128xf32>
    %c1_127 = arith.constant 1 : index
    %c0_128 = arith.constant 0 : index
    %c0_129 = arith.constant 0 : index
    %288 = vector.load %arg13[%c1_127, %c0_128, %c0_129] : memref<2x1x128xf32, #tpu.memory_space<vmem>>, vector<1x1x128xf32>
    %289 = vector.shape_cast %288 : vector<1x1x128xf32> to vector<1x128xf32>
    %290 = vector.broadcast %289 : vector<1x128xf32> to vector<16x128xf32>
    %291 = arith.addf %287, %290 : vector<16x128xf32>
    %292 = arith.addf %264, %291 : vector<16x128xf32>
    %c1_130 = arith.constant 1 : index
    %c0_131 = arith.constant 0 : index
    %c0_132 = arith.constant 0 : index
    %293 = vector.load %arg14[%c1_130, %c0_131, %c0_132] : memref<2x1x128xf32, #tpu.memory_space<vmem>>, vector<1x1x128xf32>
    %294 = vector.shape_cast %293 : vector<1x1x128xf32> to vector<1x128xf32>
    %c1_133 = arith.constant 1 : index
    %c0_134 = arith.constant 0 : index
    %c0_135 = arith.constant 0 : index
    %295 = vector.load %arg15[%c1_133, %c0_134, %c0_135] : memref<2x1x128xf32, #tpu.memory_space<vmem>>, vector<1x1x128xf32>
    %296 = vector.shape_cast %295 : vector<1x1x128xf32> to vector<1x128xf32>
    %cst_136 = arith.constant dense<0.000000e+00> : vector<16xf32>
    %297 = vector.multi_reduction <add>, %292, %cst_136 [1] : vector<16x128xf32> to vector<16xf32>
    %298 = vector.shape_cast %297 : vector<16xf32> to vector<16x1xf32>
    %cst_137 = arith.constant 1.280000e+02 : f32
    %299 = vector.broadcast %cst_137 : f32 to vector<16x1xf32>
    %300 = arith.divf %298, %299 : vector<16x1xf32>
    %301 = vector.broadcast %300 : vector<16x1xf32> to vector<16x128xf32>
    %302 = arith.subf %292, %301 : vector<16x128xf32>
    %303 = arith.mulf %302, %302 : vector<16x128xf32>
    %cst_138 = arith.constant dense<0.000000e+00> : vector<16xf32>
    %304 = vector.multi_reduction <add>, %303, %cst_138 [1] : vector<16x128xf32> to vector<16xf32>
    %305 = vector.shape_cast %304 : vector<16xf32> to vector<16x1xf32>
    %cst_139 = arith.constant 1.280000e+02 : f32
    %306 = vector.broadcast %cst_139 : f32 to vector<16x1xf32>
    %307 = arith.divf %305, %306 : vector<16x1xf32>
    %308 = vector.broadcast %300 : vector<16x1xf32> to vector<16x128xf32>
    %309 = arith.subf %292, %308 : vector<16x128xf32>
    %cst_140 = arith.constant 9.99999996E-13 : f32
    %310 = vector.broadcast %cst_140 : f32 to vector<16x1xf32>
    %311 = arith.addf %307, %310 : vector<16x1xf32>
    %312 = math.rsqrt %311 : vector<16x1xf32>
    %313 = vector.broadcast %312 : vector<16x1xf32> to vector<16x128xf32>
    %314 = arith.mulf %309, %313 : vector<16x128xf32>
    %315 = vector.broadcast %294 : vector<1x128xf32> to vector<16x128xf32>
    %316 = arith.mulf %314, %315 : vector<16x128xf32>
    %317 = vector.broadcast %296 : vector<1x128xf32> to vector<16x128xf32>
    %318 = arith.addf %316, %317 : vector<16x128xf32>
    %319 = tpu.iota {dimensions = array<i32: 0>} : vector<2x16xi32>
    %320 = tpu.iota {dimensions = array<i32: 1>} : vector<2x16xi32>
    %c8_i32 = arith.constant 8 : i32
    %321 = vector.broadcast %c8_i32 : i32 to vector<2x16xi32>
    %322 = arith.muli %319, %321 : vector<2x16xi32>
    %323 = arith.cmpi eq, %320, %322 : vector<2x16xi32>
    %324 = arith.extui %323 : vector<2x16xi1> to vector<2x16xi32>
    %325 = arith.sitofp %324 : vector<2x16xi32> to vector<2x16xf32>
    %cst_141 = arith.constant dense<0.000000e+00> : vector<2x128xf32>
    %326 = tpu.matmul %325, %318, %cst_141 {dimension_numbers = #tpu.dot_dimension_numbers<[1], [0], [0], [1], [0, 0, 1, 1], [], []>} : vector<2x16xf32>, vector<16x128xf32>, vector<2x128xf32> -> vector<2x128xf32>
    %c0_142 = arith.constant 0 : index
    %c0_143 = arith.constant 0 : index
    %327 = vector.load %arg16[%c0_142, %c0_143] : memref<128x128xf32, #tpu.memory_space<vmem>>, vector<128x128xf32>
    %cst_144 = arith.constant dense<0.000000e+00> : vector<2x128xf32>
    %328 = tpu.matmul %326, %327, %cst_144 {dimension_numbers = #tpu.dot_dimension_numbers<[1], [0], [0], [1], [0, 0, 1, 1], [], []>} : vector<2x128xf32>, vector<128x128xf32>, vector<2x128xf32> -> vector<2x128xf32>
    %c0_145 = arith.constant 0 : index
    %c0_146 = arith.constant 0 : index
    %329 = vector.load %arg17[%c0_145, %c0_146] : memref<1x128xf32, #tpu.memory_space<vmem>>, vector<1x128xf32>
    %330 = vector.broadcast %329 : vector<1x128xf32> to vector<2x128xf32>
    %331 = arith.addf %328, %330 : vector<2x128xf32>
    %332 = math.tanh %331 : vector<2x128xf32>
    %c0_147 = arith.constant 0 : index
    %c0_148 = arith.constant 0 : index
    %333 = vector.load %arg18[%c0_147, %c0_148] : memref<128x128xf32, #tpu.memory_space<vmem>>, vector<128x128xf32>
    %cst_149 = arith.constant dense<0.000000e+00> : vector<2x128xf32>
    %334 = tpu.matmul %332, %333, %cst_149 {dimension_numbers = #tpu.dot_dimension_numbers<[1], [0], [0], [1], [0, 0, 1, 1], [], []>} : vector<2x128xf32>, vector<128x128xf32>, vector<2x128xf32> -> vector<2x128xf32>
    %c0_150 = arith.constant 0 : index
    %c0_151 = arith.constant 0 : index
    %335 = vector.load %arg19[%c0_150, %c0_151] : memref<1x128xf32, #tpu.memory_space<vmem>>, vector<1x128xf32>
    %336 = vector.broadcast %335 : vector<1x128xf32> to vector<2x128xf32>
    %337 = arith.addf %334, %336 : vector<2x128xf32>
    %cst_152 = arith.constant dense<0xFF800000> : vector<2xf32>
    %338 = vector.multi_reduction <maximumf>, %337, %cst_152 [1] : vector<2x128xf32> to vector<2xf32>
    %339 = vector.shape_cast %338 : vector<2xf32> to vector<2x1xf32>
    %340 = vector.broadcast %339 : vector<2x1xf32> to vector<2x128xf32>
    %341 = arith.subf %337, %340 : vector<2x128xf32>
    %342 = math.exp %341 : vector<2x128xf32>
    %cst_153 = arith.constant dense<0.000000e+00> : vector<2xf32>
    %343 = vector.multi_reduction <add>, %342, %cst_153 [1] : vector<2x128xf32> to vector<2xf32>
    %344 = vector.shape_cast %343 : vector<2xf32> to vector<2x1xf32>
    %345 = tpu.reciprocal %344 : vector<2x1xf32> -> vector<2x1xf32>
    %346 = vector.broadcast %345 : vector<2x1xf32> to vector<2x128xf32>
    %347 = arith.mulf %342, %346 : vector<2x128xf32>
    %c0_154 = arith.constant 0 : index
    %c0_155 = arith.constant 0 : index
    %348 = vector.load %arg20[%c0_154, %c0_155] : memref<2x128xf32, #tpu.memory_space<vmem>>, vector<2x128xf32>
    tpu.vector_store %arg20[%c0_154, %c0_155], %347 {strides = array<i32>} : memref<2x128xf32, #tpu.memory_space<vmem>>, vector<2x128xf32>,
    return
  }
}

</mosaic_0001>

<bundles_post_ra>
// kernel: bmodel_forward.1
= control target key start
LH: loop header
LB: loop body
LE: loop exit
PB: predicated region body
PF: predicated region fallthrough
CT: control target
= control target key end

     0   :  { %s3289_s0 = inlined_call_operand.vmem [shape: f32[16,128], index: 0, kind: input, shape index: {}]   ;;  %s3290_s1 = inlined_call_operand.vmem [shape: f32[16,16], index: 1, kind: input, shape index: {}]   ;;  %s3291_s2 = inlined_call_operand.vmem [shape: f32[1,128], index: 2, kind: input, shape index: {}]   ;;  %s3292_s3 = inlined_call_operand.vmem [shape: f32[1,128], index: 3, kind: input, shape index: {}]   ;;  %s3293_s4 = inlined_call_operand.hbm [shape: f32[2,128,384], index: 4, kind: input, shape index: {}]   ;;  %s3294_s5 = inlined_call_operand.vmem [shape: f32[2,1,384], index: 5, kind: input, shape index: {}]   ;;  %s3295_s6 = inlined_call_operand.hbm [shape: f32[2,128,128], index: 6, kind: input, shape index: {}]   ;;  %s3296_s7 = inlined_call_operand.vmem [shape: f32[2,1,128], index: 7, kind: input, shape index: {}]   ;;  %s3297_s8 = inlined_call_operand.vmem [shape: f32[2,1,128], index: 8, kind: input, shape index: {}]   ;;  %s3298_s9 = inlined_call_operand.vmem [shape: f32[2,1,128], index: 9, kind: input, shape index: {}]   ;;  %s3299_s10 = inlined_call_operand.vmem [shape: f32[2,128,512], index: 10, kind: input, shape index: {}]   ;;  %s3300_s11 = inlined_call_operand.vmem [shape: f32[2,1,512], index: 11, kind: input, shape index: {}]   ;;  %s3301_s12 = inlined_call_operand.hbm [shape: f32[2,512,128], index: 12, kind: input, shape index: {}]   ;;  %s3302_s13 = inlined_call_operand.vmem [shape: f32[2,1,128], index: 13, kind: input, shape index: {}]   ;;  %s3303_s14 = inlined_call_operand.vmem [shape: f32[2,1,128], index: 14, kind: input, shape index: {}]   ;;  %s3304_s15 = inlined_call_operand.vmem [shape: f32[2,1,128], index: 15, kind: input, shape index: {}]   ;;  %s3305_s16 = inlined_call_operand.vmem [shape: f32[128,128], index: 16, kind: input, shape index: {}]   ;;  %s3306_s17 = inlined_call_operand.vmem [shape: f32[1,128], index: 17, kind: input, shape index: {}]   ;;  %s3307_s18 = inlined_call_operand.vmem [shape: f32[128,128], index: 18, kind: input, shape index: {}]   ;;  %s3308_s19 = inlined_call_operand.vmem [shape: f32[1,128], index: 19, kind: input, shape index: {}]   ;;  %s3309_s20 = inlined_call_operand.hbm [shape: f32[2,128], index: 20, kind: output, shape index: {}]  }
   0x1   :  { %3312 = sst [smem:[#allocation12_spill]] %s3289_s0 }
   0x2   :  { %3313 = sst [smem:[#allocation13_spill]] %s3290_s1 }
   0x3   :  { %3314 = sst [smem:[#allocation14_spill]] %s3291_s2 }
   0x4   :  { %3315 = sst [smem:[#allocation15_spill]] %s3292_s3 }
   0x5   :  { %3316 = sst [smem:[#allocation16_spill]] %s3293_s4 }
   0x6   :  { %3317 = sst [smem:[#allocation17_spill]] %s3309_s20 }
   0x7   :  { %25 = vsyncpa [#allocation3], 0 }
   0x8   :  { %26 = vsyncpa [#allocation6], 0  ;;  %s55_s23 = sshll.u32 %s3295_s6, 4  ;;  %s56_s23 = int_to_ptr.hbm [resolvable:$true] %s55_s23 }
   0x9   :  { %27 = vsyncpa [#allocation4], 0  ;;  %s2345_s24 = smov [#allocation5]   ;;  %s3318_s26 = sld [smem:[#allocation16_spill]] }
   0xa   :  { %s57_s2 = sshll.u32 %s2345_s24, 4  ;;  %s2346_s28 = smov 128   ;;  %s58_s2 = int_to_ptr.vmem [resolvable:$true] %s57_s2 }
   0xb   :  { %s2347_s4 = smov 8   ;;  %s2348_s29 = smov [#allocation2]  }
   0xc   :  { %63 = dma.hbm_to_vmem [thread:$0]  %s56_s23, 4096, %s58_s2, [#allocation6], %s2346_s28, %s2346_s28, %s2347_s4  }
   0xd   :  { %s42_s30 = sshll.u32 %s2348_s29, 4  ;;  %s2349_s0 = smov 384   ;;  %s43_s30 = int_to_ptr.vmem [resolvable:$true] %s42_s30 }
   0xe   :  { %s2350_s21 = smov 24   ;;  %s78_s22 = sshll.u32 %s3301_s12, 4  ;;  %s79_s22 = int_to_ptr.hbm [resolvable:$true] %s78_s22 }
   0xf   :  { %s40_s27 = sshll.u32 %s3318_s26, 4  ;;  %s2351_s24 = smov [#allocation7]   ;;  %s41_s27 = int_to_ptr.hbm [resolvable:$true] %s40_s27 }
  0x10   :  { %48 = dma.hbm_to_vmem [thread:$0]  %s41_s27, 12288, %s43_s30, [#allocation3], %s2349_s0, %s2349_s0, %s2350_s21  }
  0x11   :  { %s80_s20 = sshll.u32 %s2351_s24, 4  ;;  %s81_s20 = int_to_ptr.vmem [resolvable:$true] %s80_s20 }
  0x12   :  { %86 = dma.hbm_to_vmem [thread:$0]  %s79_s22, 16384, %s81_s20, [#allocation6], %s2346_s28, %s2346_s28, %s2347_s4  }
  0x13   :  { %2339 = dma.done.wait [#allocation3], 12288  }
  0x14   :  { %2340 = vsyncadd [#allocation3], 4294955008 }
  0x15   :  { %2341 = dma.done.wait [#allocation6], 20480  }
  0x16   :  { %2342 = vsyncadd [#allocation6], 4294946816  ;;  %s3319_s25 = sld [smem:[#allocation12_spill]]  ;;  %v2352_v2 = vmov 128.0   ;;  %v233_v5 = vld [vmem:[#allocation2 + $0x168] sm:$0xff]  ;;  %v234_v6 = vld [vmem:[#allocation2 + $0x170] sm:$0xff] }
  0x17   :  { %2149 = vrcp.f32 %v2352_v2  ;;  %v235_v7 = vld [vmem:[#allocation2 + $0x178] sm:$0xff]  ;;  %244 = vmatpush.msra.mxu0 %v233_v5  ;;  %267 = vmatpush.msra.mxu1 %v234_v6  ;;  %v230_v8 = vld [vmem:[#allocation2 + $0x150] sm:$0xff]  ;;  %v232_v10 = vld [vmem:[#allocation2 + $0x160] sm:$0xff]  ;;  %s3320_s27 = sld [smem:[#allocation14_spill]]  ;;  %vm342_vm8 = vcmask 130048  }
  0x18   :  { %v231_v9 = vld [vmem:[#allocation2 + $0x158] sm:$0xff]  ;;  %290 = vmatpush.msra.mxu2 %v235_v7  ;;  %v228_v24 = vld [vmem:[#allocation2 + $0x140] sm:$0xff]  ;;  %v229_v25 = vld [vmem:[#allocation2 + $0x148] sm:$0xff]  ;;  %s3321_s29 = sld [smem:[#allocation15_spill]] }
  0x19   :  { %245 = vmatpush.msra.mxu0 %v230_v8  ;;  %268 = vmatpush.msra.mxu1 %v231_v9  ;;  %v227_v23 = vld [vmem:[#allocation2 + $0x138] sm:$0xff]  ;;  %v224_v26 = vld [vmem:[#allocation2 + $0x120] sm:$0xff]  ;;  %v225_v27 = vld [vmem:[#allocation2 + $0x128] sm:$0xff]  ;;  %s3322_s1 = sld [smem:[#allocation13_spill]] }
  0x1a   :  { %291 = vmatpush.msra.mxu2 %v232_v10  ;;  %v226_v28 = vld [vmem:[#allocation2 + $0x130] sm:$0xff]  ;;  %v221_v29 = vld [vmem:[#allocation2 + $0x108] sm:$0xff]  ;;  %v223_v31 = vld [vmem:[#allocation2 + $0x118] sm:$0xff] }
  0x1b   :  { %246 = vmatpush.msra.mxu0 %v227_v23  ;;  %269 = vmatpush.msra.mxu1 %v228_v24  ;;  %v222_v30 = vld [vmem:[#allocation2 + $0x110] sm:$0xff]  ;;  %v219_v33 = vld [vmem:[#allocation2 + $0xf8] sm:$0xff]  ;;  %v220_v34 = vld [vmem:[#allocation2 + $0x100] sm:$0xff] }
  0x1c   :  { %v127_v0 = vld [vmem:[%s3319_s25] sm:$0xff]  ;;  %v128_v1 = vld [vmem:[%s3319_s25 + $0x8] sm:$0xff]  ;;  %292 = vmatpush.msra.mxu2 %v229_v25  ;;  %v218_v32 = vld [vmem:[#allocation2 + $0xf0] sm:$0xff] }
  0x1d   :  { %131 = vadd.xlane.f32.xlu0 %v127_v0  ;;  %v2150_v3 = vpop.eup %2149  ;;  %247 = vmatpush.msra.mxu0 %v224_v26  ;;  %v215_v35 = vld [vmem:[#allocation2 + $0xd8] sm:$0xff]  ;;  %v216_v36 = vld [vmem:[#allocation2 + $0xe0] sm:$0xff]  ;;  %v217_v37 = vld [vmem:[#allocation2 + $0xe8] sm:$0xff] }
  0x1e   :  { %v136_v4 = vmul.f32 128.0, %v2150_v3  ;;  %vm140_vm0 = vweird.f32 %v2150_v3  ;;  %270 = vmatpush.msra.mxu1 %v225_v27  ;;  %293 = vmatpush.msra.mxu2 %v226_v28  ;;  %v212_v38 = vld [vmem:[#allocation2 + $0xc0] sm:$0xff]  ;;  %v213_v39 = vld [vmem:[#allocation2 + $0xc8] sm:$0xff]  ;;  %v214_v40 = vld [vmem:[#allocation2 + $0xd0] sm:$0xff] }
  0x1f   :  { %248 = vmatpush.msra.mxu0 %v221_v29  ;;  %v209_v41 = vld [vmem:[#allocation2 + $0xa8] sm:$0xff]  ;;  %v210_v42 = vld [vmem:[#allocation2 + $0xb0] sm:$0xff]  ;;  %v211_v43 = vld [vmem:[#allocation2 + $0xb8] sm:$0xff] }
  0x20   :  { %v137_v11 = vsub.f32 1.0, %v136_v4  ;;  %271 = vmatpush.msra.mxu1 %v222_v30  ;;  %294 = vmatpush.msra.mxu2 %v223_v31  ;;  %v206_v44 = vld [vmem:[#allocation2 + $0x90] sm:$0xff]  ;;  %v207_v45 = vld [vmem:[#allocation2 + $0x98] sm:$0xff]  ;;  %v208_v46 = vld [vmem:[#allocation2 + $0xa0] sm:$0xff] }
  0x21   :  { %249 = vmatpush.msra.mxu0 %v218_v32  ;;  %v203_v47 = vld [vmem:[#allocation2 + $0x78] sm:$0xff]  ;;  %v204_v48 = vld [vmem:[#allocation2 + $0x80] sm:$0xff]  ;;  %v205_v49 = vld [vmem:[#allocation2 + $0x88] sm:$0xff]  ;;  %v113_v32 = vlaneseq }
  0x22   :  { %v138_v12 = vmul.f32 %v2150_v3, %v137_v11  ;;  %272 = vmatpush.msra.mxu1 %v219_v33  ;;  %295 = vmatpush.msra.mxu2 %v220_v34  ;;  %v200_v50 = vld [vmem:[#allocation2 + $0x60] sm:$0xff]  ;;  %v201_v51 = vld [vmem:[#allocation2 + $0x68] sm:$0xff]  ;;  %v202_v52 = vld [vmem:[#allocation2 + $0x70] sm:$0xff] }
  0x23   :  { %250 = vmatpush.msra.mxu0 %v215_v35  ;;  %v197_v53 = vld [vmem:[#allocation2 + $0x48] sm:$0xff]  ;;  %v198_v54 = vld [vmem:[#allocation2 + $0x50] sm:$0xff]  ;;  %v199_v55 = vld [vmem:[#allocation2 + $0x58] sm:$0xff]  ;;  %v2511_v34 = vand.u32 127, %v113_v32 }
  0x24   :  { %v139_v13 = vadd.f32 %v2150_v3, %v138_v12  ;;  %273 = vmatpush.msra.mxu1 %v216_v36  ;;  %296 = vmatpush.msra.mxu2 %v217_v37  ;;  %v194_v56 = vld [vmem:[#allocation2 + $0x30] sm:$0xff]  ;;  %v195_v57 = vld [vmem:[#allocation2 + $0x38] sm:$0xff]  ;;  %v196_v58 = vld [vmem:[#allocation2 + $0x40] sm:$0xff] }
  0x25   :  { %133 = vadd.xlane.f32.xlu0 %v128_v1  ;;  %251 = vmatpush.msra.mxu0 %v212_v38  ;;  %v191_v59 = vld [vmem:[#allocation2 + $0x18] sm:$0xff]  ;;  %v192_v60 = vld [vmem:[#allocation2 + $0x20] sm:$0xff]  ;;  %v193_v61 = vld [vmem:[#allocation2 + $0x28] sm:$0xff]  ;;  %vm116_vm7 = vcmp.lt.s32.totalorder %v2511_v34, 64  ;;  %vm120_vm9 = vcmp.ge.s32.totalorder %v2511_v34, 64 }
  0x26   :  { %v2475_v14 = vsel %vm140_vm0, %v2150_v3, %v139_v13  ;;  %274 = vmatpush.msra.mxu1 %v213_v39  ;;  %297 = vmatpush.msra.mxu2 %v214_v40  ;;  %v188_v62 = vld [vmem:[#allocation2] sm:$0xff]  ;;  %v189_v63 = vld [vmem:[#allocation2 + $0x8] sm:$0xff] }
  0x27   :  { %252 = vmatpush.msra.mxu0 %v209_v41  ;;  %v236_v33 = vld [vmem:[%s3294_s5] sm:$0x7] }
  0x28   :  { %275 = vmatpush.msra.mxu1 %v210_v42  ;;  %298 = vmatpush.msra.mxu2 %v211_v43  ;;  %v239_v35 = vperm.slane %v236_v33, 1  ;;  %v238_v38 = vperm.slane %v236_v33, 0  ;;  %v240_v42 = vperm.slane %v236_v33, 2  ;;  %v2353_v43 = vmov 0.0  }
  0x29   :  { %253 = vmatpush.msra.mxu0 %v206_v44  ;;  %v2515_v44 = vsel %vm116_vm7, 1.0, %v2353_v43 }
  0x2a   :  { %276 = vmatpush.msra.mxu1 %v207_v45  ;;  %299 = vmatpush.msra.mxu2 %v208_v46 }
  0x2b   :  { %254 = vmatpush.msra.mxu0 %v203_v47 }
  0x2c   :  { %277 = vmatpush.msra.mxu1 %v204_v48  ;;  %300 = vmatpush.msra.mxu2 %v205_v49 }
  0x2d   :  { %255 = vmatpush.msra.mxu0 %v200_v50 }
  0x2e   :  { %278 = vmatpush.msra.mxu1 %v201_v51  ;;  %301 = vmatpush.msra.mxu2 %v202_v52 }
  0x2f   :  { %256 = vmatpush.msra.mxu0 %v197_v53  ;;  %v125_v53 = vld [vmem:[%s3322_s1] sm:$0xff] }
  0x30   :  { %279 = vmatpush.msra.mxu1 %v198_v54  ;;  %302 = vmatpush.msra.mxu2 %v199_v55 }
  0x31   :  { %257 = vmatpush.msra.mxu0 %v194_v56 }
  0x32   :  { %280 = vmatpush.msra.mxu1 %v195_v57  ;;  %303 = vmatpush.msra.mxu2 %v196_v58  ;;  %v126_v58 = vld [vmem:[%s3322_s1 + $0x8] sm:$0xff] }
  0x33   :  { %258 = vmatpush.msra.mxu0 %v191_v59 }
  0x34   :  { %281 = vmatpush.msra.mxu1 %v192_v60  ;;  %304 = vmatpush.msra.mxu2 %v193_v61 }
  0x35   :  { %259 = vmatpush.msra.mxu0 %v188_v62 }
  0x36   :  { %282 = vmatpush.msra.mxu1 %v189_v63 }
  0x90   :  { %v132_v15 = vpop.xlane.xlu0 %131 }
  0x91   :  { %v142_v16 = vmul.f32 %v2475_v14, %v132_v15 }
  0x93   :  { %v2478_v17 = vsub.f32 %v127_v0, %v142_v16  ;;  %v190_v0 = vld [vmem:[#allocation2 + $0x10] sm:$0xff]  ;;  %v2133_v16 = vld [vmem:[%s3320_s27] ss:$0 sm:$0xff] }
  0x94   :  { %305 = vmatpush.msra.mxu2 %v190_v0 }
  0x95   :  { %v146_v18 = vmul.f32 %v2478_v17, %v2478_v17 }
  0x97   :  { %148 = vadd.xlane.f32.xlu1 %v146_v18 }
  0x98   :  { %v134_v19 = vpop.xlane.xlu0 %133 }
  0x99   :  { %v143_v20 = vmul.f32 %v2475_v14, %v134_v19 }
  0x9b   :  { %v2483_v21 = vsub.f32 %v128_v1, %v143_v20 }
  0x9d   :  { %v147_v22 = vmul.f32 %v2483_v21, %v2483_v21 }
  0x9f   :  { %150 = vadd.xlane.f32.xlu1 %v147_v22  ;;  %v2134_v22 = vld [vmem:[%s3321_s29] ss:$0 sm:$0xff] }
 0x10a   :  { %v149_v1 = vpop.xlane.xlu1 %148 }
 0x10b   :  { %v152_v2 = vmul.f32 %v149_v1, %v2475_v14 }
 0x10d   :  { %v154_v3 = vadd.f32 1e-12, %v152_v2 }
 0x10f   :  { %2151 = vrsqrt.f32 %v154_v3  ;;  %vm162_vm2 = vweird.f32 %v154_v3 }
 0x112   :  { %v151_v4 = vpop.xlane.xlu1 %150 }
 0x113   :  { %v153_v5 = vmul.f32 %v151_v4, %v2475_v14 }
 0x115   :  { %v2152_v6 = vpop.eup %2151  ;;  %v155_v7 = vadd.f32 1e-12, %v153_v5 }
 0x116   :  { %v157_v8 = vmul.f32 %v2152_v6, %v154_v3  ;;  %vm163_vm1 = vweird.f32 %v2152_v6 }
 0x117   :  { %2153 = vrsqrt.f32 %v155_v7  ;;  %vm164_vm3 = vmor %vm162_vm2, %vm163_vm1  ;;  %vm172_vm5 = vweird.f32 %v155_v7 }
 0x118   :  { %v158_v9 = vmul.f32 %v2152_v6, %v157_v8 }
 0x11a   :  { %v159_v10 = vmul.f32 0.5, %v158_v9 }
 0x11c   :  { %v160_v11 = vsub.f32 1.5, %v159_v10 }
 0x11d   :  { %v2154_v12 = vpop.eup %2153 }
 0x11e   :  { %v161_v13 = vmul.f32 %v2152_v6, %v160_v11  ;;  %v167_v15 = vmul.f32 %v2154_v12, %v155_v7  ;;  %vm173_vm4 = vweird.f32 %v2154_v12 }
 0x11f   :  { %vm174_vm6 = vmor %vm172_vm5, %vm173_vm4 }
 0x120   :  { %v165_v18 = vsel %vm164_vm3, %v2152_v6, %v161_v13  ;;  %v168_v19 = vmul.f32 %v2154_v12, %v167_v15  ;;  %v2533_v15 = vsel %vm120_vm9, 1.0, %v2353_v43 }
 0x121   :  { %v176_v20 = vmul.f32 %v165_v18, %v2478_v17 }
 0x122   :  { %v169_v23 = vmul.f32 0.5, %v168_v19 }
 0x123   :  { %v181_v24 = vmul.f32 %v2133_v16, %v176_v20 }
 0x124   :  { %v170_v25 = vsub.f32 1.5, %v169_v23 }
 0x125   :  { %v2496_v26 = vadd.f32 %v2134_v22, %v181_v24 }
 0x126   :  { %v171_v27 = vmul.f32 %v2154_v12, %v170_v25 }
 0x127   :  { %260 = vmatmul.f32.vlgmr.msra.gmra.mxu0 %v2496_v26  ;;  %283 = vmatmul.f32.vlgmr.msra.gmra.mxu1 %v2496_v26 }
 0x128   :  { %v175_v28 = vsel %vm174_vm6, %v2154_v12, %v171_v27  ;;  %306 = vmatmul.f32.vlgmr.msra.gmra.mxu2 %v2496_v26 }
 0x129   :  { %v177_v17 = vmul.f32 %v175_v28, %v2483_v21 }
 0x12b   :  { %v182_v29 = vmul.f32 %v2133_v16, %v177_v17 }
 0x12d   :  { %v2502_v30 = vadd.f32 %v2134_v22, %v182_v29 }
 0x12f   :  { %263 = vmatmul.f32.gmra.mxu0 %v2502_v30  ;;  %286 = vmatmul.f32.gmra.mxu1 %v2502_v30 }
 0x130   :  { %309 = vmatmul.f32.gmra.mxu2 %v2502_v30 }
 0x1a4   :  { %v284_v31 = vpop.f32.mrf.mxu1  ;;  %v261_v36 = vpop.f32.mrf.mxu0 }
 0x1a5   :  { %v262_v40 = vadd.f32 %v261_v36, %v238_v38  ;;  %v285_v41 = vadd.f32 %v284_v31, %v239_v35 }
 0x1a7   :  { %v313_v47 = vmul.f32 %v2515_v44, %v262_v40  ;;  %v398_v16 = vmul.f32 %v2533_v15, %v262_v40 }
 0x1ab   :  { %v307_v21 = vpop.f32.mrf.mxu2 }
 0x1ac   :  { %v287_v37 = vpop.f32.mrf.mxu1  ;;  %v308_v48 = vadd.f32 %v307_v21, %v240_v42  ;;  %v264_v49 = vpop.f32.mrf.mxu0 }
 0x1ad   :  { %v288_v39 = vadd.f32 %v287_v37, %v239_v35  ;;  %v265_v50 = vadd.f32 %v264_v49, %v238_v38  ;;  %v492_v49 = vld [vmem:[#allocation5 + $0x50] sm:$0xff] }
 0x1af   :  { %329 = vmatpush.xpose.msra.mxu3 %v288_v39  ;;  %v314_v51 = vmul.f32 %v2515_v44, %v265_v50  ;;  %v399_v18 = vmul.f32 %v2533_v15, %v265_v50  ;;  %v491_v50 = vld [vmem:[#allocation5 + $0x48] sm:$0xff] }
 0x1b3   :  { %v310_v45 = vpop.f32.mrf.mxu2  ;;  %330 = vmatpush.xpose.msra.mxu3 %v285_v41 }
 0x1b4   :  { %v311_v46 = vadd.f32 %v310_v45, %v240_v42  ;;  %v497_v42 = vld [vmem:[#allocation5 + $0x78] sm:$0xff]  ;;  %v496_v45 = vld [vmem:[#allocation5 + $0x70] sm:$0xff] }
 0x1b5   :  { %502 = vmatpush.msrb.mxu1 %v497_v42  ;;  %v628_v42 = vld [vmem:[%s3299_s10 + $0x188] sm:$0xff] }
 0x1b6   :  { %469 = vmatpush.msrb.mxu2 %v311_v46  ;;  %331 = vmatmul.f32.vlgmr.msra.gmra.mxu3 %v313_v47  ;;  %v494_v47 = vld [vmem:[#allocation5 + $0x60] sm:$0xff] }
 0x1b7   :  { %385 = vmatpush.msrb.mxu3 %v311_v46  ;;  %v495_v46 = vld [vmem:[#allocation5 + $0x68] sm:$0xff]  ;;  %503 = vmatpush.msrb.mxu1 %v496_v45  ;;  %v629_v45 = vld [vmem:[%s3299_s10 + $0x190] sm:$0xff] }
 0x1b8   :  { %470 = vmatpush.msrb.mxu2 %v308_v48 }
 0x1b9   :  { %386 = vmatpush.msrb.mxu3 %v308_v48  ;;  %504 = vmatpush.msrb.mxu1 %v495_v46  ;;  %v493_v48 = vld [vmem:[#allocation5 + $0x58] sm:$0xff] }
 0x1ba   :  { %v630_v46 = vld [vmem:[%s3299_s10 + $0x198] sm:$0xff] }
 0x1bb   :  { %414 = vmatpush.xpose.msra.mxu3 %v288_v39  ;;  %505 = vmatpush.msrb.mxu1 %v494_v47  ;;  %v623_v47 = vld [vmem:[%s3299_s10 + $0x160] sm:$0xff] }
 0x1bd   :  { %506 = vmatpush.msrb.mxu1 %v493_v48  ;;  %v624_v48 = vld [vmem:[%s3299_s10 + $0x168] sm:$0xff] }
 0x1be   :  { %334 = vmatmul.f32.gmra.mxu3 %v314_v51  ;;  %v490_v51 = vld [vmem:[#allocation5 + $0x40] sm:$0xff] }
 0x1bf   :  { %415 = vmatpush.xpose.msra.mxu3 %v285_v41  ;;  %507 = vmatpush.msrb.mxu1 %v492_v49  ;;  %v625_v49 = vld [vmem:[%s3299_s10 + $0x170] sm:$0xff] }
 0x1c1   :  { %508 = vmatpush.msrb.mxu1 %v491_v50  ;;  %v626_v50 = vld [vmem:[%s3299_s10 + $0x178] sm:$0xff] }
 0x1c3   :  { %509 = vmatpush.msrb.mxu1 %v490_v51  ;;  %v619_v51 = vld [vmem:[%s3299_s10 + $0x140] sm:$0xff] }
 0x239   :  { %v332_v52 = vpop.f32.mrf.mxu3 }
 0x23a   :  { %v338_v54 = vmul.f32 0.125, %v332_v52 }
 0x23c   :  { %v340_v55 = vadd.f32 %v338_v54, %v125_v53  ;;  %v488_v54 = vld [vmem:[#allocation5 + $0x30] sm:$0xff] }
 0x23e   :  { %v343_v56 = vsel %vm342_vm8, %v340_v55, -inf }
 0x23f   :  { %344 = vmax.xlane.f32.xlu2 %v343_v56  ;;  %v486_v56 = vld [vmem:[#allocation5 + $0x20] sm:$0xff] }
 0x241   :  { %v335_v57 = vpop.f32.mrf.mxu3 }
 0x242   :  { %v339_v59 = vmul.f32 0.125, %v335_v57 }
 0x244   :  { %v341_v60 = vadd.f32 %v339_v59, %v126_v58 }
 0x246   :  { %v346_v61 = vsel %vm342_vm8, %v341_v60, -inf }
 0x247   :  { %347 = vmax.xlane.f32.xlu2 %v346_v61 }
 0x2b2   :  { %v345_v62 = vpop.xlane.xlu2 %344 }
 0x2b3   :  { %v349_v63 = vsub.f32 %v340_v55, %v345_v62  ;;  %v487_v55 = vld [vmem:[#allocation5 + $0x28] sm:$0xff] }
 0x2b5   :  { %v351_v0 = vmul.f32 1.442695, %v349_v63  ;;  %v484_v63 = vld [vmem:[#allocation5 + $0x10] sm:$0xff] }
 0x2b7   :  { %2155 = vpow2.f32 %v351_v0  ;;  %v483_v0 = vld [vmem:[#allocation5 + $0x8] sm:$0xff] }
 0x2ba   :  { %v348_v1 = vpop.xlane.xlu2 %347 }
 0x2bb   :  { %v350_v2 = vsub.f32 %v341_v60, %v348_v1  ;;  %v485_v60 = vld [vmem:[#allocation5 + $0x18] sm:$0xff]  ;;  %v482_v1 = vld [vmem:[#allocation5] sm:$0xff] }
 0x2bd   :  { %v2156_v3 = vpop.eup %2155  ;;  %v353_v4 = vmul.f32 1.442695, %v350_v2 }
 0x2be   :  { %v355_v5 = vsel %vm342_vm8, %v2156_v3, 0.0 }
 0x2bf   :  { %2157 = vpow2.f32 %v353_v4  ;;  %356 = vadd.xlane.f32.xlu0 %v355_v5 }
 0x2c5   :  { %v2158_v6 = vpop.eup %2157 }
 0x2c6   :  { %v358_v7 = vsel %vm342_vm8, %v2158_v6, 0.0 }
 0x2c7   :  { %359 = vadd.xlane.f32.xlu1 %v358_v7 }
 0x332   :  { %v357_v8 = vpop.xlane.xlu0 %356 }
 0x333   :  { %2159 = vrcp.f32 %v357_v8 }
 0x339   :  { %v2160_v9 = vpop.eup %2159 }
 0x33a   :  { %v360_v10 = vpop.xlane.xlu1 %359  ;;  %v363_v11 = vmul.f32 %v2160_v9, %v2156_v3 }
 0x33b   :  { %2161 = vrcp.f32 %v360_v10  ;;  %v2135_v10 = vld [vmem:[%s3296_s7] ss:$0 sm:$0xff] }
 0x33c   :  { %2041 = vmatmul.msk.f32.vlgmr.msrb.gmra.mxu3 %vm342_vm8, %v363_v11 }
 0x341   :  { %v2162_v12 = vpop.eup %2161 }
 0x342   :  { %v364_v13 = vmul.f32 %v2162_v12, %v2158_v6 }
 0x344   :  { %2042 = vmatmul.msk.f32.gmra.mxu3 %vm342_vm8, %v364_v13 }
 0x34c   :  { %416 = vmatmul.f32.vlgmr.msra.gmra.mxu3 %v398_v16 }
 0x354   :  { %419 = vmatmul.f32.gmra.mxu3 %v399_v18 }
 0x3bf   :  { %v2537_v19 = vpop.f32.mrf.mxu3 }
 0x3c0   :  { %v394_v3 = vmul.f32 %v2515_v44, %v2537_v19 }
 0x3c7   :  { %v2539_v20 = vpop.f32.mrf.mxu3 }
 0x3c8   :  { %v395_v7 = vmul.f32 %v2515_v44, %v2539_v20  ;;  %v639_v20 = vld [vmem:[%s3299_s10 + $0x1e0] sm:$0xff] }
 0x3c9   :  { %653 = vmatpush.msra.mxu2 %v639_v20  ;;  %v593_v20 = vld [vmem:[%s3299_s10 + $0x70] sm:$0xff] }
 0x3cf   :  { %v417_v22 = vpop.f32.mrf.mxu3 }
 0x3d0   :  { %v423_v23 = vmul.f32 0.125, %v417_v22  ;;  %v640_v22 = vld [vmem:[%s3299_s10 + $0x1e8] sm:$0xff] }
 0x3d1   :  { %676 = vmatpush.msrb.mxu3 %v640_v22  ;;  %v594_v22 = vld [vmem:[%s3299_s10 + $0x78] sm:$0xff] }
 0x3d2   :  { %v425_v24 = vadd.f32 %v423_v23, %v125_v53  ;;  %v489_v53 = vld [vmem:[#allocation5 + $0x38] sm:$0xff]  ;;  %v641_v23 = vld [vmem:[%s3299_s10 + $0x1f0] sm:$0xff] }
 0x3d3   :  { %510 = vmatpush.msrb.mxu1 %v489_v53  ;;  %699 = vmatpush.msrb.mxu0 %v641_v23  ;;  %v621_v53 = vld [vmem:[%s3299_s10 + $0x150] sm:$0xff]  ;;  %v587_v23 = vld [vmem:[%s3299_s10 + $0x40] sm:$0xff] }
 0x3d4   :  { %v427_v25 = vsel %vm342_vm8, %v425_v24, -inf }
 0x3d5   :  { %428 = vmax.xlane.f32.xlu2 %v427_v25  ;;  %511 = vmatpush.msrb.mxu1 %v488_v54  ;;  %v637_v25 = vld [vmem:[%s3299_s10 + $0x1d0] sm:$0xff]  ;;  %v622_v54 = vld [vmem:[%s3299_s10 + $0x158] sm:$0xff] }
 0x3d6   :  { %700 = vmatpush.msrb.mxu0 %v637_v25  ;;  %v583_v25 = vld [vmem:[%s3299_s10 + $0x20] sm:$0xff] }
 0x3d7   :  { %v420_v27 = vpop.f32.mrf.mxu3  ;;  %512 = vmatpush.msrb.mxu1 %v487_v55  ;;  %v615_v55 = vld [vmem:[%s3299_s10 + $0x120] sm:$0xff] }
 0x3d8   :  { %v424_v28 = vmul.f32 0.125, %v420_v27  ;;  %v638_v27 = vld [vmem:[%s3299_s10 + $0x1d8] sm:$0xff] }
 0x3d9   :  { %513 = vmatpush.msrb.mxu1 %v486_v56  ;;  %v616_v56 = vld [vmem:[%s3299_s10 + $0x128] sm:$0xff] }
 0x3da   :  { %v426_v17 = vadd.f32 %v424_v28, %v126_v58 }
 0x3db   :  { %514 = vmatpush.msrb.mxu1 %v485_v60  ;;  %v612_v60 = vld [vmem:[%s3299_s10 + $0x108] sm:$0xff] }
 0x3dc   :  { %v430_v29 = vsel %vm342_vm8, %v426_v17, -inf }
 0x3dd   :  { %431 = vmax.xlane.f32.xlu0 %v430_v29  ;;  %515 = vmatpush.msrb.mxu1 %v484_v63  ;;  %v607_v63 = vld [vmem:[%s3299_s10 + $0xe0] sm:$0xff] }
 0x3df   :  { %516 = vmatpush.msrb.mxu1 %v483_v0  ;;  %v608_v0 = vld [vmem:[%s3299_s10 + $0xe8] sm:$0xff] }
 0x3e1   :  { %517 = vmatpush.msrb.mxu1 %v482_v1  ;;  %v609_v1 = vld [vmem:[%s3299_s10 + $0xf0] sm:$0xff] }
 0x448   :  { %v429_v31 = vpop.xlane.xlu2 %428 }
 0x449   :  { %v433_v33 = vsub.f32 %v425_v24, %v429_v31  ;;  %v636_v24 = vld [vmem:[%s3299_s10 + $0x1c8] sm:$0xff] }
 0x44a   :  { %677 = vmatpush.msrb.mxu3 %v636_v24  ;;  %v590_v24 = vld [vmem:[%s3299_s10 + $0x58] sm:$0xff] }
 0x44b   :  { %v435_v35 = vmul.f32 1.442695, %v433_v33 }
 0x44d   :  { %2163 = vpow2.f32 %v435_v35 }
 0x450   :  { %v432_v21 = vpop.xlane.xlu0 %431 }
 0x451   :  { %v434_v36 = vsub.f32 %v426_v17, %v432_v21 }
 0x453   :  { %v2164_v37 = vpop.eup %2163  ;;  %v437_v38 = vmul.f32 1.442695, %v434_v36 }
 0x454   :  { %v439_v39 = vsel %vm342_vm8, %v2164_v37, 0.0 }
 0x455   :  { %2165 = vpow2.f32 %v437_v38  ;;  %440 = vadd.xlane.f32.xlu1 %v439_v39  ;;  %v632_v38 = vld [vmem:[%s3299_s10 + $0x1a8] sm:$0xff]  ;;  %v633_v39 = vld [vmem:[%s3299_s10 + $0x1b0] sm:$0xff] }
 0x456   :  { %678 = vmatpush.msrb.mxu3 %v632_v38  ;;  %701 = vmatpush.msrb.mxu0 %v633_v39 }
 0x458   :  { %679 = vmatpush.msrb.mxu3 %v628_v42  ;;  %702 = vmatpush.msrb.mxu0 %v629_v45  ;;  %v863_v42 = vld [vmem:[#allocation7 + $0x170] sm:$0xff] }
 0x459   :  { %v879_v45 = vld [vmem:[#allocation7 + $0x1f0] sm:$0xff] }
 0x45a   :  { %680 = vmatpush.msrb.mxu3 %v624_v48  ;;  %703 = vmatpush.msrb.mxu0 %v625_v49  ;;  %v878_v48 = vld [vmem:[#allocation7 + $0x1e8] sm:$0xff] }
 0x45b   :  { %v2166_v40 = vpop.eup %2165 }
 0x45c   :  { %v442_v41 = vsel %vm342_vm8, %v2166_v40, 0.0  ;;  %704 = vmatpush.msrb.mxu0 %v621_v53 }
 0x45d   :  { %443 = vadd.xlane.f32.xlu2 %v442_v41  ;;  %v627_v41 = vld [vmem:[%s3299_s10 + $0x180] sm:$0xff] }
 0x4c8   :  { %v441_v52 = vpop.xlane.xlu1 %440 }
 0x4c9   :  { %2167 = vrcp.f32 %v441_v52  ;;  %v620_v52 = vld [vmem:[%s3299_s10 + $0x148] sm:$0xff] }
 0x4ca   :  { %681 = vmatpush.msrb.mxu3 %v620_v52 }
 0x4cc   :  { %682 = vmatpush.msrb.mxu3 %v616_v56 }
 0x4ce   :  { %683 = vmatpush.msrb.mxu3 %v612_v60 }
 0x4cf   :  { %v2168_v57 = vpop.eup %2167 }
 0x4d0   :  { %v444_v58 = vpop.xlane.xlu2 %443  ;;  %v447_v59 = vmul.f32 %v2168_v57, %v2164_v37  ;;  %v631_v37 = vld [vmem:[%s3299_s10 + $0x1a0] sm:$0xff]  ;;  %v617_v57 = vld [vmem:[%s3299_s10 + $0x130] sm:$0xff]  ;;  %684 = vmatpush.msrb.mxu3 %v608_v0 }
 0x4d1   :  { %2169 = vrcp.f32 %v444_v58  ;;  %v618_v58 = vld [vmem:[%s3299_s10 + $0x138] sm:$0xff]  ;;  %705 = vmatpush.msrb.mxu0 %v617_v57 }
 0x4d2   :  { %2043 = vmatmul.msk.f32.vlgmr.msrb.gmra.mxu2 %vm342_vm8, %v447_v59  ;;  %v611_v59 = vld [vmem:[%s3299_s10 + $0x100] sm:$0xff] }
 0x4d7   :  { %v2170_v61 = vpop.eup %2169 }
 0x4d8   :  { %v448_v62 = vmul.f32 %v2170_v61, %v2166_v40  ;;  %v634_v40 = vld [vmem:[%s3299_s10 + $0x1b8] sm:$0xff]  ;;  %v613_v61 = vld [vmem:[%s3299_s10 + $0x110] sm:$0xff] }
 0x4d9   :  { %706 = vmatpush.msrb.mxu0 %v613_v61 }
 0x4da   :  { %2044 = vmatmul.msk.f32.gmra.mxu2 %vm342_vm8, %v448_v62  ;;  %v614_v62 = vld [vmem:[%s3299_s10 + $0x118] sm:$0xff] }
 0x4db   :  { %707 = vmatpush.msrb.mxu0 %v609_v1 }
 0x555   :  { %v472_v2 = vpop.f32.mrf.mxu2 }
 0x556   :  { %v478_v4 = vmul.f32 %v2533_v15, %v472_v2  ;;  %v610_v2 = vld [vmem:[%s3299_s10 + $0xf8] sm:$0xff] }
 0x558   :  { %v480_v5 = vadd.f32 %v478_v4, %v394_v3  ;;  %v603_v3 = vld [vmem:[%s3299_s10 + $0xc0] sm:$0xff]  ;;  %v604_v4 = vld [vmem:[%s3299_s10 + $0xc8] sm:$0xff] }
 0x559   :  { %685 = vmatpush.msrb.mxu3 %v604_v4 }
 0x55a   :  { %518 = vmatmul.f32.vlgmr.msrb.gmra.mxu1 %v480_v5  ;;  %v605_v5 = vld [vmem:[%s3299_s10 + $0xd0] sm:$0xff] }
 0x55b   :  { %708 = vmatpush.msrb.mxu0 %v605_v5 }
 0x55d   :  { %v475_v6 = vpop.f32.mrf.mxu2 }
 0x55e   :  { %v479_v8 = vmul.f32 %v2533_v15, %v475_v6  ;;  %v606_v6 = vld [vmem:[%s3299_s10 + $0xd8] sm:$0xff] }
 0x560   :  { %v481_v9 = vadd.f32 %v479_v8, %v395_v7  ;;  %v599_v7 = vld [vmem:[%s3299_s10 + $0xa0] sm:$0xff]  ;;  %v600_v8 = vld [vmem:[%s3299_s10 + $0xa8] sm:$0xff] }
 0x561   :  { %686 = vmatpush.msrb.mxu3 %v600_v8  ;;  %v832_v8 = vld [vmem:[#allocation7 + $0x78] sm:$0xff] }
 0x562   :  { %521 = vmatmul.f32.gmra.mxu1 %v481_v9  ;;  %v601_v9 = vld [vmem:[%s3299_s10 + $0xb0] sm:$0xff] }
 0x563   :  { %709 = vmatpush.msrb.mxu0 %v601_v9  ;;  %v848_v9 = vld [vmem:[#allocation7 + $0xf8] sm:$0xff] }
 0x5d7   :  { %v519_v11 = vpop.f32.mrf.mxu1 }
 0x5d8   :  { %v520_v12 = vadd.f32 %v2135_v10, %v519_v11  ;;  %v595_v11 = vld [vmem:[%s3299_s10 + $0x80] sm:$0xff] }
 0x5da   :  { %v525_v13 = vadd.f32 %v520_v12, %v2496_v26  ;;  %v642_v26 = vld [vmem:[%s3299_s10 + $0x1f8] sm:$0xff]  ;;  %v596_v12 = vld [vmem:[%s3299_s10 + $0x88] sm:$0xff] }
 0x5db   :  { %722 = vmatpush.msra.mxu1 %v642_v26  ;;  %687 = vmatpush.msrb.mxu3 %v596_v12  ;;  %v588_v26 = vld [vmem:[%s3299_s10 + $0x48] sm:$0xff]  ;;  %v847_v12 = vld [vmem:[#allocation7 + $0xf0] sm:$0xff] }
 0x5dc   :  { %529 = vadd.xlane.f32.xlu0 %v525_v13 }
 0x5dd   :  { %723 = vmatpush.msra.mxu1 %v638_v27  ;;  %v584_v27 = vld [vmem:[%s3299_s10 + $0x28] sm:$0xff] }
 0x5df   :  { %v522_v16 = vpop.f32.mrf.mxu1  ;;  %724 = vmatpush.msra.mxu1 %v634_v40  ;;  %v864_v40 = vld [vmem:[#allocation7 + $0x178] sm:$0xff] }
 0x5e0   :  { %v523_v18 = vadd.f32 %v2135_v10, %v522_v16  ;;  %v602_v10 = vld [vmem:[%s3299_s10 + $0xb8] sm:$0xff] }
 0x5e1   :  { %725 = vmatpush.msra.mxu1 %v630_v46  ;;  %v598_v16 = vld [vmem:[%s3299_s10 + $0x98] sm:$0xff] }
 0x5e2   :  { %v526_v19 = vadd.f32 %v523_v18, %v2502_v30  ;;  %v635_v30 = vld [vmem:[%s3299_s10 + $0x1c0] sm:$0xff] }
 0x5e3   :  { %654 = vmatpush.msra.mxu2 %v635_v30  ;;  %726 = vmatpush.msra.mxu1 %v626_v50  ;;  %v591_v18 = vld [vmem:[%s3299_s10 + $0x60] sm:$0xff]  ;;  %v589_v30 = vld [vmem:[%s3299_s10 + $0x50] sm:$0xff] }
 0x5e4   :  { %531 = vadd.xlane.f32.xlu1 %v526_v19 }
 0x5e5   :  { %655 = vmatpush.msra.mxu2 %v631_v37  ;;  %727 = vmatpush.msra.mxu1 %v622_v54 }
 0x5e7   :  { %656 = vmatpush.msra.mxu2 %v627_v41  ;;  %728 = vmatpush.msra.mxu1 %v618_v58  ;;  %v880_v41 = vld [vmem:[#allocation7 + $0x1f8] sm:$0xff] }
 0x5e9   :  { %657 = vmatpush.msra.mxu2 %v623_v47  ;;  %729 = vmatpush.msra.mxu1 %v614_v62  ;;  %v862_v47 = vld [vmem:[#allocation7 + $0x168] sm:$0xff] }
 0x5eb   :  { %658 = vmatpush.msra.mxu2 %v619_v51  ;;  %730 = vmatpush.msra.mxu1 %v610_v2 }
 0x5ed   :  { %659 = vmatpush.msra.mxu2 %v615_v55  ;;  %731 = vmatpush.msra.mxu1 %v606_v6 }
 0x5ef   :  { %660 = vmatpush.msra.mxu2 %v611_v59  ;;  %732 = vmatpush.msra.mxu1 %v602_v10  ;;  %v2136_v59 = vld [vmem:[%s3297_s8] ss:$0 sm:$0xff] }
 0x5f0   :  { %v861_v10 = vld [vmem:[#allocation7 + $0x160] sm:$0xff] }
 0x5f1   :  { %661 = vmatpush.msra.mxu2 %v607_v63  ;;  %733 = vmatpush.msra.mxu1 %v598_v16  ;;  %v2137_v63 = vld [vmem:[%s3298_s9] ss:$0 sm:$0xff]  ;;  %v876_v16 = vld [vmem:[#allocation7 + $0x1d8] sm:$0xff] }
 0x5f3   :  { %662 = vmatpush.msra.mxu2 %v603_v3  ;;  %734 = vmatpush.msra.mxu1 %v594_v22  ;;  %v875_v22 = vld [vmem:[#allocation7 + $0x1d0] sm:$0xff] }
 0x5f5   :  { %663 = vmatpush.msra.mxu2 %v599_v7  ;;  %735 = vmatpush.msra.mxu1 %v590_v24  ;;  %v874_v24 = vld [vmem:[#allocation7 + $0x1c8] sm:$0xff] }
 0x5f7   :  { %664 = vmatpush.msra.mxu2 %v595_v11  ;;  %v877_v11 = vld [vmem:[#allocation7 + $0x1e0] sm:$0xff] }
 0x5f9   :  { %665 = vmatpush.msra.mxu2 %v591_v18  ;;  %v830_v18 = vld [vmem:[#allocation7 + $0x68] sm:$0xff] }
 0x5fb   :  { %666 = vmatpush.msra.mxu2 %v587_v23  ;;  %v829_v23 = vld [vmem:[#allocation7 + $0x60] sm:$0xff] }
 0x5fd   :  { %667 = vmatpush.msra.mxu2 %v583_v25  ;;  %v828_v25 = vld [vmem:[#allocation7 + $0x58] sm:$0xff] }
 0x64f   :  { %v530_v28 = vpop.xlane.xlu0 %529 }
 0x650   :  { %v533_v17 = vmul.f32 %v530_v28, %v2475_v14  ;;  %v585_v28 = vld [vmem:[%s3299_s10 + $0x30] sm:$0xff] }
 0x652   :  { %v2583_v29 = vsub.f32 %v525_v13, %v533_v17  ;;  %v597_v13 = vld [vmem:[%s3299_s10 + $0x90] sm:$0xff]  ;;  %v586_v17 = vld [vmem:[%s3299_s10 + $0x38] sm:$0xff] }
 0x653   :  { %710 = vmatpush.msrb.mxu0 %v597_v13  ;;  %736 = vmatpush.msra.mxu1 %v586_v17  ;;  %v860_v13 = vld [vmem:[#allocation7 + $0x158] sm:$0xff]  ;;  %v873_v17 = vld [vmem:[#allocation7 + $0x1c0] sm:$0xff] }
 0x654   :  { %v537_v31 = vmul.f32 %v2583_v29, %v2583_v29 }
 0x655   :  { %711 = vmatpush.msrb.mxu0 %v593_v20  ;;  %v859_v20 = vld [vmem:[#allocation7 + $0x150] sm:$0xff] }
 0x656   :  { %539 = vadd.xlane.f32.xlu2 %v537_v31  ;;  %v579_v31 = vld [vmem:[%s3299_s10] sm:$0xff] }
 0x657   :  { %v532_v33 = vpop.xlane.xlu1 %531  ;;  %712 = vmatpush.msrb.mxu0 %v589_v30  ;;  %668 = vmatpush.msra.mxu2 %v579_v31  ;;  %v858_v30 = vld [vmem:[#allocation7 + $0x148] sm:$0xff]  ;;  %v827_v31 = vld [vmem:[#allocation7 + $0x50] sm:$0xff] }
 0x658   :  { %v534_v35 = vmul.f32 %v532_v33, %v2475_v14  ;;  %v580_v33 = vld [vmem:[%s3299_s10 + $0x8] sm:$0xff] }
 0x659   :  { %713 = vmatpush.msrb.mxu0 %v585_v28  ;;  %885 = vmatpush.msrb.mxu2 %v832_v8  ;;  %v857_v28 = vld [vmem:[#allocation7 + $0x140] sm:$0xff]  ;;  %v834_v8 = vld [vmem:[#allocation7 + $0x88] sm:$0xff] }
 0x65a   :  { %v2588_v21 = vsub.f32 %v526_v19, %v534_v35  ;;  %v592_v19 = vld [vmem:[%s3299_s10 + $0x68] sm:$0xff]  ;;  %v581_v35 = vld [vmem:[%s3299_s10 + $0x10] sm:$0xff] }
 0x65b   :  { %688 = vmatpush.msrb.mxu3 %v592_v19  ;;  %714 = vmatpush.msrb.mxu0 %v581_v35  ;;  %v846_v19 = vld [vmem:[#allocation7 + $0xe8] sm:$0xff]  ;;  %v856_v35 = vld [vmem:[#allocation7 + $0x138] sm:$0xff] }
 0x65c   :  { %v538_v36 = vmul.f32 %v2588_v21, %v2588_v21 }
 0x65d   :  { %689 = vmatpush.msrb.mxu3 %v588_v26  ;;  %931 = vmatpush.msra.mxu0 %v864_v40  ;;  %v845_v26 = vld [vmem:[#allocation7 + $0xe0] sm:$0xff]  ;;  %v871_v40 = vld [vmem:[#allocation7 + $0x1b0] sm:$0xff] }
 0x65e   :  { %541 = vadd.xlane.f32.xlu0 %v538_v36  ;;  %v582_v36 = vld [vmem:[%s3299_s10 + $0x18] sm:$0xff] }
 0x65f   :  { %690 = vmatpush.msrb.mxu3 %v584_v27  ;;  %737 = vmatpush.msra.mxu1 %v582_v36  ;;  %v844_v27 = vld [vmem:[#allocation7 + $0xd8] sm:$0xff] }
 0x660   :  { %932 = vmatpush.msra.mxu0 %v863_v42  ;;  %v872_v36 = vld [vmem:[#allocation7 + $0x1b8] sm:$0xff]  ;;  %v841_v42 = vld [vmem:[#allocation7 + $0xc0] sm:$0xff] }
 0x661   :  { %691 = vmatpush.msrb.mxu3 %v580_v33  ;;  %954 = vmatpush.msrb.mxu1 %v880_v41  ;;  %v843_v33 = vld [vmem:[#allocation7 + $0xd0] sm:$0xff]  ;;  %v825_v41 = vld [vmem:[#allocation7 + $0x40] sm:$0xff] }
 0x662   :  { %933 = vmatpush.msra.mxu0 %v862_v47  ;;  %v824_v47 = vld [vmem:[#allocation7 + $0x38] sm:$0xff] }
 0x663   :  { %955 = vmatpush.msrb.mxu1 %v879_v45  ;;  %908 = vmatpush.msra.mxu3 %v848_v9  ;;  %v854_v45 = vld [vmem:[#allocation7 + $0x128] sm:$0xff] }
 0x664   :  { %934 = vmatpush.msra.mxu0 %v861_v10 }
 0x665   :  { %956 = vmatpush.msrb.mxu1 %v878_v48  ;;  %909 = vmatpush.msra.mxu3 %v847_v12  ;;  %v840_v48 = vld [vmem:[#allocation7 + $0xb8] sm:$0xff] }
 0x666   :  { %935 = vmatpush.msra.mxu0 %v860_v13 }
 0x667   :  { %957 = vmatpush.msrb.mxu1 %v877_v11  ;;  %910 = vmatpush.msra.mxu3 %v846_v19  ;;  %v817_v11 = vld [vmem:[#allocation7] sm:$0xff] }
 0x668   :  { %936 = vmatpush.msra.mxu0 %v859_v20 }
 0x669   :  { %958 = vmatpush.msrb.mxu1 %v876_v16  ;;  %911 = vmatpush.msra.mxu3 %v845_v26 }
 0x66a   :  { %937 = vmatpush.msra.mxu0 %v858_v30 }
 0x66b   :  { %959 = vmatpush.msrb.mxu1 %v875_v22  ;;  %912 = vmatpush.msra.mxu3 %v844_v27 }
 0x66c   :  { %938 = vmatpush.msra.mxu0 %v857_v28 }
 0x66d   :  { %960 = vmatpush.msrb.mxu1 %v874_v24  ;;  %913 = vmatpush.msra.mxu3 %v843_v33 }
 0x66e   :  { %939 = vmatpush.msra.mxu0 %v856_v35 }
 0x66f   :  { %961 = vmatpush.msrb.mxu1 %v873_v17 }
 0x671   :  { %962 = vmatpush.msrb.mxu1 %v872_v36 }
 0x673   :  { %963 = vmatpush.msrb.mxu1 %v871_v40 }
 0x6c9   :  { %v540_v37 = vpop.xlane.xlu2 %539 }
 0x6ca   :  { %v543_v38 = vmul.f32 %v540_v37, %v2475_v14  ;;  %v826_v37 = vld [vmem:[#allocation7 + $0x48] sm:$0xff] }
 0x6cc   :  { %v545_v39 = vadd.f32 1e-12, %v543_v38  ;;  %v842_v38 = vld [vmem:[#allocation7 + $0xc8] sm:$0xff] }
 0x6cd   :  { %914 = vmatpush.msra.mxu3 %v842_v38 }
 0x6ce   :  { %2171 = vrsqrt.f32 %v545_v39  ;;  %vm553_vm11 = vweird.f32 %v545_v39 }
 0x6cf   :  { %915 = vmatpush.msra.mxu3 %v841_v42 }
 0x6d1   :  { %v542_v46 = vpop.xlane.xlu0 %541  ;;  %916 = vmatpush.msra.mxu3 %v840_v48 }
 0x6d2   :  { %v544_v49 = vmul.f32 %v542_v46, %v2475_v14  ;;  %v870_v46 = vld [vmem:[#allocation7 + $0x1a8] sm:$0xff] }
 0x6d3   :  { %964 = vmatpush.msrb.mxu1 %v870_v46 }
 0x6d4   :  { %v2172_v50 = vpop.eup %2171  ;;  %v546_v51 = vadd.f32 1e-12, %v544_v49  ;;  %v853_v49 = vld [vmem:[#allocation7 + $0x120] sm:$0xff] }
 0x6d5   :  { %v548_v52 = vmul.f32 %v2172_v50, %v545_v39  ;;  %vm554_vm10 = vweird.f32 %v2172_v50  ;;  %v855_v39 = vld [vmem:[#allocation7 + $0x130] sm:$0xff] }
 0x6d6   :  { %2173 = vrsqrt.f32 %v546_v51  ;;  %vm555_vm12 = vmor %vm553_vm11, %vm554_vm10  ;;  %vm563_vm14 = vweird.f32 %v546_v51  ;;  %940 = vmatpush.msra.mxu0 %v855_v39 }
 0x6d7   :  { %v549_v53 = vmul.f32 %v2172_v50, %v548_v52  ;;  %v839_v52 = vld [vmem:[#allocation7 + $0xb0] sm:$0xff] }
 0x6d8   :  { %941 = vmatpush.msra.mxu0 %v854_v45  ;;  %917 = vmatpush.msra.mxu3 %v839_v52 }
 0x6d9   :  { %v550_v54 = vmul.f32 0.5, %v549_v53  ;;  %v852_v53 = vld [vmem:[#allocation7 + $0x118] sm:$0xff] }
 0x6da   :  { %942 = vmatpush.msra.mxu0 %v853_v49 }
 0x6db   :  { %v551_v55 = vsub.f32 1.5, %v550_v54  ;;  %v868_v54 = vld [vmem:[#allocation7 + $0x198] sm:$0xff] }
 0x6dc   :  { %v2174_v56 = vpop.eup %2173  ;;  %943 = vmatpush.msra.mxu0 %v852_v53 }
 0x6dd   :  { %v552_v57 = vmul.f32 %v2172_v50, %v551_v55  ;;  %v558_v58 = vmul.f32 %v2174_v56, %v546_v51  ;;  %vm564_vm13 = vweird.f32 %v2174_v56  ;;  %v823_v51 = vld [vmem:[#allocation7 + $0x30] sm:$0xff]  ;;  %v822_v55 = vld [vmem:[#allocation7 + $0x28] sm:$0xff] }
 0x6de   :  { %vm565_vm15 = vmor %vm563_vm14, %vm564_vm13 }
 0x6df   :  { %v556_v60 = vsel %vm555_vm12, %v2172_v50, %v552_v57  ;;  %v559_v61 = vmul.f32 %v2174_v56, %v558_v58  ;;  %v869_v50 = vld [vmem:[#allocation7 + $0x1a0] sm:$0xff]  ;;  %v851_v57 = vld [vmem:[#allocation7 + $0x110] sm:$0xff] }
 0x6e0   :  { %v567_v62 = vmul.f32 %v556_v60, %v2583_v29  ;;  %965 = vmatpush.msrb.mxu1 %v869_v50  ;;  %v867_v58 = vld [vmem:[#allocation7 + $0x190] sm:$0xff]  ;;  %v837_v60 = vld [vmem:[#allocation7 + $0xa0] sm:$0xff]  ;;  %944 = vmatpush.msra.mxu0 %v851_v57 }
 0x6e1   :  { %v560_v0 = vmul.f32 0.5, %v559_v61  ;;  %v850_v61 = vld [vmem:[#allocation7 + $0x108] sm:$0xff] }
 0x6e2   :  { %v572_v1 = vmul.f32 %v2136_v59, %v567_v62  ;;  %966 = vmatpush.msrb.mxu1 %v868_v54  ;;  %v866_v62 = vld [vmem:[#allocation7 + $0x188] sm:$0xff]  ;;  %945 = vmatpush.msra.mxu0 %v850_v61 }
 0x6e3   :  { %v561_v2 = vsub.f32 1.5, %v560_v0  ;;  %v836_v0 = vld [vmem:[#allocation7 + $0x98] sm:$0xff] }
 0x6e4   :  { %v2769_v3 = vadd.f32 %v2137_v63, %v572_v1  ;;  %967 = vmatpush.msrb.mxu1 %v867_v58  ;;  %v849_v1 = vld [vmem:[#allocation7 + $0x100] sm:$0xff] }
 0x6e5   :  { %v562_v4 = vmul.f32 %v2174_v56, %v561_v2  ;;  %v865_v2 = vld [vmem:[#allocation7 + $0x180] sm:$0xff]  ;;  %946 = vmatpush.msra.mxu0 %v849_v1 }
 0x6e6   :  { %669 = vmatmul.f32.vlgmr.msra.gmra.mxu2 %v2769_v3  ;;  %692 = vmatmul.f32.vlgmr.msrb.gmra.mxu3 %v2769_v3 }
 0x6e7   :  { %v566_v5 = vsel %vm565_vm15, %v2174_v56, %v562_v4  ;;  %715 = vmatmul.f32.vlgmr.msrb.gmra.mxu0 %v2769_v3  ;;  %738 = vmatmul.f32.vlgmr.msra.gmra.mxu1 %v2769_v3  ;;  %v838_v56 = vld [vmem:[#allocation7 + $0xa8] sm:$0xff]  ;;  %v643_v4 = vld [vmem:[%s3300_s11] sm:$0xf] }
 0x6e8   :  { %v568_v29 = vmul.f32 %v566_v5, %v2588_v21  ;;  %v831_v21 = vld [vmem:[#allocation7 + $0x70] sm:$0xff]  ;;  %918 = vmatpush.msra.mxu3 %v838_v56  ;;  %968 = vmatpush.msrb.mxu1 %v866_v62  ;;  %v647_v9 = vperm.slane %v643_v4, 2  ;;  %v648_v10 = vperm.slane %v643_v4, 3  ;;  %v645_v19 = vperm.slane %v643_v4, 0 }
 0x6e9   :  { %886 = vmatpush.msrb.mxu2 %v831_v21  ;;  %v819_v5 = vld [vmem:[#allocation7 + $0x10] sm:$0xff]  ;;  %v833_v21 = vld [vmem:[#allocation7 + $0x80] sm:$0xff]  ;;  %v646_v20 = vperm.slane %v643_v4, 1 }
 0x6ea   :  { %v573_v6 = vmul.f32 %v2136_v59, %v568_v29  ;;  %v821_v59 = vld [vmem:[#allocation7 + $0x20] sm:$0xff]  ;;  %919 = vmatpush.msra.mxu3 %v837_v60  ;;  %969 = vmatpush.msrb.mxu1 %v865_v2  ;;  %v835_v29 = vld [vmem:[#allocation7 + $0x90] sm:$0xff] }
 0x6eb   :  { %887 = vmatpush.msrb.mxu2 %v830_v18 }
 0x6ec   :  { %v2776_v7 = vadd.f32 %v2137_v63, %v573_v6  ;;  %v820_v63 = vld [vmem:[#allocation7 + $0x18] sm:$0xff]  ;;  %920 = vmatpush.msra.mxu3 %v836_v0  ;;  %v818_v6 = vld [vmem:[#allocation7 + $0x8] sm:$0xff] }
 0x6ed   :  { %888 = vmatpush.msrb.mxu2 %v829_v23 }
 0x6ee   :  { %672 = vmatmul.f32.gmra.mxu2 %v2776_v7  ;;  %695 = vmatmul.f32.gmra.mxu3 %v2776_v7 }
 0x6ef   :  { %718 = vmatmul.f32.gmra.mxu0 %v2776_v7  ;;  %741 = vmatmul.f32.gmra.mxu1 %v2776_v7 }
 0x6f0   :  { %889 = vmatpush.msrb.mxu2 %v828_v25  ;;  %921 = vmatpush.msra.mxu3 %v835_v29 }
 0x6f2   :  { %890 = vmatpush.msrb.mxu2 %v827_v31  ;;  %922 = vmatpush.msra.mxu3 %v834_v8 }
 0x6f4   :  { %891 = vmatpush.msrb.mxu2 %v826_v37  ;;  %923 = vmatpush.msra.mxu3 %v833_v21 }
 0x6f6   :  { %892 = vmatpush.msrb.mxu2 %v825_v41 }
 0x6f8   :  { %893 = vmatpush.msrb.mxu2 %v824_v47 }
 0x6fa   :  { %894 = vmatpush.msrb.mxu2 %v823_v51 }
 0x6fc   :  { %895 = vmatpush.msrb.mxu2 %v822_v55 }
 0x6fe   :  { %896 = vmatpush.msrb.mxu2 %v821_v59 }
 0x700   :  { %897 = vmatpush.msrb.mxu2 %v820_v63 }
 0x702   :  { %898 = vmatpush.msrb.mxu2 %v819_v5 }
 0x704   :  { %899 = vmatpush.msrb.mxu2 %v818_v6 }
 0x706   :  { %900 = vmatpush.msrb.mxu2 %v817_v11 }
 0x764   :  { %v716_v12 = vpop.f32.mrf.mxu0  ;;  %v739_v13 = vpop.f32.mrf.mxu1 }
 0x765   :  { %v2785_v16 = vadd.f32 %v716_v12, %v647_v9  ;;  %v2787_v18 = vadd.f32 %v739_v13, %v648_v10 }
 0x767   :  { %v747_v22 = vmul.f32 %v2785_v16, %v2785_v16  ;;  %v748_v23 = vmul.f32 %v2787_v18, %v2787_v18 }
 0x769   :  { %v755_v26 = vmul.f32 %v747_v22, %v2785_v16  ;;  %v756_v30 = vmul.f32 %v748_v23, %v2787_v18  ;;  %v670_v24 = vpop.f32.mrf.mxu2  ;;  %v693_v25 = vpop.f32.mrf.mxu3 }
 0x76a   :  { %v2795_v27 = vadd.f32 %v670_v24, %v645_v19  ;;  %v2797_v28 = vadd.f32 %v693_v25, %v646_v20 }
 0x76b   :  { %v763_v17 = vmul.f32 0.044715, %v755_v26  ;;  %v764_v31 = vmul.f32 0.044715, %v756_v30 }
 0x76c   :  { %v745_v33 = vmul.f32 %v2795_v27, %v2795_v27  ;;  %v746_v35 = vmul.f32 %v2797_v28, %v2797_v28  ;;  %v719_v36 = vpop.f32.mrf.mxu0  ;;  %v742_v37 = vpop.f32.mrf.mxu1 }
 0x76d   :  { %v771_v38 = vadd.f32 %v763_v17, %v2785_v16  ;;  %v772_v39 = vadd.f32 %v764_v31, %v2787_v18  ;;  %v2805_v40 = vadd.f32 %v719_v36, %v647_v9  ;;  %v2807_v41 = vadd.f32 %v742_v37, %v648_v10 }
 0x76e   :  { %v753_v42 = vmul.f32 %v745_v33, %v2795_v27  ;;  %v754_v45 = vmul.f32 %v746_v35, %v2797_v28 }
 0x76f   :  { %v779_v46 = vmul.f32 0.7978846, %v771_v38  ;;  %v780_v47 = vmul.f32 0.7978846, %v772_v39  ;;  %v751_v48 = vmul.f32 %v2805_v40, %v2805_v40  ;;  %v752_v49 = vmul.f32 %v2807_v41, %v2807_v41 }
 0x770   :  { %v761_v50 = vmul.f32 0.044715, %v753_v42  ;;  %v762_v51 = vmul.f32 0.044715, %v754_v45 }
 0x771   :  { %2175 = vtanh.f32 %v779_v46  ;;  %v759_v52 = vmul.f32 %v751_v48, %v2805_v40  ;;  %v760_v53 = vmul.f32 %v752_v49, %v2807_v41  ;;  %v673_v54 = vpop.f32.mrf.mxu2  ;;  %v696_v55 = vpop.f32.mrf.mxu3 }
 0x772   :  { %2177 = vtanh.f32 %v780_v47  ;;  %v769_v56 = vadd.f32 %v761_v50, %v2795_v27  ;;  %v770_v57 = vadd.f32 %v762_v51, %v2797_v28  ;;  %v674_v58 = vadd.f32 %v673_v54, %v645_v19 }
 0x773   :  { %v697_v59 = vadd.f32 %v696_v55, %v646_v20  ;;  %v767_v60 = vmul.f32 0.044715, %v759_v52  ;;  %v768_v61 = vmul.f32 0.044715, %v760_v53 }
 0x774   :  { %v777_v62 = vmul.f32 0.7978846, %v769_v56  ;;  %v778_v63 = vmul.f32 0.7978846, %v770_v57  ;;  %v749_v0 = vmul.f32 %v674_v58, %v674_v58 }
 0x775   :  { %v750_v1 = vmul.f32 %v697_v59, %v697_v59  ;;  %v775_v2 = vadd.f32 %v767_v60, %v2805_v40  ;;  %v776_v4 = vadd.f32 %v768_v61, %v2807_v41 }
 0x776   :  { %2179 = vtanh.f32 %v777_v62  ;;  %v757_v5 = vmul.f32 %v749_v0, %v674_v58 }
 0x777   :  { %v2176_v29 = vpop.eup %2175  ;;  %2181 = vtanh.f32 %v778_v63  ;;  %v758_v6 = vmul.f32 %v750_v1, %v697_v59  ;;  %v783_v8 = vmul.f32 0.7978846, %v775_v2  ;;  %v784_v9 = vmul.f32 0.7978846, %v776_v4 }
 0x778   :  { %v2178_v10 = vpop.eup %2177  ;;  %v795_v11 = vadd.f32 1.0, %v2176_v29  ;;  %v765_v21 = vmul.f32 0.044715, %v757_v5 }
 0x779   :  { %v796_v12 = vadd.f32 1.0, %v2178_v10  ;;  %2183 = vtanh.f32 %v783_v8  ;;  %v766_v13 = vmul.f32 0.044715, %v758_v6  ;;  %v1077_v10 = vld [vmem:[#allocation2 + $0x2e8] sm:$0xff] }
 0x77a   :  { %v803_v19 = vmul.f32 0.5, %v795_v11  ;;  %2185 = vtanh.f32 %v784_v9  ;;  %v773_v20 = vadd.f32 %v765_v21, %v674_v58  ;;  %v1078_v11 = vld [vmem:[#allocation2 + $0x2f0] sm:$0xff]  ;;  %v1079_v21 = vld [vmem:[#allocation2 + $0x2f8] sm:$0xff]  ;;  %1089 = vmatpush.msra.mxu2 %v1077_v10 }
 0x77b   :  { %v804_v22 = vmul.f32 0.5, %v796_v12  ;;  %v774_v23 = vadd.f32 %v766_v13, %v697_v59  ;;  %1112 = vmatpush.msrb.mxu3 %v1078_v11  ;;  %v1074_v12 = vld [vmem:[#allocation2 + $0x2d0] sm:$0xff]  ;;  %v1075_v13 = vld [vmem:[#allocation2 + $0x2d8] sm:$0xff]  ;;  %1135 = vmatpush.msrb.mxu0 %v1079_v21 }
 0x77c   :  { %v2180_v26 = vpop.eup %2179  ;;  %v811_v30 = vmul.f32 %v803_v19, %v2785_v16  ;;  %v781_v24 = vmul.f32 0.7978846, %v773_v20  ;;  %v1076_v19 = vld [vmem:[#allocation2 + $0x2e0] sm:$0xff]  ;;  %1090 = vmatpush.msra.mxu2 %v1074_v12 }
 0x77d   :  { %v2182_v25 = vpop.eup %2181  ;;  %v812_v17 = vmul.f32 %v804_v22, %v2787_v18  ;;  %v793_v31 = vadd.f32 1.0, %v2180_v26  ;;  %v782_v33 = vmul.f32 0.7978846, %v774_v23  ;;  %1113 = vmatpush.msrb.mxu3 %v1075_v13  ;;  %1136 = vmatpush.msrb.mxu0 %v1076_v19 }
 0x77e   :  { %947 = vmatmul.f32.vlgmr.msra.gmra.mxu0 %v811_v30  ;;  %v794_v35 = vadd.f32 1.0, %v2182_v25  ;;  %2187 = vtanh.f32 %v781_v24  ;;  %v1071_v25 = vld [vmem:[#allocation2 + $0x2b8] sm:$0xff] }
 0x77f   :  { %v2184_v36 = vpop.eup %2183  ;;  %970 = vmatmul.f32.vlgmr.msrb.gmra.mxu1 %v812_v17  ;;  %v801_v37 = vmul.f32 0.5, %v793_v31  ;;  %2189 = vtanh.f32 %v782_v33  ;;  %v1072_v17 = vld [vmem:[#allocation2 + $0x2c0] sm:$0xff]  ;;  %v1073_v31 = vld [vmem:[#allocation2 + $0x2c8] sm:$0xff]  ;;  %1091 = vmatpush.msra.mxu2 %v1071_v25 }
 0x780   :  { %v2186_v38 = vpop.eup %2185  ;;  %v802_v39 = vmul.f32 0.5, %v794_v35  ;;  %v799_v42 = vadd.f32 1.0, %v2184_v36  ;;  %1114 = vmatpush.msrb.mxu3 %v1072_v17  ;;  %1137 = vmatpush.msrb.mxu0 %v1073_v31  ;;  %v1068_v33 = vld [vmem:[#allocation2 + $0x2a0] sm:$0xff]  ;;  %v1069_v35 = vld [vmem:[#allocation2 + $0x2a8] sm:$0xff]  ;;  %v1070_v36 = vld [vmem:[#allocation2 + $0x2b0] sm:$0xff] }
 0x781   :  { %v809_v45 = vmul.f32 %v801_v37, %v2795_v27  ;;  %v800_v46 = vadd.f32 1.0, %v2186_v38  ;;  %1092 = vmatpush.msra.mxu2 %v1068_v33  ;;  %v1065_v37 = vld [vmem:[#allocation2 + $0x288] sm:$0xff]  ;;  %v1066_v38 = vld [vmem:[#allocation2 + $0x290] sm:$0xff]  ;;  %v2139_v25 = vld [vmem:[%s3303_s14] ss:$0 sm:$0xff] }
 0x782   :  { %v810_v16 = vmul.f32 %v802_v39, %v2797_v28  ;;  %v807_v47 = vmul.f32 0.5, %v799_v42  ;;  %v2138_v28 = vld [vmem:[%s3302_s13] ss:$0 sm:$0xff]  ;;  %1115 = vmatpush.msrb.mxu3 %v1069_v35  ;;  %1138 = vmatpush.msrb.mxu0 %v1070_v36  ;;  %v1067_v39 = vld [vmem:[#allocation2 + $0x298] sm:$0xff]  ;;  %v1062_v42 = vld [vmem:[#allocation2 + $0x270] sm:$0xff] }
 0x783   :  { %901 = vmatmul.f32.vlgmr.msrb.gmra.mxu2 %v809_v45  ;;  %v808_v18 = vmul.f32 0.5, %v800_v46  ;;  %v1063_v45 = vld [vmem:[#allocation2 + $0x278] sm:$0xff]  ;;  %v1064_v46 = vld [vmem:[#allocation2 + $0x280] sm:$0xff] }
 0x784   :  { %v2188_v48 = vpop.eup %2187  ;;  %924 = vmatmul.f32.vlgmr.msra.gmra.mxu3 %v810_v16  ;;  %v815_v49 = vmul.f32 %v807_v47, %v2805_v40  ;;  %1093 = vmatpush.msra.mxu2 %v1065_v37  ;;  %v1059_v16 = vld [vmem:[#allocation2 + $0x258] sm:$0xff]  ;;  %v1060_v47 = vld [vmem:[#allocation2 + $0x260] sm:$0xff] }
 0x785   :  { %v2190_v50 = vpop.eup %2189  ;;  %v816_v51 = vmul.f32 %v808_v18, %v2807_v41  ;;  %v797_v52 = vadd.f32 1.0, %v2188_v48  ;;  %1116 = vmatpush.msrb.mxu3 %v1066_v38  ;;  %1139 = vmatpush.msrb.mxu0 %v1067_v39  ;;  %v1061_v18 = vld [vmem:[#allocation2 + $0x268] sm:$0xff]  ;;  %v1056_v48 = vld [vmem:[#allocation2 + $0x240] sm:$0xff] }
 0x786   :  { %950 = vmatmul.f32.gmra.mxu0 %v815_v49  ;;  %v798_v53 = vadd.f32 1.0, %v2190_v50  ;;  %1094 = vmatpush.msra.mxu2 %v1062_v42  ;;  %v1057_v49 = vld [vmem:[#allocation2 + $0x248] sm:$0xff]  ;;  %v1058_v50 = vld [vmem:[#allocation2 + $0x250] sm:$0xff]  ;;  %v2140_v35 = vld [vmem:[%s3304_s15] ss:$0 sm:$0xff] }
 0x787   :  { %973 = vmatmul.f32.gmra.mxu1 %v816_v51  ;;  %v805_v54 = vmul.f32 0.5, %v797_v52  ;;  %1117 = vmatpush.msrb.mxu3 %v1063_v45  ;;  %v1053_v51 = vld [vmem:[#allocation2 + $0x228] sm:$0xff]  ;;  %v1054_v52 = vld [vmem:[#allocation2 + $0x230] sm:$0xff] }
 0x788   :  { %v806_v55 = vmul.f32 0.5, %v798_v53  ;;  %1140 = vmatpush.msrb.mxu0 %v1064_v46  ;;  %1095 = vmatpush.msra.mxu2 %v1059_v16  ;;  %v1055_v53 = vld [vmem:[#allocation2 + $0x238] sm:$0xff] }
 0x789   :  { %v813_v27 = vmul.f32 %v805_v54, %v674_v58  ;;  %1118 = vmatpush.msrb.mxu3 %v1060_v47  ;;  %v1050_v54 = vld [vmem:[#allocation2 + $0x210] sm:$0xff] }
 0x78a   :  { %v814_v56 = vmul.f32 %v806_v55, %v697_v59  ;;  %1141 = vmatpush.msrb.mxu0 %v1061_v18  ;;  %1096 = vmatpush.msra.mxu2 %v1056_v48  ;;  %v1051_v55 = vld [vmem:[#allocation2 + $0x218] sm:$0xff]  ;;  %v2045_v18 = vld [vmem:[%s3294_s5 + $0x3] sm:$0x7] }
 0x78b   :  { %904 = vmatmul.f32.gmra.mxu2 %v813_v27  ;;  %1119 = vmatpush.msrb.mxu3 %v1057_v49  ;;  %v1052_v27 = vld [vmem:[#allocation2 + $0x220] sm:$0xff]  ;;  %v1085_v49 = vperm.slane %v2045_v18, 2 }
 0x78c   :  { %927 = vmatmul.f32.gmra.mxu3 %v814_v56  ;;  %1142 = vmatpush.msrb.mxu0 %v1058_v50  ;;  %v1047_v56 = vld [vmem:[#allocation2 + $0x1f8] sm:$0xff] }
 0x78d   :  { %1097 = vmatpush.msra.mxu2 %v1053_v51  ;;  %1120 = vmatpush.msrb.mxu3 %v1054_v52 }
 0x78e   :  { %1143 = vmatpush.msrb.mxu0 %v1055_v53  ;;  %v1084_v53 = vperm.slane %v2045_v18, 1 }
 0x78f   :  { %1098 = vmatpush.msra.mxu2 %v1050_v54  ;;  %1121 = vmatpush.msrb.mxu3 %v1051_v55  ;;  %v1083_v54 = vperm.slane %v2045_v18, 0 }
 0x790   :  { %1144 = vmatpush.msrb.mxu0 %v1052_v27 }
 0x791   :  { %1099 = vmatpush.msra.mxu2 %v1047_v56 }
 0x7fb   :  { %v948_v61 = vpop.f32.mrf.mxu0 }
 0x7fc   :  { %v971_v41 = vpop.f32.mrf.mxu1 }
 0x803   :  { %v951_v5 = vpop.f32.mrf.mxu0 }
 0x804   :  { %v974_v6 = vpop.f32.mrf.mxu1 }
 0x806   :  { %v902_v57 = vpop.f32.mrf.mxu2 }
 0x807   :  { %v903_v60 = vadd.f32 %v2138_v28, %v902_v57  ;;  %v925_v40 = vpop.f32.mrf.mxu3  ;;  %v1049_v57 = vld [vmem:[#allocation2 + $0x208] sm:$0xff] }
 0x808   :  { %1145 = vmatpush.msrb.mxu0 %v1049_v57 }
 0x809   :  { %v926_v62 = vadd.f32 %v925_v40, %v903_v60  ;;  %v1044_v60 = vld [vmem:[#allocation2 + $0x1e0] sm:$0xff]  ;;  %v1045_v40 = vld [vmem:[#allocation2 + $0x1e8] sm:$0xff] }
 0x80a   :  { %1100 = vmatpush.msra.mxu2 %v1044_v60 }
 0x80b   :  { %v949_v63 = vadd.f32 %v948_v61, %v926_v62  ;;  %v1046_v61 = vld [vmem:[#allocation2 + $0x1f0] sm:$0xff]  ;;  %v1041_v62 = vld [vmem:[#allocation2 + $0x1c8] sm:$0xff] }
 0x80c   :  { %1146 = vmatpush.msrb.mxu0 %v1046_v61  ;;  %1101 = vmatpush.msra.mxu2 %v1041_v62 }
 0x80d   :  { %v972_v0 = vadd.f32 %v971_v41, %v949_v63  ;;  %v1042_v41 = vld [vmem:[#allocation2 + $0x1d0] sm:$0xff]  ;;  %v1043_v63 = vld [vmem:[#allocation2 + $0x1d8] sm:$0xff] }
 0x80e   :  { %v905_v1 = vpop.f32.mrf.mxu2  ;;  %1147 = vmatpush.msrb.mxu0 %v1043_v63 }
 0x80f   :  { %v906_v2 = vadd.f32 %v2138_v28, %v905_v1  ;;  %v977_v4 = vadd.f32 %v972_v0, %v2769_v3  ;;  %v928_v58 = vpop.f32.mrf.mxu3  ;;  %v1048_v28 = vld [vmem:[#allocation2 + $0x200] sm:$0xff]  ;;  %v1038_v0 = vld [vmem:[#allocation2 + $0x1b0] sm:$0xff]  ;;  %v1039_v1 = vld [vmem:[#allocation2 + $0x1b8] sm:$0xff] }
 0x810   :  { %1122 = vmatpush.msrb.mxu3 %v1048_v28  ;;  %1102 = vmatpush.msra.mxu2 %v1038_v0 }
 0x811   :  { %v929_v59 = vadd.f32 %v928_v58, %v906_v2  ;;  %981 = vadd.xlane.f32.xlu1 %v977_v4  ;;  %v1040_v2 = vld [vmem:[#allocation2 + $0x1c0] sm:$0xff] }
 0x812   :  { %1123 = vmatpush.msrb.mxu3 %v1045_v40  ;;  %1148 = vmatpush.msrb.mxu0 %v1040_v2  ;;  %v1036_v58 = vld [vmem:[#allocation2 + $0x1a0] sm:$0xff] }
 0x813   :  { %v952_v29 = vadd.f32 %v951_v5, %v929_v59  ;;  %v1037_v59 = vld [vmem:[#allocation2 + $0x1a8] sm:$0xff]  ;;  %v1032_v5 = vld [vmem:[#allocation2 + $0x180] sm:$0xff] }
 0x814   :  { %1124 = vmatpush.msrb.mxu3 %v1042_v41  ;;  %1149 = vmatpush.msrb.mxu0 %v1037_v59 }
 0x815   :  { %v975_v8 = vadd.f32 %v974_v6, %v952_v29  ;;  %v1033_v29 = vld [vmem:[#allocation2 + $0x188] sm:$0xff]  ;;  %v1034_v6 = vld [vmem:[#allocation2 + $0x190] sm:$0xff] }
 0x816   :  { %1125 = vmatpush.msrb.mxu3 %v1039_v1  ;;  %1150 = vmatpush.msrb.mxu0 %v1034_v6  ;;  %v2241_v1 = vld [vmem:[%s3322_s1] sm:$0xff] }
 0x817   :  { %v978_v9 = vadd.f32 %v975_v8, %v2776_v7 }
 0x818   :  { %1126 = vmatpush.msrb.mxu3 %v1036_v58 }
 0x819   :  { %983 = vadd.xlane.f32.xlu2 %v978_v9 }
 0x81a   :  { %1127 = vmatpush.msrb.mxu3 %v1033_v29 }
 0x884   :  { %v982_v3 = vpop.xlane.xlu1 %981 }
 0x885   :  { %v985_v20 = vmul.f32 %v982_v3, %v2475_v14 }
 0x887   :  { %v2833_v22 = vsub.f32 %v977_v4, %v985_v20  ;;  %v1035_v4 = vld [vmem:[#allocation2 + $0x198] sm:$0xff] }
 0x888   :  { %1103 = vmatpush.msra.mxu2 %v1035_v4 }
 0x889   :  { %v989_v7 = vmul.f32 %v2833_v22, %v2833_v22 }
 0x88a   :  { %1104 = vmatpush.msra.mxu2 %v1032_v5 }
 0x88b   :  { %991 = vadd.xlane.f32.xlu0 %v989_v7 }
 0x88c   :  { %v984_v23 = vpop.xlane.xlu2 %983 }
 0x88d   :  { %v986_v26 = vmul.f32 %v984_v23, %v2475_v14 }
 0x88f   :  { %v2838_v30 = vsub.f32 %v978_v9, %v986_v26 }
 0x891   :  { %v990_v24 = vmul.f32 %v2838_v30, %v2838_v30 }
 0x893   :  { %993 = vadd.xlane.f32.xlu1 %v990_v24 }
 0x8fe   :  { %v992_v8 = vpop.xlane.xlu0 %991 }
 0x8ff   :  { %v995_v9 = vmul.f32 %v992_v8, %v2475_v14 }
 0x901   :  { %v997_v10 = vadd.f32 1e-12, %v995_v9  ;;  %v2242_v9 = vld [vmem:[%s3322_s1 + $0x8] sm:$0xff] }
 0x903   :  { %2191 = vrsqrt.f32 %v997_v10  ;;  %vm1005_vm1 = vweird.f32 %v997_v10 }
 0x906   :  { %v994_v11 = vpop.xlane.xlu1 %993 }
 0x907   :  { %v996_v21 = vmul.f32 %v994_v11, %v2475_v14 }
 0x909   :  { %v2192_v12 = vpop.eup %2191  ;;  %v998_v13 = vadd.f32 1e-12, %v996_v21 }
 0x90a   :  { %v1000_v19 = vmul.f32 %v2192_v12, %v997_v10  ;;  %vm1006_vm0 = vweird.f32 %v2192_v12 }
 0x90b   :  { %2193 = vrsqrt.f32 %v998_v13  ;;  %vm1007_vm2 = vmor %vm1005_vm1, %vm1006_vm0  ;;  %vm1015_vm4 = vweird.f32 %v998_v13 }
 0x90c   :  { %v1001_v3 = vmul.f32 %v2192_v12, %v1000_v19 }
 0x90e   :  { %v1002_v20 = vmul.f32 0.5, %v1001_v3 }
 0x910   :  { %v1003_v7 = vsub.f32 1.5, %v1002_v20 }
 0x911   :  { %v2194_v23 = vpop.eup %2193 }
 0x912   :  { %v1004_v26 = vmul.f32 %v2192_v12, %v1003_v7  ;;  %v1010_v24 = vmul.f32 %v2194_v23, %v998_v13  ;;  %vm1016_vm3 = vweird.f32 %v2194_v23 }
 0x913   :  { %vm1017_vm5 = vmor %vm1015_vm4, %vm1016_vm3 }
 0x914   :  { %v1008_v17 = vsel %vm1007_vm2, %v2192_v12, %v1004_v26  ;;  %v1011_v31 = vmul.f32 %v2194_v23, %v1010_v24 }
 0x915   :  { %v1019_v33 = vmul.f32 %v1008_v17, %v2833_v22 }
 0x916   :  { %v1012_v36 = vmul.f32 0.5, %v1011_v31 }
 0x917   :  { %v1024_v37 = vmul.f32 %v2139_v25, %v1019_v33 }
 0x918   :  { %v1013_v38 = vsub.f32 1.5, %v1012_v36 }
 0x919   :  { %v2851_v39 = vadd.f32 %v2140_v35, %v1024_v37 }
 0x91a   :  { %v1014_v42 = vmul.f32 %v2194_v23, %v1013_v38 }
 0x91b   :  { %1105 = vmatmul.f32.vlgmr.msra.gmra.mxu2 %v2851_v39  ;;  %1128 = vmatmul.f32.vlgmr.msrb.gmra.mxu3 %v2851_v39 }
 0x91c   :  { %v1018_v45 = vsel %vm1017_vm5, %v2194_v23, %v1014_v42  ;;  %1151 = vmatmul.f32.vlgmr.msrb.gmra.mxu0 %v2851_v39 }
 0x91d   :  { %v1020_v22 = vmul.f32 %v1018_v45, %v2838_v30 }
 0x91f   :  { %v1025_v46 = vmul.f32 %v2139_v25, %v1020_v22 }
 0x921   :  { %v2857_v16 = vadd.f32 %v2140_v35, %v1025_v46 }
 0x923   :  { %1108 = vmatmul.f32.gmra.mxu2 %v2857_v16  ;;  %1131 = vmatmul.f32.gmra.mxu3 %v2857_v16 }
 0x924   :  { %1154 = vmatmul.f32.gmra.mxu0 %v2857_v16 }
 0x999   :  { %v1152_v47 = vpop.f32.mrf.mxu0 }
 0x99a   :  { %v1153_v52 = vadd.f32 %v1152_v47, %v1085_v49 }
 0x99e   :  { %v1129_v48 = vpop.f32.mrf.mxu3  ;;  %v1106_v30 = vpop.f32.mrf.mxu2 }
 0x99f   :  { %v1107_v56 = vadd.f32 %v1106_v30, %v1083_v54  ;;  %v1130_v28 = vadd.f32 %v1129_v48, %v1084_v53  ;;  %v1342_v48 = vld [vmem:[#allocation5 + $0xf8] sm:$0xff] }
 0x9a1   :  { %v1155_v50 = vpop.f32.mrf.mxu0  ;;  %v1158_v57 = vmul.f32 %v2515_v44, %v1107_v56  ;;  %v1242_v60 = vmul.f32 %v2533_v15, %v1107_v56  ;;  %v1334_v56 = vld [vmem:[#allocation5 + $0xb8] sm:$0xff] }
 0x9a2   :  { %v1156_v51 = vadd.f32 %v1155_v50, %v1085_v49  ;;  %v1341_v49 = vld [vmem:[#allocation5 + $0xf0] sm:$0xff]  ;;  %v1340_v50 = vld [vmem:[#allocation5 + $0xe8] sm:$0xff] }
 0x9a4   :  { %1229 = vmatpush.msrb.mxu2 %v1156_v51  ;;  %1313 = vmatpush.msra.mxu0 %v1156_v51  ;;  %v1339_v51 = vld [vmem:[#allocation5 + $0xe0] sm:$0xff] }
 0x9a6   :  { %1230 = vmatpush.msrb.mxu2 %v1153_v52  ;;  %1314 = vmatpush.msra.mxu0 %v1153_v52  ;;  %v1132_v55 = vpop.f32.mrf.mxu3  ;;  %v1109_v40 = vpop.f32.mrf.mxu2  ;;  %v1338_v52 = vld [vmem:[#allocation5 + $0xd8] sm:$0xff] }
 0x9a7   :  { %v1133_v27 = vadd.f32 %v1132_v55, %v1084_v53  ;;  %v1110_v61 = vadd.f32 %v1109_v40, %v1083_v54  ;;  %v1337_v53 = vld [vmem:[#allocation5 + $0xd0] sm:$0xff]  ;;  %v1336_v54 = vld [vmem:[#allocation5 + $0xc8] sm:$0xff]  ;;  %v1335_v55 = vld [vmem:[#allocation5 + $0xc0] sm:$0xff] }
 0x9a8   :  { %v1333_v40 = vld [vmem:[#allocation5 + $0xb0] sm:$0xff] }
 0x9a9   :  { %1174 = vmatpush.xpose.msra.mxu1 %v1133_v27  ;;  %1258 = vmatpush.xpose.msra.mxu3 %v1133_v27  ;;  %v1159_v62 = vmul.f32 %v2515_v44, %v1110_v61  ;;  %v1243_v41 = vmul.f32 %v2533_v15, %v1110_v61  ;;  %v1332_v61 = vld [vmem:[#allocation5 + $0xa8] sm:$0xff] }
 0x9ad   :  { %1175 = vmatpush.xpose.msra.mxu1 %v1130_v28  ;;  %1259 = vmatpush.xpose.msra.mxu3 %v1130_v28 }
 0x9b0   :  { %1176 = vmatmul.f32.vlgmr.msra.gmra.mxu1 %v1158_v57  ;;  %1260 = vmatmul.f32.vlgmr.msra.gmra.mxu3 %v1242_v60 }
 0x9b1   :  { %1348 = vmatpush.msrb.mxu1 %v1342_v48 }
 0x9b3   :  { %1349 = vmatpush.msrb.mxu1 %v1341_v49  ;;  %v2105_v49 = vld [vmem:[%s3299_s10 + $0x3a0] sm:$0xff] }
 0x9b5   :  { %1350 = vmatpush.msrb.mxu1 %v1340_v50  ;;  %v2106_v50 = vld [vmem:[%s3299_s10 + $0x3a8] sm:$0xff] }
 0x9b7   :  { %1351 = vmatpush.msrb.mxu1 %v1339_v51  ;;  %v2107_v51 = vld [vmem:[%s3299_s10 + $0x3b0] sm:$0xff] }
 0x9b8   :  { %1179 = vmatmul.f32.gmra.mxu1 %v1159_v62  ;;  %1263 = vmatmul.f32.gmra.mxu3 %v1243_v41  ;;  %v1331_v62 = vld [vmem:[#allocation5 + $0xa0] sm:$0xff] }
 0x9b9   :  { %1352 = vmatpush.msrb.mxu1 %v1338_v52  ;;  %v2108_v52 = vld [vmem:[%s3299_s10 + $0x3b8] sm:$0xff] }
 0x9bb   :  { %1353 = vmatpush.msrb.mxu1 %v1337_v53  ;;  %v2102_v53 = vld [vmem:[%s3299_s10 + $0x388] sm:$0xff] }
 0x9bd   :  { %1354 = vmatpush.msrb.mxu1 %v1336_v54  ;;  %v2103_v54 = vld [vmem:[%s3299_s10 + $0x390] sm:$0xff] }
 0x9bf   :  { %1355 = vmatpush.msrb.mxu1 %v1335_v55  ;;  %v2104_v55 = vld [vmem:[%s3299_s10 + $0x398] sm:$0xff] }
 0x9c1   :  { %1356 = vmatpush.msrb.mxu1 %v1334_v56  ;;  %v2098_v56 = vld [vmem:[%s3299_s10 + $0x368] sm:$0xff] }
 0x9c3   :  { %1357 = vmatpush.msrb.mxu1 %v1333_v40  ;;  %v2094_v40 = vld [vmem:[%s3299_s10 + $0x348] sm:$0xff] }
 0x9c5   :  { %1358 = vmatpush.msrb.mxu1 %v1332_v61  ;;  %v2095_v61 = vld [vmem:[%s3299_s10 + $0x350] sm:$0xff] }
 0x9c7   :  { %1359 = vmatpush.msrb.mxu1 %v1331_v62  ;;  %v2096_v62 = vld [vmem:[%s3299_s10 + $0x358] sm:$0xff] }
 0xa2d   :  { %v1177_v63 = vpop.f32.mrf.mxu1 }
 0xa2e   :  { %v1183_v0 = vmul.f32 0.125, %v1177_v63 }
 0xa30   :  { %v1185_v2 = vadd.f32 %v2241_v1, %v1183_v0 }
 0xa32   :  { %v1187_v4 = vsel %vm342_vm8, %v1185_v2, -inf }
 0xa33   :  { %v1261_v58 = vpop.f32.mrf.mxu3  ;;  %1188 = vmax.xlane.f32.xlu2 %v1187_v4 }
 0xa34   :  { %v1267_v59 = vmul.f32 0.125, %v1261_v58 }
 0xa35   :  { %v1180_v5 = vpop.f32.mrf.mxu1 }
 0xa36   :  { %v1184_v29 = vmul.f32 0.125, %v1180_v5  ;;  %v1269_v6 = vadd.f32 %v2241_v1, %v1267_v59  ;;  %v1330_v1 = vld [vmem:[#allocation5 + $0x98] sm:$0xff]  ;;  %v1329_v5 = vld [vmem:[#allocation5 + $0x90] sm:$0xff] }
 0xa37   :  { %1360 = vmatpush.msrb.mxu1 %v1330_v1  ;;  %v2092_v1 = vld [vmem:[%s3299_s10 + $0x338] sm:$0xff] }
 0xa38   :  { %v1271_v8 = vsel %vm342_vm8, %v1269_v6, -inf  ;;  %v1186_v10 = vadd.f32 %v2242_v9, %v1184_v29  ;;  %v1328_v29 = vld [vmem:[#allocation5 + $0x88] sm:$0xff] }
 0xa39   :  { %1272 = vmax.xlane.f32.xlu0 %v1271_v8  ;;  %1361 = vmatpush.msrb.mxu1 %v1329_v5  ;;  %v2081_v5 = vld [vmem:[%s3299_s10 + $0x2e0] sm:$0xff] }
 0xa3a   :  { %v1190_v11 = vsel %vm342_vm8, %v1186_v10, -inf }
 0xa3b   :  { %v1264_v21 = vpop.f32.mrf.mxu3  ;;  %1191 = vmax.xlane.f32.xlu1 %v1190_v11  ;;  %1362 = vmatpush.msrb.mxu1 %v1328_v29  ;;  %v2082_v29 = vld [vmem:[%s3299_s10 + $0x2e8] sm:$0xff] }
 0xa3c   :  { %v1268_v12 = vmul.f32 0.125, %v1264_v21 }
 0xa3e   :  { %v1270_v13 = vadd.f32 %v2242_v9, %v1268_v12 }
 0xa40   :  { %v1274_v19 = vsel %vm342_vm8, %v1270_v13, -inf }
 0xa41   :  { %1275 = vmax.xlane.f32.xlu2 %v1274_v19 }
 0xaa6   :  { %v1189_v3 = vpop.xlane.xlu2 %1188 }
 0xaa7   :  { %v1193_v20 = vsub.f32 %v1185_v2, %v1189_v3 }
 0xaa9   :  { %v1195_v7 = vmul.f32 1.442695, %v1193_v20 }
 0xaab   :  { %2195 = vpow2.f32 %v1195_v7  ;;  %v2141_v7 = vld [vmem:[%s3296_s7 + $0x1] ss:$0 sm:$0xff] }
 0xaac   :  { %v1273_v23 = vpop.xlane.xlu0 %1272 }
 0xaad   :  { %v1277_v26 = vsub.f32 %v1269_v6, %v1273_v23  ;;  %v1327_v6 = vld [vmem:[#allocation5 + $0x80] sm:$0xff] }
 0xaae   :  { %v1192_v24 = vpop.xlane.xlu1 %1191  ;;  %1363 = vmatpush.msrb.mxu1 %v1327_v6  ;;  %v2083_v6 = vld [vmem:[%s3299_s10 + $0x2f0] sm:$0xff] }
 0xaaf   :  { %v1279_v25 = vmul.f32 1.442695, %v1277_v26  ;;  %v1194_v17 = vsub.f32 %v1186_v10, %v1192_v24 }
 0xab1   :  { %v2196_v31 = vpop.eup %2195  ;;  %2197 = vpow2.f32 %v1279_v25  ;;  %v1197_v33 = vmul.f32 1.442695, %v1194_v17 }
 0xab2   :  { %v1199_v35 = vsel %vm342_vm8, %v2196_v31, 0.0 }
 0xab3   :  { %2199 = vpow2.f32 %v1197_v33  ;;  %1200 = vadd.xlane.f32.xlu0 %v1199_v35  ;;  %v2115_v33 = vld [vmem:[%s3299_s10 + $0x3f0] sm:$0xff]  ;;  %v2110_v35 = vld [vmem:[%s3299_s10 + $0x3c8] sm:$0xff] }
 0xab4   :  { %v1276_v36 = vpop.xlane.xlu2 %1275  ;;  %1549 = vmatpush.msrb.mxu0 %v2115_v33  ;;  %v2063_v33 = vld [vmem:[%s3299_s10 + $0x250] sm:$0xff] }
 0xab5   :  { %v1278_v37 = vsub.f32 %v1270_v13, %v1276_v36  ;;  %v2111_v36 = vld [vmem:[%s3299_s10 + $0x3d0] sm:$0xff] }
 0xab6   :  { %1550 = vmatpush.msrb.mxu0 %v2111_v36  ;;  %v2059_v36 = vld [vmem:[%s3299_s10 + $0x230] sm:$0xff] }
 0xab7   :  { %v2198_v38 = vpop.eup %2197  ;;  %v1281_v42 = vmul.f32 1.442695, %v1278_v37  ;;  %v2112_v37 = vld [vmem:[%s3299_s10 + $0x3d8] sm:$0xff] }
 0xab8   :  { %v1283_v45 = vsel %vm342_vm8, %v2198_v38, 0.0  ;;  %1551 = vmatpush.msrb.mxu0 %v2107_v51  ;;  %v1731_v51 = vld [vmem:[#allocation7 + $0x3f8] sm:$0xff] }
 0xab9   :  { %v2200_v22 = vpop.eup %2199  ;;  %2201 = vpow2.f32 %v1281_v42  ;;  %1284 = vadd.xlane.f32.xlu1 %v1283_v45 }
 0xaba   :  { %v1202_v46 = vsel %vm342_vm8, %v2200_v22, 0.0  ;;  %1552 = vmatpush.msrb.mxu0 %v2103_v54  ;;  %v1713_v54 = vld [vmem:[#allocation7 + $0x368] sm:$0xff] }
 0xabb   :  { %1203 = vadd.xlane.f32.xlu2 %v1202_v46 }
 0xabf   :  { %v2202_v47 = vpop.eup %2201 }
 0xac0   :  { %v1286_v18 = vsel %vm342_vm8, %v2202_v47, 0.0 }
 0xac1   :  { %1287 = vadd.xlane.f32.xlu0 %v1286_v18 }
 0xb26   :  { %v1201_v30 = vpop.xlane.xlu0 %1200 }
 0xb27   :  { %2203 = vrcp.f32 %v1201_v30  ;;  %v2101_v30 = vld [vmem:[%s3299_s10 + $0x380] sm:$0xff] }
 0xb2c   :  { %v1285_v27 = vpop.xlane.xlu1 %1284 }
 0xb2d   :  { %v2204_v28 = vpop.eup %2203  ;;  %2205 = vrcp.f32 %v1285_v27  ;;  %v2097_v27 = vld [vmem:[%s3299_s10 + $0x360] sm:$0xff] }
 0xb2e   :  { %v1207_v57 = vmul.f32 %v2204_v28, %v2196_v31  ;;  %v1204_v60 = vpop.xlane.xlu2 %1203  ;;  %v2099_v28 = vld [vmem:[%s3299_s10 + $0x370] sm:$0xff] }
 0xb2f   :  { %2207 = vrcp.f32 %v1204_v60  ;;  %1553 = vmatpush.msrb.mxu0 %v2099_v28  ;;  %v2093_v60 = vld [vmem:[%s3299_s10 + $0x340] sm:$0xff] }
 0xb30   :  { %2046 = vmatmul.msk.f32.vlgmr.msrb.gmra.mxu2 %vm342_vm8, %v1207_v57  ;;  %v2100_v57 = vld [vmem:[%s3299_s10 + $0x378] sm:$0xff] }
 0xb31   :  { %1554 = vmatpush.msrb.mxu0 %v2095_v61 }
 0xb33   :  { %v2206_v41 = vpop.eup %2205 }
 0xb34   :  { %v1291_v63 = vmul.f32 %v2206_v41, %v2198_v38  ;;  %v1288_v0 = vpop.xlane.xlu0 %1287  ;;  %v2089_v41 = vld [vmem:[%s3299_s10 + $0x320] sm:$0xff] }
 0xb35   :  { %v2208_v2 = vpop.eup %2207  ;;  %2209 = vrcp.f32 %v1288_v0  ;;  %v2091_v0 = vld [vmem:[%s3299_s10 + $0x330] sm:$0xff] }
 0xb36   :  { %2048 = vmatmul.msk.f32.vlgmr.msra.gmra.mxu0 %vm342_vm8, %v1291_v63  ;;  %v1208_v4 = vmul.f32 %v2208_v2, %v2200_v22  ;;  %v2090_v63 = vld [vmem:[%s3299_s10 + $0x328] sm:$0xff]  ;;  %v2085_v2 = vld [vmem:[%s3299_s10 + $0x300] sm:$0xff] }
 0xb37   :  { %1555 = vmatpush.msrb.mxu0 %v2091_v0  ;;  %v2142_v0 = vld [vmem:[%s3297_s8 + $0x1] ss:$0 sm:$0xff] }
 0xb38   :  { %2047 = vmatmul.msk.f32.gmra.mxu2 %vm342_vm8, %v1208_v4  ;;  %v2086_v4 = vld [vmem:[%s3299_s10 + $0x308] sm:$0xff] }
 0xb3b   :  { %v2210_v58 = vpop.eup %2209 }
 0xb3c   :  { %v1292_v59 = vmul.f32 %v2210_v58, %v2202_v47  ;;  %v2087_v58 = vld [vmem:[%s3299_s10 + $0x310] sm:$0xff] }
 0xb3d   :  { %1556 = vmatpush.msrb.mxu0 %v2087_v58  ;;  %v2143_v58 = vld [vmem:[%s3298_s9 + $0x1] ss:$0 sm:$0xff] }
 0xb3e   :  { %2049 = vmatmul.msk.f32.gmra.mxu0 %vm342_vm8, %v1292_v59  ;;  %v2088_v59 = vld [vmem:[%s3299_s10 + $0x318] sm:$0xff] }
 0xb3f   :  { %1557 = vmatpush.msrb.mxu0 %v2083_v6 }
 0xbb3   :  { %v1232_v8 = vpop.f32.mrf.mxu2  ;;  %v1316_v9 = vpop.f32.mrf.mxu0 }
 0xbb4   :  { %v1238_v10 = vmul.f32 %v2515_v44, %v1232_v8  ;;  %v1322_v11 = vmul.f32 %v2533_v15, %v1316_v9  ;;  %v2084_v8 = vld [vmem:[%s3299_s10 + $0x2f8] sm:$0xff]  ;;  %v2077_v9 = vld [vmem:[%s3299_s10 + $0x2c0] sm:$0xff] }
 0xbb6   :  { %v1324_v21 = vadd.f32 %v1322_v11, %v1238_v10  ;;  %v2078_v10 = vld [vmem:[%s3299_s10 + $0x2c8] sm:$0xff]  ;;  %v2079_v11 = vld [vmem:[%s3299_s10 + $0x2d0] sm:$0xff] }
 0xbb7   :  { %1558 = vmatpush.msrb.mxu0 %v2079_v11 }
 0xbb8   :  { %1364 = vmatmul.f32.vlgmr.msrb.gmra.mxu1 %v1324_v21  ;;  %v2080_v21 = vld [vmem:[%s3299_s10 + $0x2d8] sm:$0xff] }
 0xbbb   :  { %v1235_v12 = vpop.f32.mrf.mxu2  ;;  %v1319_v13 = vpop.f32.mrf.mxu0 }
 0xbbc   :  { %v1239_v19 = vmul.f32 %v2515_v44, %v1235_v12  ;;  %v1323_v3 = vmul.f32 %v2533_v15, %v1319_v13  ;;  %v2113_v44 = vld [vmem:[%s3299_s10 + $0x3e0] sm:$0xff]  ;;  %v2114_v15 = vld [vmem:[%s3299_s10 + $0x3e8] sm:$0xff] }
 0xbbd   :  { %1503 = vmatpush.msra.mxu2 %v2113_v44  ;;  %1526 = vmatpush.msrb.mxu3 %v2114_v15  ;;  %v2073_v12 = vld [vmem:[%s3299_s10 + $0x2a0] sm:$0xff]  ;;  %v2074_v13 = vld [vmem:[%s3299_s10 + $0x2a8] sm:$0xff] }
 0xbbe   :  { %v1325_v20 = vadd.f32 %v1323_v3, %v1239_v19  ;;  %v2075_v19 = vld [vmem:[%s3299_s10 + $0x2b0] sm:$0xff]  ;;  %v2076_v3 = vld [vmem:[%s3299_s10 + $0x2b8] sm:$0xff]  ;;  %v2061_v44 = vld [vmem:[%s3299_s10 + $0x240] sm:$0xff] }
 0xbbf   :  { %1527 = vmatpush.msrb.mxu3 %v2110_v35  ;;  %1559 = vmatpush.msrb.mxu0 %v2075_v19  ;;  %v2062_v15 = vld [vmem:[%s3299_s10 + $0x248] sm:$0xff]  ;;  %v1728_v19 = vld [vmem:[#allocation7 + $0x3e0] sm:$0xff] }
 0xbc0   :  { %1367 = vmatmul.f32.gmra.mxu1 %v1325_v20  ;;  %v2069_v20 = vld [vmem:[%s3299_s10 + $0x280] sm:$0xff]  ;;  %v2058_v35 = vld [vmem:[%s3299_s10 + $0x228] sm:$0xff] }
 0xbc1   :  { %1528 = vmatpush.msrb.mxu3 %v2106_v50  ;;  %v1715_v50 = vld [vmem:[#allocation7 + $0x378] sm:$0xff] }
 0xbc3   :  { %1529 = vmatpush.msrb.mxu3 %v2102_v53 }
 0xbc5   :  { %1530 = vmatpush.msrb.mxu3 %v2098_v56 }
 0xbc7   :  { %1531 = vmatpush.msrb.mxu3 %v2094_v40 }
 0xbc9   :  { %1532 = vmatpush.msrb.mxu3 %v2090_v63 }
 0xbcb   :  { %1533 = vmatpush.msrb.mxu3 %v2086_v4 }
 0xbcd   :  { %1534 = vmatpush.msrb.mxu3 %v2082_v29 }
 0xbcf   :  { %1535 = vmatpush.msrb.mxu3 %v2078_v10 }
 0xbd1   :  { %1536 = vmatpush.msrb.mxu3 %v2074_v13  ;;  %v1712_v13 = vld [vmem:[#allocation7 + $0x360] sm:$0xff] }
 0xc35   :  { %v1365_v23 = vpop.f32.mrf.mxu1 }
 0xc36   :  { %v1366_v26 = vadd.f32 %v2141_v7, %v1365_v23  ;;  %v2071_v23 = vld [vmem:[%s3299_s10 + $0x290] sm:$0xff] }
 0xc37   :  { %1560 = vmatpush.msrb.mxu0 %v2071_v23  ;;  %v1681_v23 = vld [vmem:[#allocation7 + $0x268] sm:$0xff] }
 0xc38   :  { %v1371_v24 = vadd.f32 %v1366_v26, %v2851_v39  ;;  %v2116_v39 = vld [vmem:[%s3299_s10 + $0x3f8] sm:$0xff] }
 0xc39   :  { %1572 = vmatpush.msra.mxu1 %v2116_v39  ;;  %v2072_v26 = vld [vmem:[%s3299_s10 + $0x298] sm:$0xff] }
 0xc3a   :  { %1377 = vadd.xlane.f32.xlu1 %v1371_v24  ;;  %v2064_v39 = vld [vmem:[%s3299_s10 + $0x258] sm:$0xff] }
 0xc3b   :  { %1573 = vmatpush.msra.mxu1 %v2112_v37  ;;  %v2060_v37 = vld [vmem:[%s3299_s10 + $0x238] sm:$0xff] }
 0xc3d   :  { %v1368_v25 = vpop.f32.mrf.mxu1  ;;  %1574 = vmatpush.msra.mxu1 %v2108_v52  ;;  %v1714_v52 = vld [vmem:[#allocation7 + $0x370] sm:$0xff] }
 0xc3e   :  { %v1369_v17 = vadd.f32 %v2141_v7, %v1368_v25  ;;  %v2070_v7 = vld [vmem:[%s3299_s10 + $0x288] sm:$0xff] }
 0xc3f   :  { %1575 = vmatpush.msra.mxu1 %v2104_v55  ;;  %1537 = vmatpush.msrb.mxu3 %v2070_v7  ;;  %v2066_v25 = vld [vmem:[%s3299_s10 + $0x268] sm:$0xff]  ;;  %v1727_v7 = vld [vmem:[#allocation7 + $0x3d8] sm:$0xff] }
 0xc40   :  { %v1372_v31 = vadd.f32 %v1369_v17, %v2857_v16  ;;  %v2109_v16 = vld [vmem:[%s3299_s10 + $0x3c0] sm:$0xff]  ;;  %v2067_v17 = vld [vmem:[%s3299_s10 + $0x270] sm:$0xff]  ;;  %v1729_v55 = vld [vmem:[#allocation7 + $0x3e8] sm:$0xff] }
 0xc41   :  { %1504 = vmatpush.msra.mxu2 %v2109_v16  ;;  %1576 = vmatpush.msra.mxu1 %v2100_v57  ;;  %v2057_v16 = vld [vmem:[%s3299_s10 + $0x220] sm:$0xff] }
 0xc42   :  { %1379 = vadd.xlane.f32.xlu2 %v1372_v31  ;;  %1538 = vmatpush.msrb.mxu3 %v2066_v25  ;;  %v1726_v25 = vld [vmem:[#allocation7 + $0x3d0] sm:$0xff] }
 0xc43   :  { %1505 = vmatpush.msra.mxu2 %v2105_v49  ;;  %1577 = vmatpush.msra.mxu1 %v2096_v62 }
 0xc44   :  { %1561 = vmatpush.msrb.mxu0 %v2067_v17  ;;  %1539 = vmatpush.msrb.mxu3 %v2062_v15  ;;  %v1680_v17 = vld [vmem:[#allocation7 + $0x260] sm:$0xff]  ;;  %v1725_v15 = vld [vmem:[#allocation7 + $0x3c8] sm:$0xff] }
 0xc45   :  { %1506 = vmatpush.msra.mxu2 %v2101_v30  ;;  %1578 = vmatpush.msra.mxu1 %v2092_v1  ;;  %v1730_v30 = vld [vmem:[#allocation7 + $0x3f0] sm:$0xff] }
 0xc46   :  { %1562 = vmatpush.msrb.mxu0 %v2063_v33  ;;  %1540 = vmatpush.msrb.mxu3 %v2058_v35  ;;  %v1679_v33 = vld [vmem:[#allocation7 + $0x258] sm:$0xff]  ;;  %v1724_v35 = vld [vmem:[#allocation7 + $0x3c0] sm:$0xff] }
 0xc47   :  { %1507 = vmatpush.msra.mxu2 %v2097_v27  ;;  %1579 = vmatpush.msra.mxu1 %v2088_v59 }
 0xc48   :  { %1563 = vmatpush.msrb.mxu0 %v2059_v36  ;;  %v1678_v36 = vld [vmem:[#allocation7 + $0x250] sm:$0xff] }
 0xc49   :  { %1508 = vmatpush.msra.mxu2 %v2093_v60  ;;  %1580 = vmatpush.msra.mxu1 %v2084_v8 }
 0xc4b   :  { %1509 = vmatpush.msra.mxu2 %v2089_v41  ;;  %1581 = vmatpush.msra.mxu1 %v2080_v21  ;;  %v1683_v21 = vld [vmem:[#allocation7 + $0x278] sm:$0xff] }
 0xc4d   :  { %1510 = vmatpush.msra.mxu2 %v2085_v2  ;;  %1582 = vmatpush.msra.mxu1 %v2076_v3  ;;  %v1698_v3 = vld [vmem:[#allocation7 + $0x2f0] sm:$0xff] }
 0xc4f   :  { %1511 = vmatpush.msra.mxu2 %v2081_v5  ;;  %1583 = vmatpush.msra.mxu1 %v2072_v26  ;;  %v1697_v26 = vld [vmem:[#allocation7 + $0x2e8] sm:$0xff] }
 0xc51   :  { %1512 = vmatpush.msra.mxu2 %v2077_v9 }
 0xc53   :  { %1513 = vmatpush.msra.mxu2 %v2073_v12  ;;  %v1699_v12 = vld [vmem:[#allocation7 + $0x2f8] sm:$0xff] }
 0xc55   :  { %1514 = vmatpush.msra.mxu2 %v2069_v20  ;;  %v1711_v20 = vld [vmem:[#allocation7 + $0x358] sm:$0xff] }
 0xcad   :  { %v1378_v38 = vpop.xlane.xlu1 %1377 }
 0xcae   :  { %v1381_v42 = vmul.f32 %v1378_v38, %v2475_v14  ;;  %v2053_v38 = vld [vmem:[%s3299_s10 + $0x200] sm:$0xff] }
 0xcb0   :  { %v2921_v45 = vsub.f32 %v1371_v24, %v1381_v42  ;;  %v2065_v24 = vld [vmem:[%s3299_s10 + $0x260] sm:$0xff]  ;;  %v2054_v42 = vld [vmem:[%s3299_s10 + $0x208] sm:$0xff] }
 0xcb1   :  { %1515 = vmatpush.msra.mxu2 %v2065_v24  ;;  %1541 = vmatpush.msrb.mxu3 %v2054_v42  ;;  %v1710_v24 = vld [vmem:[#allocation7 + $0x350] sm:$0xff]  ;;  %v1723_v42 = vld [vmem:[#allocation7 + $0x3b8] sm:$0xff] }
 0xcb2   :  { %v1385_v22 = vmul.f32 %v2921_v45, %v2921_v45 }
 0xcb3   :  { %1516 = vmatpush.msra.mxu2 %v2061_v44  ;;  %1760 = vmatpush.msra.mxu3 %v1699_v12  ;;  %v1709_v44 = vld [vmem:[#allocation7 + $0x348] sm:$0xff]  ;;  %v1668_v12 = vld [vmem:[#allocation7 + $0x200] sm:$0xff] }
 0xcb4   :  { %1387 = vadd.xlane.f32.xlu0 %v1385_v22  ;;  %v2055_v22 = vld [vmem:[%s3299_s10 + $0x210] sm:$0xff] }
 0xcb5   :  { %v1380_v46 = vpop.xlane.xlu2 %1379  ;;  %1517 = vmatpush.msra.mxu2 %v2057_v16  ;;  %1564 = vmatpush.msrb.mxu0 %v2055_v22  ;;  %v1708_v16 = vld [vmem:[#allocation7 + $0x340] sm:$0xff]  ;;  %v1677_v22 = vld [vmem:[#allocation7 + $0x248] sm:$0xff] }
 0xcb6   :  { %v1382_v47 = vmul.f32 %v1380_v46, %v2475_v14  ;;  %v2056_v46 = vld [vmem:[%s3299_s10 + $0x218] sm:$0xff]  ;;  %1761 = vmatpush.msra.mxu3 %v1698_v3 }
 0xcb7   :  { %1518 = vmatpush.msra.mxu2 %v2053_v38  ;;  %1783 = vmatpush.msra.mxu0 %v1715_v50  ;;  %v1707_v38 = vld [vmem:[#allocation7 + $0x338] sm:$0xff]  ;;  %v1692_v50 = vld [vmem:[#allocation7 + $0x2c0] sm:$0xff] }
 0xcb8   :  { %v2926_v18 = vsub.f32 %v1372_v31, %v1382_v47  ;;  %v2068_v31 = vld [vmem:[%s3299_s10 + $0x278] sm:$0xff]  ;;  %1762 = vmatpush.msra.mxu3 %v1697_v26  ;;  %s3323_s10 = sld [smem:[#allocation17_spill]] }
 0xcb9   :  { %1584 = vmatpush.msra.mxu1 %v2068_v31  ;;  %1784 = vmatpush.msra.mxu0 %v1714_v52  ;;  %v1696_v31 = vld [vmem:[#allocation7 + $0x2e0] sm:$0xff]  ;;  %v1721_v52 = vld [vmem:[#allocation7 + $0x3a8] sm:$0xff] }
 0xcba   :  { %v1386_v48 = vmul.f32 %v2926_v18, %v2926_v18  ;;  %1737 = vmatpush.msrb.mxu2 %v1683_v21  ;;  %1763 = vmatpush.msra.mxu3 %v1696_v31 }
 0xcbb   :  { %1585 = vmatpush.msra.mxu1 %v2064_v39  ;;  %1785 = vmatpush.msra.mxu0 %v1713_v54  ;;  %v1695_v39 = vld [vmem:[#allocation7 + $0x2d8] sm:$0xff]  ;;  %v1704_v54 = vld [vmem:[#allocation7 + $0x320] sm:$0xff] }
 0xcbc   :  { %1389 = vadd.xlane.f32.xlu1 %v1386_v48  ;;  %1764 = vmatpush.msra.mxu3 %v1695_v39 }
 0xcbd   :  { %1586 = vmatpush.msra.mxu1 %v2060_v37  ;;  %1786 = vmatpush.msra.mxu0 %v1712_v13  ;;  %v1694_v37 = vld [vmem:[#allocation7 + $0x2d0] sm:$0xff]  ;;  %v1684_v13 = vld [vmem:[#allocation7 + $0x280] sm:$0xff] }
 0xcbe   :  { %1765 = vmatpush.msra.mxu3 %v1694_v37  ;;  %s2028_s25 = sshll.u32 %s3323_s10, 4  ;;  %s2029_s25 = int_to_ptr.hbm [resolvable:$true] %s2028_s25 }
 0xcbf   :  { %1587 = vmatpush.msra.mxu1 %v2056_v46  ;;  %1787 = vmatpush.msra.mxu0 %v1711_v20  ;;  %v1693_v46 = vld [vmem:[#allocation7 + $0x2c8] sm:$0xff] }
 0xcc0   :  { %1766 = vmatpush.msra.mxu3 %v1693_v46 }
 0xcc1   :  { %1806 = vmatpush.msrb.mxu1 %v1731_v51  ;;  %1788 = vmatpush.msra.mxu0 %v1710_v24  ;;  %v1705_v51 = vld [vmem:[#allocation7 + $0x328] sm:$0xff] }
 0xcc2   :  { %1767 = vmatpush.msra.mxu3 %v1692_v50 }
 0xcc3   :  { %1807 = vmatpush.msrb.mxu1 %v1730_v30  ;;  %1789 = vmatpush.msra.mxu0 %v1709_v44  ;;  %v1675_v30 = vld [vmem:[#allocation7 + $0x238] sm:$0xff] }
 0xcc5   :  { %1808 = vmatpush.msrb.mxu1 %v1729_v55  ;;  %1790 = vmatpush.msra.mxu0 %v1708_v16  ;;  %v1720_v55 = vld [vmem:[#allocation7 + $0x3a0] sm:$0xff] }
 0xcc7   :  { %1809 = vmatpush.msrb.mxu1 %v1728_v19  ;;  %1791 = vmatpush.msra.mxu0 %v1707_v38 }
 0xcc9   :  { %1810 = vmatpush.msrb.mxu1 %v1727_v7 }
 0xccb   :  { %1811 = vmatpush.msrb.mxu1 %v1726_v25 }
 0xccd   :  { %1812 = vmatpush.msrb.mxu1 %v1725_v15 }
 0xccf   :  { %1813 = vmatpush.msrb.mxu1 %v1724_v35 }
 0xcd1   :  { %1814 = vmatpush.msrb.mxu1 %v1723_v42 }
 0xd27   :  { %v1388_v47 = vpop.xlane.xlu0 %1387 }
 0xd28   :  { %v1391_v48 = vmul.f32 %v1388_v47, %v2475_v14  ;;  %v1706_v47 = vld [vmem:[#allocation7 + $0x330] sm:$0xff] }
 0xd29   :  { %1792 = vmatpush.msra.mxu0 %v1706_v47 }
 0xd2a   :  { %v1393_v49 = vadd.f32 1e-12, %v1391_v48  ;;  %v1722_v48 = vld [vmem:[#allocation7 + $0x3b0] sm:$0xff] }
 0xd2b   :  { %1815 = vmatpush.msrb.mxu1 %v1722_v48  ;;  %1793 = vmatpush.msra.mxu0 %v1705_v51 }
 0xd2c   :  { %2211 = vrsqrt.f32 %v1393_v49  ;;  %vm1401_vm7 = vweird.f32 %v1393_v49 }
 0xd2d   :  { %1816 = vmatpush.msrb.mxu1 %v1721_v52  ;;  %1794 = vmatpush.msra.mxu0 %v1704_v54 }
 0xd2f   :  { %v1390_v53 = vpop.xlane.xlu1 %1389  ;;  %1817 = vmatpush.msrb.mxu1 %v1720_v55 }
 0xd30   :  { %v1392_v27 = vmul.f32 %v1390_v53, %v2475_v14  ;;  %v1691_v53 = vld [vmem:[#allocation7 + $0x2b8] sm:$0xff] }
 0xd31   :  { %1768 = vmatpush.msra.mxu3 %v1691_v53 }
 0xd32   :  { %v2212_v56 = vpop.eup %2211  ;;  %v1394_v28 = vadd.f32 1e-12, %v1392_v27  ;;  %v1674_v27 = vld [vmem:[#allocation7 + $0x230] sm:$0xff] }
 0xd33   :  { %v1396_v57 = vmul.f32 %v2212_v56, %v1393_v49  ;;  %vm1402_vm6 = vweird.f32 %v2212_v56  ;;  %v1676_v49 = vld [vmem:[#allocation7 + $0x240] sm:$0xff] }
 0xd34   :  { %2213 = vrsqrt.f32 %v1394_v28  ;;  %vm1403_vm9 = vmor %vm1401_vm7, %vm1402_vm6  ;;  %vm1411_vm11 = vweird.f32 %v1394_v28 }
 0xd35   :  { %v1397_v60 = vmul.f32 %v2212_v56, %v1396_v57  ;;  %v1719_v57 = vld [vmem:[#allocation7 + $0x398] sm:$0xff] }
 0xd36   :  { %1818 = vmatpush.msrb.mxu1 %v1719_v57 }
 0xd37   :  { %v1398_v40 = vmul.f32 0.5, %v1397_v60  ;;  %v1673_v60 = vld [vmem:[#allocation7 + $0x228] sm:$0xff] }
 0xd39   :  { %v1399_v61 = vsub.f32 1.5, %v1398_v40  ;;  %v1689_v40 = vld [vmem:[#allocation7 + $0x2a8] sm:$0xff] }
 0xd3a   :  { %v2214_v62 = vpop.eup %2213 }
 0xd3b   :  { %v1400_v41 = vmul.f32 %v2212_v56, %v1399_v61  ;;  %v1406_v63 = vmul.f32 %v2214_v62, %v1394_v28  ;;  %vm1412_vm10 = vweird.f32 %v2214_v62  ;;  %v1703_v28 = vld [vmem:[#allocation7 + $0x318] sm:$0xff]  ;;  %v1702_v61 = vld [vmem:[#allocation7 + $0x310] sm:$0xff] }
 0xd3c   :  { %vm1413_vm12 = vmor %vm1411_vm11, %vm1412_vm10  ;;  %1795 = vmatpush.msra.mxu0 %v1703_v28 }
 0xd3d   :  { %v1404_v1 = vsel %vm1403_vm9, %v2212_v56, %v1400_v41  ;;  %v1407_v2 = vmul.f32 %v2214_v62, %v1406_v63  ;;  %v1690_v56 = vld [vmem:[#allocation7 + $0x2b0] sm:$0xff]  ;;  %v1672_v41 = vld [vmem:[#allocation7 + $0x220] sm:$0xff] }
 0xd3e   :  { %v1415_v4 = vmul.f32 %v1404_v1, %v2921_v45  ;;  %1769 = vmatpush.msra.mxu3 %v1690_v56  ;;  %v1688_v63 = vld [vmem:[#allocation7 + $0x2a0] sm:$0xff]  ;;  %v1717_v1 = vld [vmem:[#allocation7 + $0x388] sm:$0xff]  ;;  %1796 = vmatpush.msra.mxu0 %v1702_v61 }
 0xd3f   :  { %v1408_v59 = vmul.f32 0.5, %v1407_v2  ;;  %v1671_v2 = vld [vmem:[#allocation7 + $0x218] sm:$0xff] }
 0xd40   :  { %v1420_v5 = vmul.f32 %v2142_v0, %v1415_v4  ;;  %1770 = vmatpush.msra.mxu3 %v1689_v40  ;;  %v1687_v4 = vld [vmem:[#allocation7 + $0x298] sm:$0xff] }
 0xd41   :  { %v1409_v29 = vsub.f32 1.5, %v1408_v59  ;;  %v1716_v59 = vld [vmem:[#allocation7 + $0x380] sm:$0xff] }
 0xd42   :  { %v3107_v6 = vadd.f32 %v2143_v58, %v1420_v5  ;;  %1771 = vmatpush.msra.mxu3 %v1688_v63  ;;  %v2117_v5 = vld [vmem:[%s3300_s11 + $0x4] sm:$0xf] }
 0xd43   :  { %v1410_v8 = vmul.f32 %v2214_v62, %v1409_v29  ;;  %v1670_v29 = vld [vmem:[#allocation7 + $0x210] sm:$0xff]  ;;  %v1498_v21 = vperm.slane %v2117_v5, 3  ;;  %v1495_v7 = vperm.slane %v2117_v5, 0 }
 0xd44   :  { %1519 = vmatmul.f32.vlgmr.msra.gmra.mxu2 %v3107_v6  ;;  %1542 = vmatmul.f32.vlgmr.msrb.gmra.mxu3 %v3107_v6 }
 0xd45   :  { %v1414_v9 = vsel %vm1413_vm12, %v2214_v62, %v1410_v8  ;;  %1565 = vmatmul.f32.vlgmr.msrb.gmra.mxu0 %v3107_v6  ;;  %1588 = vmatmul.f32.vlgmr.msra.gmra.mxu1 %v3107_v6  ;;  %v1718_v62 = vld [vmem:[#allocation7 + $0x390] sm:$0xff] }
 0xd46   :  { %v1416_v45 = vmul.f32 %v1414_v9, %v2926_v18  ;;  %v1682_v18 = vld [vmem:[#allocation7 + $0x270] sm:$0xff]  ;;  %1819 = vmatpush.msrb.mxu1 %v1718_v62  ;;  %1772 = vmatpush.msra.mxu3 %v1687_v4  ;;  %v1669_v9 = vld [vmem:[#allocation7 + $0x208] sm:$0xff] }
 0xd47   :  { %1738 = vmatpush.msrb.mxu2 %v1682_v18  ;;  %v1686_v8 = vld [vmem:[#allocation7 + $0x290] sm:$0xff] }
 0xd48   :  { %v1421_v10 = vmul.f32 %v2142_v0, %v1416_v45  ;;  %v1701_v0 = vld [vmem:[#allocation7 + $0x308] sm:$0xff]  ;;  %1820 = vmatpush.msrb.mxu1 %v1717_v1  ;;  %1773 = vmatpush.msra.mxu3 %v1686_v8 }
 0xd49   :  { %1739 = vmatpush.msrb.mxu2 %v1681_v23  ;;  %1797 = vmatpush.msra.mxu0 %v1701_v0  ;;  %v1685_v45 = vld [vmem:[#allocation7 + $0x288] sm:$0xff]  ;;  %v1496_v23 = vperm.slane %v2117_v5, 1 }
 0xd4a   :  { %v3114_v11 = vadd.f32 %v2143_v58, %v1421_v10  ;;  %v1700_v58 = vld [vmem:[#allocation7 + $0x300] sm:$0xff]  ;;  %1821 = vmatpush.msrb.mxu1 %v1716_v59  ;;  %v1497_v10 = vperm.slane %v2117_v5, 2  ;;  %1774 = vmatpush.msra.mxu3 %v1685_v45 }
 0xd4b   :  { %1740 = vmatpush.msrb.mxu2 %v1680_v17  ;;  %1798 = vmatpush.msra.mxu0 %v1700_v58 }
 0xd4c   :  { %1522 = vmatmul.f32.gmra.mxu2 %v3114_v11  ;;  %1545 = vmatmul.f32.gmra.mxu3 %v3114_v11 }
 0xd4d   :  { %1568 = vmatmul.f32.gmra.mxu0 %v3114_v11  ;;  %1591 = vmatmul.f32.gmra.mxu1 %v3114_v11 }
 0xd4e   :  { %1741 = vmatpush.msrb.mxu2 %v1679_v33  ;;  %1775 = vmatpush.msra.mxu3 %v1684_v13 }
 0xd50   :  { %1742 = vmatpush.msrb.mxu2 %v1678_v36 }
 0xd52   :  { %1743 = vmatpush.msrb.mxu2 %v1677_v22 }
 0xd54   :  { %1744 = vmatpush.msrb.mxu2 %v1676_v49 }
 0xd56   :  { %1745 = vmatpush.msrb.mxu2 %v1675_v30 }
 0xd58   :  { %1746 = vmatpush.msrb.mxu2 %v1674_v27 }
 0xd5a   :  { %1747 = vmatpush.msrb.mxu2 %v1673_v60 }
 0xd5c   :  { %1748 = vmatpush.msrb.mxu2 %v1672_v41 }
 0xd5e   :  { %1749 = vmatpush.msrb.mxu2 %v1671_v2 }
 0xd60   :  { %1750 = vmatpush.msrb.mxu2 %v1670_v29 }
 0xd62   :  { %1751 = vmatpush.msrb.mxu2 %v1669_v9 }
 0xd64   :  { %1752 = vmatpush.msrb.mxu2 %v1668_v12 }
 0xdc2   :  { %v1566_v19 = vpop.f32.mrf.mxu0  ;;  %v1589_v18 = vpop.f32.mrf.mxu1 }
 0xdc3   :  { %v3123_v3 = vadd.f32 %v1566_v19, %v1497_v10  ;;  %v3125_v20 = vadd.f32 %v1589_v18, %v1498_v21 }
 0xdc5   :  { %v1597_v26 = vmul.f32 %v3123_v3, %v3123_v3  ;;  %v1598_v24 = vmul.f32 %v3125_v20, %v3125_v20 }
 0xdc7   :  { %v1605_v25 = vmul.f32 %v1597_v26, %v3123_v3  ;;  %v1606_v17 = vmul.f32 %v1598_v24, %v3125_v20  ;;  %v1520_v31 = vpop.f32.mrf.mxu2  ;;  %v1543_v44 = vpop.f32.mrf.mxu3 }
 0xdc8   :  { %v3133_v15 = vadd.f32 %v1520_v31, %v1495_v7  ;;  %v3135_v33 = vadd.f32 %v1543_v44, %v1496_v23 }
 0xdc9   :  { %v1613_v39 = vmul.f32 0.044715, %v1605_v25  ;;  %v1614_v16 = vmul.f32 0.044715, %v1606_v17 }
 0xdca   :  { %v1595_v35 = vmul.f32 %v3133_v15, %v3133_v15  ;;  %v1596_v36 = vmul.f32 %v3135_v33, %v3135_v33  ;;  %v1569_v37 = vpop.f32.mrf.mxu0  ;;  %v1592_v38 = vpop.f32.mrf.mxu1 }
 0xdcb   :  { %v1621_v42 = vadd.f32 %v1613_v39, %v3123_v3  ;;  %v1622_v22 = vadd.f32 %v1614_v16, %v3125_v20  ;;  %v3143_v46 = vadd.f32 %v1569_v37, %v1497_v10  ;;  %v3145_v47 = vadd.f32 %v1592_v38, %v1498_v21 }
 0xdcc   :  { %v1603_v48 = vmul.f32 %v1595_v35, %v3133_v15  ;;  %v1604_v49 = vmul.f32 %v1596_v36, %v3135_v33 }
 0xdcd   :  { %v1629_v50 = vmul.f32 0.7978846, %v1621_v42  ;;  %v1630_v51 = vmul.f32 0.7978846, %v1622_v22  ;;  %v1601_v52 = vmul.f32 %v3143_v46, %v3143_v46  ;;  %v1602_v30 = vmul.f32 %v3145_v47, %v3145_v47 }
 0xdce   :  { %v1611_v53 = vmul.f32 0.044715, %v1603_v48  ;;  %v1612_v54 = vmul.f32 0.044715, %v1604_v49 }
 0xdcf   :  { %2215 = vtanh.f32 %v1629_v50  ;;  %v1609_v55 = vmul.f32 %v1601_v52, %v3143_v46  ;;  %v1610_v27 = vmul.f32 %v1602_v30, %v3145_v47  ;;  %v1523_v56 = vpop.f32.mrf.mxu2  ;;  %v1546_v28 = vpop.f32.mrf.mxu3 }
 0xdd0   :  { %2217 = vtanh.f32 %v1630_v51  ;;  %v1619_v57 = vadd.f32 %v1611_v53, %v3133_v15  ;;  %v1620_v60 = vadd.f32 %v1612_v54, %v3135_v33  ;;  %v1524_v40 = vadd.f32 %v1523_v56, %v1495_v7 }
 0xdd1   :  { %v1547_v61 = vadd.f32 %v1546_v28, %v1496_v23  ;;  %v1617_v62 = vmul.f32 0.044715, %v1609_v55  ;;  %v1618_v41 = vmul.f32 0.044715, %v1610_v27 }
 0xdd2   :  { %v1627_v63 = vmul.f32 0.7978846, %v1619_v57  ;;  %v1628_v0 = vmul.f32 0.7978846, %v1620_v60  ;;  %v1599_v1 = vmul.f32 %v1524_v40, %v1524_v40 }
 0xdd3   :  { %v1600_v2 = vmul.f32 %v1547_v61, %v1547_v61  ;;  %v1625_v4 = vadd.f32 %v1617_v62, %v3143_v46  ;;  %v1626_v58 = vadd.f32 %v1618_v41, %v3145_v47 }
 0xdd4   :  { %2219 = vtanh.f32 %v1627_v63  ;;  %v1607_v59 = vmul.f32 %v1599_v1, %v1524_v40 }
 0xdd5   :  { %v2216_v5 = vpop.eup %2215  ;;  %2221 = vtanh.f32 %v1628_v0  ;;  %v1608_v29 = vmul.f32 %v1600_v2, %v1547_v61  ;;  %v1633_v8 = vmul.f32 0.7978846, %v1625_v4  ;;  %v1634_v9 = vmul.f32 0.7978846, %v1626_v58 }
 0xdd6   :  { %v2218_v45 = vpop.eup %2217  ;;  %v1645_v10 = vadd.f32 1.0, %v2216_v5  ;;  %v1615_v21 = vmul.f32 0.044715, %v1607_v59 }
 0xdd7   :  { %v1646_v12 = vadd.f32 1.0, %v2218_v45  ;;  %2223 = vtanh.f32 %v1633_v8  ;;  %v1616_v13 = vmul.f32 0.044715, %v1608_v29 }
 0xdd8   :  { %v1653_v19 = vmul.f32 0.5, %v1645_v10  ;;  %2225 = vtanh.f32 %v1634_v9  ;;  %v1623_v18 = vadd.f32 %v1615_v21, %v1524_v40 }
 0xdd9   :  { %v1654_v7 = vmul.f32 0.5, %v1646_v12  ;;  %v1624_v23 = vadd.f32 %v1616_v13, %v1547_v61 }
 0xdda   :  { %v2220_v26 = vpop.eup %2219  ;;  %v1661_v24 = vmul.f32 %v1653_v19, %v3123_v3  ;;  %v1631_v25 = vmul.f32 0.7978846, %v1623_v18 }
 0xddb   :  { %v2222_v17 = vpop.eup %2221  ;;  %v1662_v31 = vmul.f32 %v1654_v7, %v3125_v20  ;;  %v1643_v44 = vadd.f32 1.0, %v2220_v26  ;;  %v1632_v39 = vmul.f32 0.7978846, %v1624_v23  ;;  %v1928_v26 = vld [vmem:[%s3305_s16 + $0x70] sm:$0xff] }
 0xddc   :  { %1799 = vmatmul.f32.vlgmr.msra.gmra.mxu0 %v1661_v24  ;;  %v1644_v16 = vadd.f32 1.0, %v2222_v17  ;;  %2227 = vtanh.f32 %v1631_v25  ;;  %v1927_v25 = vld [vmem:[%s3305_s16 + $0x68] sm:$0xff] }
 0xddd   :  { %v2224_v35 = vpop.eup %2223  ;;  %1822 = vmatmul.f32.vlgmr.msrb.gmra.mxu1 %v1662_v31  ;;  %v1651_v36 = vmul.f32 0.5, %v1643_v44  ;;  %2229 = vtanh.f32 %v1632_v39  ;;  %v1926_v39 = vld [vmem:[%s3305_s16 + $0x60] sm:$0xff] }
 0xdde   :  { %v2226_v37 = vpop.eup %2225  ;;  %v1652_v38 = vmul.f32 0.5, %v1644_v16  ;;  %v1649_v42 = vadd.f32 1.0, %v2224_v35 }
 0xddf   :  { %v1659_v22 = vmul.f32 %v1651_v36, %v3133_v15  ;;  %v1650_v48 = vadd.f32 1.0, %v2226_v37  ;;  %v1924_v36 = vld [vmem:[%s3305_s16 + $0x50] sm:$0xff] }
 0xde0   :  { %v1660_v3 = vmul.f32 %v1652_v38, %v3135_v33  ;;  %v1657_v49 = vmul.f32 0.5, %v1649_v42  ;;  %v2144_v33 = vld [vmem:[%s3302_s13 + $0x1] ss:$0 sm:$0xff]  ;;  %v1923_v38 = vld [vmem:[%s3305_s16 + $0x48] sm:$0xff] }
 0xde1   :  { %1753 = vmatmul.f32.vlgmr.msrb.gmra.mxu2 %v1659_v22  ;;  %v1658_v20 = vmul.f32 0.5, %v1650_v48  ;;  %v1922_v48 = vld [vmem:[%s3305_s16 + $0x40] sm:$0xff] }
 0xde2   :  { %v2228_v50 = vpop.eup %2227  ;;  %1776 = vmatmul.f32.vlgmr.msra.gmra.mxu3 %v1660_v3  ;;  %v1665_v51 = vmul.f32 %v1657_v49, %v3143_v46 }
 0xde3   :  { %v2230_v52 = vpop.eup %2229  ;;  %v1666_v30 = vmul.f32 %v1658_v20, %v3145_v47  ;;  %v1647_v53 = vadd.f32 1.0, %v2228_v50  ;;  %v1921_v20 = vld [vmem:[%s3305_s16 + $0x38] sm:$0xff] }
 0xde4   :  { %1802 = vmatmul.f32.gmra.mxu0 %v1665_v51  ;;  %v1648_v54 = vadd.f32 1.0, %v2230_v52  ;;  %v1920_v51 = vld [vmem:[%s3305_s16 + $0x30] sm:$0xff] }
 0xde5   :  { %1825 = vmatmul.f32.gmra.mxu1 %v1666_v30  ;;  %v1655_v55 = vmul.f32 0.5, %v1647_v53  ;;  %v1886_v53 = vshrl.u32 %v113_v32, 7 }
 0xde6   :  { %v1656_v27 = vmul.f32 0.5, %v1648_v54  ;;  %v1919_v54 = vld [vmem:[%s3305_s16 + $0x28] sm:$0xff] }
 0xde7   :  { %v1663_v15 = vmul.f32 %v1655_v55, %v1524_v40  ;;  %v1887_v32 = vmul.u32 8, %v1886_v53 }
 0xde8   :  { %v1664_v56 = vmul.f32 %v1656_v27, %v1547_v61  ;;  %v1918_v27 = vld [vmem:[%s3305_s16 + $0x20] sm:$0xff] }
 0xde9   :  { %1756 = vmatmul.f32.gmra.mxu2 %v1663_v15  ;;  %v2145_v15 = vld [vmem:[%s3303_s14 + $0x1] ss:$0 sm:$0xff]  ;;  %vm1888_vm3 = vcmp.eq.s32.totalorder %v2511_v34, %v1887_v32  ;;  %v1970_v34 = vld [vmem:[%s3307_s18 + $0x78] sm:$0xff] }
 0xdea   :  { %1779 = vmatmul.f32.gmra.mxu3 %v1664_v56  ;;  %1975 = vmatpush.msrb.mxu0 %v1970_v34 }
 0xe59   :  { %v1800_v60 = vpop.f32.mrf.mxu0 }
 0xe5a   :  { %v1823_v47 = vpop.f32.mrf.mxu1 }
 0xe61   :  { %v1803_v4 = vpop.f32.mrf.mxu0 }
 0xe62   :  { %v1826_v59 = vpop.f32.mrf.mxu1 }
 0xe64   :  { %v1754_v28 = vpop.f32.mrf.mxu2 }
 0xe65   :  { %v1755_v57 = vadd.f32 %v2144_v33, %v1754_v28  ;;  %v1777_v46 = vpop.f32.mrf.mxu3  ;;  %v1917_v28 = vld [vmem:[%s3305_s16 + $0x18] sm:$0xff] }
 0xe67   :  { %v1778_v62 = vadd.f32 %v1777_v46, %v1755_v57  ;;  %v1916_v46 = vld [vmem:[%s3305_s16 + $0x10] sm:$0xff] }
 0xe69   :  { %v1801_v41 = vadd.f32 %v1800_v60, %v1778_v62  ;;  %v2146_v62 = vld [vmem:[%s3304_s15 + $0x1] ss:$0 sm:$0xff] }
 0xe6b   :  { %v1824_v63 = vadd.f32 %v1823_v47, %v1801_v41  ;;  %v1915_v41 = vld [vmem:[%s3305_s16 + $0x8] sm:$0xff] }
 0xe6c   :  { %v1757_v0 = vpop.f32.mrf.mxu2 }
 0xe6d   :  { %v1758_v1 = vadd.f32 %v2144_v33, %v1757_v0  ;;  %v1829_v2 = vadd.f32 %v1824_v63, %v3107_v6  ;;  %v1780_v40 = vpop.f32.mrf.mxu3 }
 0xe6f   :  { %v1781_v61 = vadd.f32 %v1780_v40, %v1758_v1  ;;  %1835 = vadd.xlane.f32.xlu0 %v1829_v2  ;;  %v2121_v1 = vsel %vm1888_vm3, 1.0, %v2353_v43  ;;  %v1969_v40 = vld [vmem:[%s3307_s18 + $0x70] sm:$0xff]  ;;  %v1968_v43 = vld [vmem:[%s3307_s18 + $0x68] sm:$0xff] }
 0xe70   :  { %1976 = vmatpush.msrb.mxu0 %v1969_v40 }
 0xe71   :  { %v1804_v58 = vadd.f32 %v1803_v4, %v1781_v61  ;;  %v1967_v61 = vld [vmem:[%s3307_s18 + $0x60] sm:$0xff]  ;;  %v1966_v4 = vld [vmem:[%s3307_s18 + $0x58] sm:$0xff] }
 0xe72   :  { %1977 = vmatpush.msrb.mxu0 %v1968_v43 }
 0xe73   :  { %v1827_v5 = vadd.f32 %v1826_v59, %v1804_v58  ;;  %v1965_v58 = vld [vmem:[%s3307_s18 + $0x50] sm:$0xff]  ;;  %v1964_v59 = vld [vmem:[%s3307_s18 + $0x48] sm:$0xff] }
 0xe74   :  { %1978 = vmatpush.msrb.mxu0 %v1967_v61 }
 0xe75   :  { %v1830_v29 = vadd.f32 %v1827_v5, %v3114_v11  ;;  %v1929_v11 = vld [vmem:[%s3305_s16 + $0x78] sm:$0xff]  ;;  %v1963_v5 = vld [vmem:[%s3307_s18 + $0x40] sm:$0xff] }
 0xe76   :  { %1934 = vmatpush.msrb.mxu3 %v1929_v11  ;;  %1979 = vmatpush.msrb.mxu0 %v1966_v4  ;;  %v2148_v11 = vld [vmem:[%s3308_s19] ss:$0 sm:$0xff] }
 0xe77   :  { %1837 = vadd.xlane.f32.xlu2 %v1830_v29 }
 0xe78   :  { %1935 = vmatpush.msrb.mxu3 %v1928_v26  ;;  %1980 = vmatpush.msrb.mxu0 %v1965_v58 }
 0xe7a   :  { %1936 = vmatpush.msrb.mxu3 %v1927_v25  ;;  %1981 = vmatpush.msrb.mxu0 %v1964_v59 }
 0xe7c   :  { %1937 = vmatpush.msrb.mxu3 %v1926_v39  ;;  %1982 = vmatpush.msrb.mxu0 %v1963_v5 }
 0xee2   :  { %v1836_v8 = vpop.xlane.xlu0 %1835 }
 0xee3   :  { %v1839_v9 = vmul.f32 %v1836_v8, %v2475_v14  ;;  %v1961_v8 = vld [vmem:[%s3307_s18 + $0x30] sm:$0xff] }
 0xee5   :  { %v1841_v45 = vsub.f32 %v1829_v2, %v1839_v9  ;;  %v1914_v2 = vld [vmem:[%s3305_s16] sm:$0xff]  ;;  %v1960_v9 = vld [vmem:[%s3307_s18 + $0x28] sm:$0xff] }
 0xee7   :  { %v1843_v10 = vmul.f32 %v1841_v45, %v1841_v45 }
 0xee9   :  { %1845 = vadd.xlane.f32.xlu2 %v1843_v10  ;;  %v1959_v10 = vld [vmem:[%s3307_s18 + $0x20] sm:$0xff] }
 0xeea   :  { %v1838_v21 = vpop.xlane.xlu2 %1837 }
 0xeeb   :  { %v1840_v12 = vmul.f32 %v1838_v21, %v2475_v14  ;;  %v1958_v21 = vld [vmem:[%s3307_s18 + $0x18] sm:$0xff] }
 0xeed   :  { %v1842_v6 = vsub.f32 %v1830_v29, %v1840_v12  ;;  %v1962_v29 = vld [vmem:[%s3307_s18 + $0x38] sm:$0xff]  ;;  %v1957_v12 = vld [vmem:[%s3307_s18 + $0x10] sm:$0xff] }
 0xeee   :  { %1983 = vmatpush.msrb.mxu0 %v1962_v29 }
 0xeef   :  { %v1844_v13 = vmul.f32 %v1842_v6, %v1842_v6 }
 0xef0   :  { %1984 = vmatpush.msrb.mxu0 %v1961_v8 }
 0xef1   :  { %1847 = vadd.xlane.f32.xlu1 %v1844_v13  ;;  %v1955_v13 = vld [vmem:[%s3307_s18] sm:$0xff] }
 0xef2   :  { %1985 = vmatpush.msrb.mxu0 %v1960_v9 }
 0xef4   :  { %1986 = vmatpush.msrb.mxu0 %v1959_v10 }
 0xef6   :  { %1987 = vmatpush.msrb.mxu0 %v1958_v21 }
 0xef8   :  { %1988 = vmatpush.msrb.mxu0 %v1957_v12 }
 0xf5c   :  { %v1846_v19 = vpop.xlane.xlu2 %1845 }
 0xf5d   :  { %v1849_v18 = vmul.f32 %v1846_v19, %v2475_v14  ;;  %v2147_v19 = vld [vmem:[%s3306_s17] ss:$0 sm:$0xff]  ;;  %s2354_s17 = smov [#allocation8]  }
 0xf5f   :  { %v1851_v7 = vadd.f32 1e-12, %v1849_v18 }
 0xf61   :  { %2231 = vrsqrt.f32 %v1851_v7  ;;  %vm1859_vm14 = vweird.f32 %v1851_v7 }
 0xf64   :  { %v1848_v23 = vpop.xlane.xlu1 %1847 }
 0xf65   :  { %v1850_v24 = vmul.f32 %v1848_v23, %v2475_v14  ;;  %v1925_v14 = vld [vmem:[%s3305_s16 + $0x58] sm:$0xff] }
 0xf66   :  { %1938 = vmatpush.msrb.mxu3 %v1925_v14 }
 0xf67   :  { %v2232_v17 = vpop.eup %2231  ;;  %v1852_v31 = vadd.f32 1e-12, %v1850_v24 }
 0xf68   :  { %v1854_v44 = vmul.f32 %v2232_v17, %v1851_v7  ;;  %1939 = vmatpush.msrb.mxu3 %v1924_v36  ;;  %vm1860_vm13 = vweird.f32 %v2232_v17 }
 0xf69   :  { %2233 = vrsqrt.f32 %v1852_v31  ;;  %vm1861_vm15 = vmor %vm1859_vm14, %vm1860_vm13  ;;  %vm1869_vm1 = vweird.f32 %v1852_v31 }
 0xf6a   :  { %v1855_v16 = vmul.f32 %v2232_v17, %v1854_v44  ;;  %1940 = vmatpush.msrb.mxu3 %v1923_v38 }
 0xf6c   :  { %v1856_v35 = vmul.f32 0.5, %v1855_v16  ;;  %1941 = vmatpush.msrb.mxu3 %v1922_v48 }
 0xf6e   :  { %v1857_v37 = vsub.f32 1.5, %v1856_v35  ;;  %1942 = vmatpush.msrb.mxu3 %v1921_v20 }
 0xf6f   :  { %v2234_v42 = vpop.eup %2233 }
 0xf70   :  { %v1864_v22 = vmul.f32 %v2234_v42, %v1852_v31  ;;  %v1858_v3 = vmul.f32 %v2232_v17, %v1857_v37  ;;  %vm1870_vm0 = vweird.f32 %v2234_v42  ;;  %1943 = vmatpush.msrb.mxu3 %v1920_v51 }
 0xf71   :  { %vm1871_vm2 = vmor %vm1869_vm1, %vm1870_vm0 }
 0xf72   :  { %v1865_v49 = vmul.f32 %v2234_v42, %v1864_v22  ;;  %v1862_v52 = vsel %vm1861_vm15, %v2232_v17, %v1858_v3  ;;  %1944 = vmatpush.msrb.mxu3 %v1919_v54 }
 0xf73   :  { %v1873_v56 = vmul.f32 %v1862_v52, %v1841_v45 }
 0xf74   :  { %v1866_v50 = vmul.f32 0.5, %v1865_v49  ;;  %1945 = vmatpush.msrb.mxu3 %v1918_v27 }
 0xf75   :  { %v1878_v47 = vmul.f32 %v2145_v15, %v1873_v56 }
 0xf76   :  { %v1867_v30 = vsub.f32 1.5, %v1866_v50  ;;  %1946 = vmatpush.msrb.mxu3 %v1917_v28 }
 0xf77   :  { %v1883_v0 = vadd.f32 %v2146_v62, %v1878_v47 }
 0xf78   :  { %v1868_v55 = vmul.f32 %v2234_v42, %v1867_v30  ;;  %1947 = vmatpush.msrb.mxu3 %v1916_v46 }
 0xf7a   :  { %v1872_v33 = vsel %vm1871_vm2, %v2234_v42, %v1868_v55  ;;  %1948 = vmatpush.msrb.mxu3 %v1915_v41 }
 0xf7b   :  { %v1874_v57 = vmul.f32 %v1872_v33, %v1842_v6  ;;  %v1956_v6 = vld [vmem:[%s3307_s18 + $0x8] sm:$0xff]  ;;  %s2026_s18 = sshll.u32 %s2354_s17, 4  ;;  %s2027_s18 = int_to_ptr.vmem [resolvable:$true] %s2026_s18 }
 0xf7c   :  { %1949 = vmatpush.msrb.mxu3 %v1914_v2  ;;  %1989 = vmatpush.msrb.mxu0 %v1956_v6 }
 0xf7d   :  { %v1879_v60 = vmul.f32 %v2145_v15, %v1874_v57 }
 0xf7e   :  { %1990 = vmatpush.msrb.mxu0 %v1955_v13 }
 0xf7f   :  { %v1884_v63 = vadd.f32 %v2146_v62, %v1879_v60 }
 0xf81   :  { %1908 = vmatpush.msra.mxu2 %v1884_v63 }
 0xf83   :  { %1909 = vmatpush.msra.mxu2 %v1883_v0 }
 0xf84   :  { %2122 = vmatmul.msk.f32.vlgmr.msra.gmra.mxu2 %vm342_vm8, %v2121_v1  ;;  %vm1995_vm8 = vcmask 1041408  }
0x1007   :  { %v1911_v45 = vpop.f32.mrf.mxu2 }
0x1008   :  { %1950 = vmatmul.f32.vlgmr.msrb.gmra.mxu3 %v1911_v45 }
0x108b   :  { %v1951_v18 = vpop.f32.mrf.mxu3 }
0x108c   :  { %v1952_v7 = vadd.f32 %v2147_v19, %v1951_v18 }
0x108e   :  { %2235 = vtanh.f32 %v1952_v7 }
0x1094   :  { %v2236_v23 = vpop.eup %2235 }
0x1095   :  { %1991 = vmatmul.f32.vlgmr.msrb.gmra.mxu0 %v2236_v23 }
0x1112   :  { %v1992_v26 = vpop.f32.mrf.mxu0 }
0x1113   :  { %v1993_v24 = vadd.f32 %v2148_v11, %v1992_v26 }
0x1115   :  { %v1996_v25 = vsel %vm1995_vm8, %v1993_v24, -inf }
0x1116   :  { %1997 = vmax.xlane.f32.xlu0 %v1996_v25 }
0x1189   :  { %v1998_v17 = vpop.xlane.xlu0 %1997 }
0x118a   :  { %v1999_v31 = vsub.f32 %v1993_v24, %v1998_v17 }
0x118c   :  { %v2000_v44 = vmul.f32 1.442695, %v1999_v31 }
0x118e   :  { %2237 = vpow2.f32 %v2000_v44 }
0x1194   :  { %v2238_v39 = vpop.eup %2237 }
0x1195   :  { %v2002_v16 = vsel %vm1995_vm8, %v2238_v39, 0.0 }
0x1196   :  { %2003 = vadd.xlane.f32.xlu1 %v2002_v16 }
0x1209   :  { %v2004_v14 = vpop.xlane.xlu1 %2003 }
0x120a   :  { %2239 = vrcp.f32 %v2004_v14  ;;  %v2016_v38 = vand.u32 2147483648, %v2004_v14  ;;  %v2014_v22 = vand.u32 2147483647, %v2004_v14  ;;  %vm2010_vm5 = vweird.f32 %v2004_v14 }
0x120c   :  { %v2017_v3 = vor.u32 1.1754944e-38, %v2016_v38  ;;  %vm2015_vm7 = vcmp.eq.f32.partialorder %v2014_v22, 8.507059e+37 }
0x1210   :  { %v2240_v35 = vpop.eup %2239 }
0x1211   :  { %v2006_v36 = vmul.f32 %v2240_v35, %v2004_v14  ;;  %vm2011_vm4 = vweird.f32 %v2240_v35 }
0x1212   :  { %vm2012_vm6 = vmor %vm2010_vm5, %vm2011_vm4 }
0x1213   :  { %v2007_v37 = vsub.f32 1.0, %v2006_v36 }
0x1215   :  { %v2008_v42 = vmul.f32 %v2240_v35, %v2007_v37 }
0x1217   :  { %v2009_v48 = vadd.f32 %v2240_v35, %v2008_v42 }
0x1219   :  { %v2013_v49 = vsel %vm2012_vm6, %v2240_v35, %v2009_v48 }
0x121a   :  { %v2018_v20 = vsel %vm2015_vm7, %v2017_v3, %v2013_v49 }
0x121b   :  { %v2019_v50 = vmul.f32 %v2238_v39, %v2018_v20 }
0x121d   :  { %2020 = vst [vmem:[#allocation8] sm:$0x3] %v2019_v50 }
0x121e   :  { %2031 = dma.vmem_to_hbm [thread:$0]  %s2027_s18, 32, %s2029_s25, [#allocation4]  }
0x121f   :  { %2343 = dma.done.wait [#allocation4], 32  }
0x1220   :  { %2344 = vsyncadd [#allocation4], 4294967264 }
0x1221   :  { %2036 = vsyncpa [#allocation3], 1 }
0x1222   :  { %2037 = vsyncpa [#allocation6], 1 }
0x1223   :  { %2038 = vsyncpa [#allocation4], 1 }

</bundles_post_ra>
